<compile_context>
chip_gen: v7x
topology: tpu7x:2x2x1
jax: 0.10.0
libtpu: 0.0.40
codegen_flags: <defaults>
</compile_context>

<pallas_src>
import jax
import jax.numpy as jnp
from jax import lax
from jax.experimental import pallas as pl
from jax.experimental.pallas import tpu as pltpu

# ----------------------------- config ---------------------------------------
B = 2                 # batch of graphs
N = 8                 # max nodes per graph
INPUT_DIM = 16
HIDDEN_DIM = 32
EMBEDDING_DIM = 64
NUM_LAYERS = 3        # conv_first + 1 conv_block + conv_last
LABEL_DIM = 8
PRED_INPUT_DIM = HIDDEN_DIM * (NUM_LAYERS - 1) + EMBEDDING_DIM   # 128 (lane-dense)
LANE = 128
BN_EPS = 1e-5


# ----------------------------- kernel ---------------------------------------
def gcn_set2set_kernel(
    x_ref, adj_ref,
    # conv_first MLP
    w1f_ref, b1f_ref, w2f_ref, b2f_ref,
    # conv_block[0] MLP
    w1b_ref, b1b_ref, w2b_ref, b2b_ref,
    # conv_last MLP
    w1l_ref, b1l_ref, w2l_ref, b2l_ref,
    # Set2Set LSTM (weights pre-transposed to (in, 4*hidden); biases pre-summed)
    wih_ref, whh_ref, blstm_ref,
    # Set2Set output projection Linear(2D, D)
    wp_ref, bp_ref,
    # pred_model Linear(D, label_dim) lane-padded to 128 output cols
    wm_ref, bm_ref,
    out_ref,
):
    x = x_ref[...]
    adj = adj_ref[...]
    D = PRED_INPUT_DIM

    def sigmoid(z):
        # 1 / (1 + exp(-z)) via EUP reciprocal
        return pl.reciprocal(1.0 + jnp.exp(-z), approx=False)

    def mlp(h, w1, b1, w2, b2):
        # fold batch into rows -> one lane-dense MXU matmul per linear
        cin = h.shape[-1]
        h2 = h.reshape(B * N, cin)
        h2 = jnp.maximum(jnp.dot(h2, w1, preferred_element_type=jnp.float32) + b1, 0.0)
        h2 = jnp.dot(h2, w2, preferred_element_type=jnp.float32) + b2
        return h2.reshape(B, N, w2.shape[-1])

    def normalize_embedding(p):
        # (p - mean(p, dim=0)) / std(p, dim=0), unbiased std over the batch dim
        mu = jnp.mean(p, axis=0, keepdims=True)
        d = p - mu
        var = jnp.sum(d * d, axis=0, keepdims=True) / (B - 1)
        return d * lax.rsqrt(var)

    def apply_bn(p):
        # fresh train-mode BatchNorm1d(N): per-node stats over (batch, feature)
        cnt = B * p.shape[-1]
        s = jnp.sum(p, axis=2, keepdims=True)       # (B, N, 1)
        s = jnp.sum(s, axis=0, keepdims=True)       # (1, N, 1)
        mu = s / cnt
        d = p - mu
        v = jnp.sum(d * d, axis=2, keepdims=True)
        v = jnp.sum(v, axis=0, keepdims=True)
        return d * lax.rsqrt(v / cnt + BN_EPS)

    def graph_conv(h, w1, b1, w2, b2):
        agg = jnp.einsum("bij,bjc->bic", adj, h, preferred_element_type=jnp.float32)
        return normalize_embedding(mlp(agg, w1, b1, w2, b2))

    # ---------------- gcn_forward ----------------
    h1 = graph_conv(x, w1f_ref[...], b1f_ref[...], w2f_ref[...], b2f_ref[...])
    h1 = apply_bn(jnp.maximum(h1, 0.0))
    h2 = graph_conv(h1, w1b_ref[...], b1b_ref[...], w2b_ref[...], b2b_ref[...])
    h2 = apply_bn(jnp.maximum(h2, 0.0))
    h3 = graph_conv(h2, w1l_ref[...], b1l_ref[...], w2l_ref[...], b2l_ref[...])
    emb = jnp.concatenate([h1, h2, h3], axis=2)     # (B, N, 128) lane-dense

    # ---------------- Set2Set (N LSTM-attention steps) ----------------
    wih = wih_ref[...]      # (2D, 4D)
    whh = whh_ref[...]      # (D, 4D)
    bl = blstm_ref[...]     # (1, 4D)

    def s2s_step(_, carry):
        h, c, q_star = carry
        gates = (jnp.dot(q_star, wih, preferred_element_type=jnp.float32)
                 + jnp.dot(h, whh, preferred_element_type=jnp.float32) + bl)
        i_g = sigmoid(gates[:, 0 * D:1 * D])
        f_g = sigmoid(gates[:, 1 * D:2 * D])
        g_g = jnp.tanh(gates[:, 2 * D:3 * D])
        o_g = sigmoid(gates[:, 3 * D:4 * D])
        c = f_g * c + i_g * g_g
        h = o_g * jnp.tanh(c)
        q = h                                                   # (B, D)
        # attention scores via VPU reduce (avoid 1-wide MXU output columns)
        e = jnp.sum(emb * q[:, None, :], axis=-1)               # (B, N)
        m = jnp.max(e, axis=1, keepdims=True)
        p = jnp.exp(e - m)
        a = p * pl.reciprocal(jnp.sum(p, axis=1, keepdims=True), approx=False)
        r = jnp.sum(a[:, :, None] * emb, axis=1)                # (B, D)
        q_star = jnp.concatenate([q, r], axis=-1)               # (B, 2D)
        return h, c, q_star

    h0 = jnp.zeros((B, D), jnp.float32)
    c0 = jnp.zeros((B, D), jnp.float32)
    q0 = jnp.zeros((B, 2 * D), jnp.float32)
    _, _, q_star = lax.fori_loop(0, N, s2s_step, (h0, c0, q0), unroll=True)

    s2s_out = jnp.dot(q_star, wp_ref[...], preferred_element_type=jnp.float32) + bp_ref[...]

    # pred_model: weights lane-padded to 128 outputs in the wrapper -> unmasked store
    out_ref[...] = (jnp.dot(s2s_out, wm_ref[...], preferred_element_type=jnp.float32)
                    + bm_ref[...])


# ----------------------------- wrapper ---------------------------------------
def gcn_set2set_forward(x, adj, params):
    """x: (B, N, INPUT_DIM), adj: (B, N, N) -> ypred (B, LABEL_DIM)."""
    vmem = pl.BlockSpec(memory_space=pltpu.MemorySpace.VMEM)
    n_in = 2 + len(params)
    out_pad = pl.pallas_call(
        gcn_set2set_kernel,
        out_shape=jax.ShapeDtypeStruct((B, LANE), jnp.float32),
        in_specs=[vmem] * n_in,
        out_specs=vmem,
    )(x, adj, *params)
    return out_pad[:, :LABEL_DIM]


# ------------------------ deterministic params --------------------------------
def xavier_uniform(key, shape, gain):
    fan_in, fan_out = shape
    bound = gain * (6.0 / (fan_in + fan_out)) ** 0.5
    return jax.random.uniform(key, shape, jnp.float32, -bound, bound)


def make_params(key):
    D = PRED_INPUT_DIM
    gain = 2.0 ** 0.5  # calculate_gain('relu')
    ks = jax.random.split(key, 14)

    # GraphConv MLPs: Linear(Cin, HIDDEN) -> ReLU -> Linear(HIDDEN, Cout); biases 0
    w1f = xavier_uniform(ks[0], (INPUT_DIM, HIDDEN_DIM), gain)
    w2f = xavier_uniform(ks[1], (HIDDEN_DIM, HIDDEN_DIM), gain)
    w1b = xavier_uniform(ks[2], (HIDDEN_DIM, HIDDEN_DIM), gain)
    w2b = xavier_uniform(ks[3], (HIDDEN_DIM, HIDDEN_DIM), gain)
    w1l = xavier_uniform(ks[4], (HIDDEN_DIM, HIDDEN_DIM), gain)
    w2l = xavier_uniform(ks[5], (HIDDEN_DIM, EMBEDDING_DIM), gain)
    zb = lambda c: jnp.zeros((1, c), jnp.float32)

    # Set2Set LSTM(input=2D, hidden=D), gate order [i, f, g, o]; (in, 4*hidden) layout
    s = D ** -0.5
    wih = jax.random.uniform(ks[6], (2 * D, 4 * D), jnp.float32, -s, s)
    whh = jax.random.uniform(ks[7], (D, 4 * D), jnp.float32, -s, s)
    b_ih = jax.random.uniform(ks[8], (1, 4 * D), jnp.float32, -s, s)
    b_hh = jax.random.uniform(ks[9], (1, 4 * D), jnp.float32, -s, s)
    blstm = b_ih + b_hh

    # Set2Set output projection Linear(2D, D)
    sp = (2 * D) ** -0.5
    wp = jax.random.uniform(ks[10], (2 * D, D), jnp.float32, -sp, sp)
    bp = jax.random.uniform(ks[11], (1, D), jnp.float32, -sp, sp)

    # pred_model Linear(D, LABEL_DIM), lane-padded to 128 output cols
    sm = D ** -0.5
    wm = jax.random.uniform(ks[12], (D, LABEL_DIM), jnp.float32, -sm, sm)
    bm = jax.random.uniform(ks[13], (1, LABEL_DIM), jnp.float32, -sm, sm)
    wm_pad = jnp.zeros((D, LANE), jnp.float32).at[:, :LABEL_DIM].set(wm)
    bm_pad = jnp.zeros((1, LANE), jnp.float32).at[:, :LABEL_DIM].set(bm)

    params = (w1f, zb(HIDDEN_DIM), w2f, zb(HIDDEN_DIM),
              w1b, zb(HIDDEN_DIM), w2b, zb(HIDDEN_DIM),
              w1l, zb(HIDDEN_DIM), w2l, zb(EMBEDDING_DIM),
              wih, whh, blstm, wp, bp, wm_pad, bm_pad)
    return params, (wm, bm)


# ------------------------------ reference -------------------------------------
def reference(x, adj, params, wm, bm):
    (w1f, b1f, w2f, b2f, w1b, b1b, w2b, b2b, w1l, b1l, w2l, b2l,
     wih, whh, blstm, wp, bp, _wm_pad, _bm_pad) = params

    def mlp(h, w1, b1, w2, b2):
        return jnp.maximum(h @ w1 + b1, 0.0) @ w2 + b2

    def norm_emb(p):
        mu = jnp.mean(p, axis=0, keepdims=True)
        sd = jnp.std(p, axis=0, keepdims=True, ddof=1)
        return (p - mu) / sd

    def bn(p):
        mu = jnp.mean(p, axis=(0, 2), keepdims=True)
        var = jnp.mean((p - mu) ** 2, axis=(0, 2), keepdims=True)
        return (p - mu) / jnp.sqrt(var + BN_EPS)

    def conv(h, w1, b1, w2, b2):
        agg = jnp.einsum("bij,bjc->bic", adj, h)
        return norm_emb(mlp(agg, w1, b1, w2, b2))

    h1 = bn(jax.nn.relu(conv(x, w1f, b1f, w2f, b2f)))
    h2 = bn(jax.nn.relu(conv(h1, w1b, b1b, w2b, b2b)))
    h3 = conv(h2, w1l, b1l, w2l, b2l)
    emb = jnp.concatenate([h1, h2, h3], axis=2)

    D = PRED_INPUT_DIM
    h = jnp.zeros((B, D), jnp.float32)
    c = jnp.zeros((B, D), jnp.float32)
    q_star = jnp.zeros((B, 2 * D), jnp.float32)
    for _ in range(N):
        gates = q_star @ wih + h @ whh + blstm
        i_g = jax.nn.sigmoid(gates[:, :D])
        f_g = jax.nn.sigmoid(gates[:, D:2 * D])
        g_g = jnp.tanh(gates[:, 2 * D:3 * D])
        o_g = jax.nn.sigmoid(gates[:, 3 * D:])
        c = f_g * c + i_g * g_g
        h = o_g * jnp.tanh(c)
        q = h
        e = jnp.einsum("bnd,bd->bn", emb, q)
        a = jax.nn.softmax(e, axis=1)
        r = jnp.einsum("bn,bnd->bd", a, emb)
        q_star = jnp.concatenate([q, r], axis=-1)
    s2s_out = q_star @ wp + bp
    return s2s_out @ wm + bm


if __name__ == "__main__":
    key = jax.random.PRNGKey(0)
    k_x, k_adj, k_p = jax.random.split(key, 3)

    x = jax.random.normal(k_x, (B, N, INPUT_DIM), jnp.float32)
    adj = (jax.random.uniform(k_adj, (B, N, N)) > 0.5).astype(jnp.float32)
    adj = jnp.maximum(adj, jnp.swapaxes(adj, 1, 2))                 # symmetric
    adj = jnp.maximum(adj, jnp.eye(N, dtype=jnp.float32)[None])     # self loops

    params, (wm, bm) = make_params(k_p)

    out = gcn_set2set_forward(x, adj, params)
    jax.block_until_ready(out)

    ref = reference(x, adj, params, wm, bm)
    assert out.shape == (B, LABEL_DIM)
    err = jnp.max(jnp.abs(out - ref))
    assert jnp.allclose(out, ref, atol=1e-3, rtol=1e-3), f"mismatch vs JAX reference, max abs err {err}"

    print("KERNEL_OK")
</pallas_src>

<mosaic_0001>
module attributes {stable_mosaic.version = 11 : i64} {
  func.func @gcn_set2set_kernel(%arg0: memref<2x8x16xf32, #tpu.memory_space<vmem>>, %arg1: memref<2x8x8xf32, #tpu.memory_space<vmem>>, %arg2: memref<16x32xf32, #tpu.memory_space<vmem>>, %arg3: memref<1x32xf32, #tpu.memory_space<vmem>>, %arg4: memref<32x32xf32, #tpu.memory_space<vmem>>, %arg5: memref<1x32xf32, #tpu.memory_space<vmem>>, %arg6: memref<32x32xf32, #tpu.memory_space<vmem>>, %arg7: memref<1x32xf32, #tpu.memory_space<vmem>>, %arg8: memref<32x32xf32, #tpu.memory_space<vmem>>, %arg9: memref<1x32xf32, #tpu.memory_space<vmem>>, %arg10: memref<32x32xf32, #tpu.memory_space<vmem>>, %arg11: memref<1x32xf32, #tpu.memory_space<vmem>>, %arg12: memref<32x64xf32, #tpu.memory_space<vmem>>, %arg13: memref<1x64xf32, #tpu.memory_space<vmem>>, %arg14: memref<256x512xf32, #tpu.memory_space<vmem>>, %arg15: memref<128x512xf32, #tpu.memory_space<vmem>>, %arg16: memref<1x512xf32, #tpu.memory_space<vmem>>, %arg17: memref<256x128xf32, #tpu.memory_space<vmem>>, %arg18: memref<1x128xf32, #tpu.memory_space<vmem>>, %arg19: memref<128x128xf32, #tpu.memory_space<vmem>>, %arg20: memref<1x128xf32, #tpu.memory_space<vmem>>, %arg21: memref<2x128xf32, #tpu.memory_space<vmem>>) attributes {dimension_semantics = [], scalar_prefetch = 0 : i64, scratch_operands = 0 : i64, tpu.core_type = #tpu.core_type<tc>} {
    %c0 = arith.constant 0 : index
    %c0_0 = arith.constant 0 : index
    %c0_1 = arith.constant 0 : index
    %0 = vector.load %arg0[%c0, %c0_0, %c0_1] : memref<2x8x16xf32, #tpu.memory_space<vmem>>, vector<2x8x16xf32>
    %c0_2 = arith.constant 0 : index
    %c0_3 = arith.constant 0 : index
    %c0_4 = arith.constant 0 : index
    %1 = vector.load %arg1[%c0_2, %c0_3, %c0_4] : memref<2x8x8xf32, #tpu.memory_space<vmem>>, vector<2x8x8xf32>
    %c0_5 = arith.constant 0 : index
    %c0_6 = arith.constant 0 : index
    %2 = vector.load %arg2[%c0_5, %c0_6] : memref<16x32xf32, #tpu.memory_space<vmem>>, vector<16x32xf32>
    %c0_7 = arith.constant 0 : index
    %c0_8 = arith.constant 0 : index
    %3 = vector.load %arg3[%c0_7, %c0_8] : memref<1x32xf32, #tpu.memory_space<vmem>>, vector<1x32xf32>
    %c0_9 = arith.constant 0 : index
    %c0_10 = arith.constant 0 : index
    %4 = vector.load %arg4[%c0_9, %c0_10] : memref<32x32xf32, #tpu.memory_space<vmem>>, vector<32x32xf32>
    %c0_11 = arith.constant 0 : index
    %c0_12 = arith.constant 0 : index
    %5 = vector.load %arg5[%c0_11, %c0_12] : memref<1x32xf32, #tpu.memory_space<vmem>>, vector<1x32xf32>
    "tpu.trace_start"() <{level = 10 : i32, message = "bij,bjc->bic"}> : () -> ()
    %cst = arith.constant dense<0.000000e+00> : vector<2x8x16xf32>
    %6 = tpu.matmul %1, %0, %cst {dimension_numbers = #tpu.dot_dimension_numbers<[2], [1], [1], [2], [0, 0, 0, 1, 1, 2], [0], [0]>} : vector<2x8x8xf32>, vector<2x8x16xf32>, vector<2x8x16xf32> -> vector<2x8x16xf32>
    "tpu.trace_stop"() : () -> ()
    %7 = vector.shape_cast %6 : vector<2x8x16xf32> to vector<16x16xf32>
    %cst_13 = arith.constant dense<0.000000e+00> : vector<16x32xf32>
    %8 = tpu.matmul %7, %2, %cst_13 {dimension_numbers = #tpu.dot_dimension_numbers<[1], [0], [0], [1], [0, 0, 1, 1], [], []>} : vector<16x16xf32>, vector<16x32xf32>, vector<16x32xf32> -> vector<16x32xf32>
    %9 = vector.broadcast %3 : vector<1x32xf32> to vector<16x32xf32>
    %10 = arith.addf %8, %9 : vector<16x32xf32>
    %cst_14 = arith.constant 0.000000e+00 : f32
    %11 = vector.broadcast %cst_14 : f32 to vector<16x32xf32>
    %12 = arith.maximumf %10, %11 : vector<16x32xf32>
    %cst_15 = arith.constant dense<0.000000e+00> : vector<16x32xf32>
    %13 = tpu.matmul %12, %4, %cst_15 {dimension_numbers = #tpu.dot_dimension_numbers<[1], [0], [0], [1], [0, 0, 1, 1], [], []>} : vector<16x32xf32>, vector<32x32xf32>, vector<16x32xf32> -> vector<16x32xf32>
    %14 = vector.broadcast %5 : vector<1x32xf32> to vector<16x32xf32>
    %15 = arith.addf %13, %14 : vector<16x32xf32>
    %16 = vector.shape_cast %15 : vector<16x32xf32> to vector<2x8x32xf32>
    %cst_16 = arith.constant dense<0.000000e+00> : vector<8x32xf32>
    %17 = vector.multi_reduction <add>, %16, %cst_16 [0] : vector<2x8x32xf32> to vector<8x32xf32>
    %18 = vector.shape_cast %17 : vector<8x32xf32> to vector<1x8x32xf32>
    %cst_17 = arith.constant 2.000000e+00 : f32
    %19 = vector.broadcast %cst_17 : f32 to vector<1x8x32xf32>
    %20 = arith.divf %18, %19 : vector<1x8x32xf32>
    %21 = vector.broadcast %20 : vector<1x8x32xf32> to vector<2x8x32xf32>
    %22 = arith.subf %16, %21 : vector<2x8x32xf32>
    %23 = arith.mulf %22, %22 : vector<2x8x32xf32>
    %cst_18 = arith.constant dense<0.000000e+00> : vector<8x32xf32>
    %24 = vector.multi_reduction <add>, %23, %cst_18 [0] : vector<2x8x32xf32> to vector<8x32xf32>
    %25 = vector.shape_cast %24 : vector<8x32xf32> to vector<1x8x32xf32>
    %cst_19 = arith.constant 1.000000e+00 : f32
    %26 = vector.broadcast %cst_19 : f32 to vector<1x8x32xf32>
    %27 = arith.divf %25, %26 : vector<1x8x32xf32>
    %28 = math.rsqrt %27 : vector<1x8x32xf32>
    %29 = vector.broadcast %28 : vector<1x8x32xf32> to vector<2x8x32xf32>
    %30 = arith.mulf %22, %29 : vector<2x8x32xf32>
    %cst_20 = arith.constant 0.000000e+00 : f32
    %31 = vector.broadcast %cst_20 : f32 to vector<2x8x32xf32>
    %32 = arith.maximumf %30, %31 : vector<2x8x32xf32>
    %cst_21 = arith.constant dense<0.000000e+00> : vector<2x8xf32>
    %33 = vector.multi_reduction <add>, %32, %cst_21 [2] : vector<2x8x32xf32> to vector<2x8xf32>
    %34 = vector.shape_cast %33 : vector<2x8xf32> to vector<2x8x1xf32>
    %cst_22 = arith.constant dense<0.000000e+00> : vector<8x1xf32>
    %35 = vector.multi_reduction <add>, %34, %cst_22 [0] : vector<2x8x1xf32> to vector<8x1xf32>
    %36 = vector.shape_cast %35 : vector<8x1xf32> to vector<1x8x1xf32>
    %cst_23 = arith.constant 6.400000e+01 : f32
    %37 = vector.broadcast %cst_23 : f32 to vector<1x8x1xf32>
    %38 = arith.divf %36, %37 : vector<1x8x1xf32>
    %39 = vector.broadcast %38 : vector<1x8x1xf32> to vector<2x8x32xf32>
    %40 = arith.subf %32, %39 : vector<2x8x32xf32>
    %41 = arith.mulf %40, %40 : vector<2x8x32xf32>
    %cst_24 = arith.constant dense<0.000000e+00> : vector<2x8xf32>
    %42 = vector.multi_reduction <add>, %41, %cst_24 [2] : vector<2x8x32xf32> to vector<2x8xf32>
    %43 = vector.shape_cast %42 : vector<2x8xf32> to vector<2x8x1xf32>
    %cst_25 = arith.constant dense<0.000000e+00> : vector<8x1xf32>
    %44 = vector.multi_reduction <add>, %43, %cst_25 [0] : vector<2x8x1xf32> to vector<8x1xf32>
    %45 = vector.shape_cast %44 : vector<8x1xf32> to vector<1x8x1xf32>
    %cst_26 = arith.constant 6.400000e+01 : f32
    %46 = vector.broadcast %cst_26 : f32 to vector<1x8x1xf32>
    %47 = arith.divf %45, %46 : vector<1x8x1xf32>
    %cst_27 = arith.constant 9.99999974E-6 : f32
    %48 = vector.broadcast %cst_27 : f32 to vector<1x8x1xf32>
    %49 = arith.addf %47, %48 : vector<1x8x1xf32>
    %50 = math.rsqrt %49 : vector<1x8x1xf32>
    %51 = vector.broadcast %50 : vector<1x8x1xf32> to vector<2x8x32xf32>
    %52 = arith.mulf %40, %51 : vector<2x8x32xf32>
    %c0_28 = arith.constant 0 : index
    %c0_29 = arith.constant 0 : index
    %53 = vector.load %arg6[%c0_28, %c0_29] : memref<32x32xf32, #tpu.memory_space<vmem>>, vector<32x32xf32>
    %c0_30 = arith.constant 0 : index
    %c0_31 = arith.constant 0 : index
    %54 = vector.load %arg7[%c0_30, %c0_31] : memref<1x32xf32, #tpu.memory_space<vmem>>, vector<1x32xf32>
    %c0_32 = arith.constant 0 : index
    %c0_33 = arith.constant 0 : index
    %55 = vector.load %arg8[%c0_32, %c0_33] : memref<32x32xf32, #tpu.memory_space<vmem>>, vector<32x32xf32>
    %c0_34 = arith.constant 0 : index
    %c0_35 = arith.constant 0 : index
    %56 = vector.load %arg9[%c0_34, %c0_35] : memref<1x32xf32, #tpu.memory_space<vmem>>, vector<1x32xf32>
    "tpu.trace_start"() <{level = 10 : i32, message = "bij,bjc->bic"}> : () -> ()
    %cst_36 = arith.constant dense<0.000000e+00> : vector<2x8x32xf32>
    %57 = tpu.matmul %1, %52, %cst_36 {dimension_numbers = #tpu.dot_dimension_numbers<[2], [1], [1], [2], [0, 0, 0, 1, 1, 2], [0], [0]>} : vector<2x8x8xf32>, vector<2x8x32xf32>, vector<2x8x32xf32> -> vector<2x8x32xf32>
    "tpu.trace_stop"() : () -> ()
    %58 = vector.shape_cast %57 : vector<2x8x32xf32> to vector<16x32xf32>
    %cst_37 = arith.constant dense<0.000000e+00> : vector<16x32xf32>
    %59 = tpu.matmul %58, %53, %cst_37 {dimension_numbers = #tpu.dot_dimension_numbers<[1], [0], [0], [1], [0, 0, 1, 1], [], []>} : vector<16x32xf32>, vector<32x32xf32>, vector<16x32xf32> -> vector<16x32xf32>
    %60 = vector.broadcast %54 : vector<1x32xf32> to vector<16x32xf32>
    %61 = arith.addf %59, %60 : vector<16x32xf32>
    %cst_38 = arith.constant 0.000000e+00 : f32
    %62 = vector.broadcast %cst_38 : f32 to vector<16x32xf32>
    %63 = arith.maximumf %61, %62 : vector<16x32xf32>
    %cst_39 = arith.constant dense<0.000000e+00> : vector<16x32xf32>
    %64 = tpu.matmul %63, %55, %cst_39 {dimension_numbers = #tpu.dot_dimension_numbers<[1], [0], [0], [1], [0, 0, 1, 1], [], []>} : vector<16x32xf32>, vector<32x32xf32>, vector<16x32xf32> -> vector<16x32xf32>
    %65 = vector.broadcast %56 : vector<1x32xf32> to vector<16x32xf32>
    %66 = arith.addf %64, %65 : vector<16x32xf32>
    %67 = vector.shape_cast %66 : vector<16x32xf32> to vector<2x8x32xf32>
    %cst_40 = arith.constant dense<0.000000e+00> : vector<8x32xf32>
    %68 = vector.multi_reduction <add>, %67, %cst_40 [0] : vector<2x8x32xf32> to vector<8x32xf32>
    %69 = vector.shape_cast %68 : vector<8x32xf32> to vector<1x8x32xf32>
    %cst_41 = arith.constant 2.000000e+00 : f32
    %70 = vector.broadcast %cst_41 : f32 to vector<1x8x32xf32>
    %71 = arith.divf %69, %70 : vector<1x8x32xf32>
    %72 = vector.broadcast %71 : vector<1x8x32xf32> to vector<2x8x32xf32>
    %73 = arith.subf %67, %72 : vector<2x8x32xf32>
    %74 = arith.mulf %73, %73 : vector<2x8x32xf32>
    %cst_42 = arith.constant dense<0.000000e+00> : vector<8x32xf32>
    %75 = vector.multi_reduction <add>, %74, %cst_42 [0] : vector<2x8x32xf32> to vector<8x32xf32>
    %76 = vector.shape_cast %75 : vector<8x32xf32> to vector<1x8x32xf32>
    %cst_43 = arith.constant 1.000000e+00 : f32
    %77 = vector.broadcast %cst_43 : f32 to vector<1x8x32xf32>
    %78 = arith.divf %76, %77 : vector<1x8x32xf32>
    %79 = math.rsqrt %78 : vector<1x8x32xf32>
    %80 = vector.broadcast %79 : vector<1x8x32xf32> to vector<2x8x32xf32>
    %81 = arith.mulf %73, %80 : vector<2x8x32xf32>
    %cst_44 = arith.constant 0.000000e+00 : f32
    %82 = vector.broadcast %cst_44 : f32 to vector<2x8x32xf32>
    %83 = arith.maximumf %81, %82 : vector<2x8x32xf32>
    %cst_45 = arith.constant dense<0.000000e+00> : vector<2x8xf32>
    %84 = vector.multi_reduction <add>, %83, %cst_45 [2] : vector<2x8x32xf32> to vector<2x8xf32>
    %85 = vector.shape_cast %84 : vector<2x8xf32> to vector<2x8x1xf32>
    %cst_46 = arith.constant dense<0.000000e+00> : vector<8x1xf32>
    %86 = vector.multi_reduction <add>, %85, %cst_46 [0] : vector<2x8x1xf32> to vector<8x1xf32>
    %87 = vector.shape_cast %86 : vector<8x1xf32> to vector<1x8x1xf32>
    %cst_47 = arith.constant 6.400000e+01 : f32
    %88 = vector.broadcast %cst_47 : f32 to vector<1x8x1xf32>
    %89 = arith.divf %87, %88 : vector<1x8x1xf32>
    %90 = vector.broadcast %89 : vector<1x8x1xf32> to vector<2x8x32xf32>
    %91 = arith.subf %83, %90 : vector<2x8x32xf32>
    %92 = arith.mulf %91, %91 : vector<2x8x32xf32>
    %cst_48 = arith.constant dense<0.000000e+00> : vector<2x8xf32>
    %93 = vector.multi_reduction <add>, %92, %cst_48 [2] : vector<2x8x32xf32> to vector<2x8xf32>
    %94 = vector.shape_cast %93 : vector<2x8xf32> to vector<2x8x1xf32>
    %cst_49 = arith.constant dense<0.000000e+00> : vector<8x1xf32>
    %95 = vector.multi_reduction <add>, %94, %cst_49 [0] : vector<2x8x1xf32> to vector<8x1xf32>
    %96 = vector.shape_cast %95 : vector<8x1xf32> to vector<1x8x1xf32>
    %cst_50 = arith.constant 6.400000e+01 : f32
    %97 = vector.broadcast %cst_50 : f32 to vector<1x8x1xf32>
    %98 = arith.divf %96, %97 : vector<1x8x1xf32>
    %cst_51 = arith.constant 9.99999974E-6 : f32
    %99 = vector.broadcast %cst_51 : f32 to vector<1x8x1xf32>
    %100 = arith.addf %98, %99 : vector<1x8x1xf32>
    %101 = math.rsqrt %100 : vector<1x8x1xf32>
    %102 = vector.broadcast %101 : vector<1x8x1xf32> to vector<2x8x32xf32>
    %103 = arith.mulf %91, %102 : vector<2x8x32xf32>
    %c0_52 = arith.constant 0 : index
    %c0_53 = arith.constant 0 : index
    %104 = vector.load %arg10[%c0_52, %c0_53] : memref<32x32xf32, #tpu.memory_space<vmem>>, vector<32x32xf32>
    %c0_54 = arith.constant 0 : index
    %c0_55 = arith.constant 0 : index
    %105 = vector.load %arg11[%c0_54, %c0_55] : memref<1x32xf32, #tpu.memory_space<vmem>>, vector<1x32xf32>
    %c0_56 = arith.constant 0 : index
    %c0_57 = arith.constant 0 : index
    %106 = vector.load %arg12[%c0_56, %c0_57] : memref<32x64xf32, #tpu.memory_space<vmem>>, vector<32x64xf32>
    %c0_58 = arith.constant 0 : index
    %c0_59 = arith.constant 0 : index
    %107 = vector.load %arg13[%c0_58, %c0_59] : memref<1x64xf32, #tpu.memory_space<vmem>>, vector<1x64xf32>
    "tpu.trace_start"() <{level = 10 : i32, message = "bij,bjc->bic"}> : () -> ()
    %cst_60 = arith.constant dense<0.000000e+00> : vector<2x8x32xf32>
    %108 = tpu.matmul %1, %103, %cst_60 {dimension_numbers = #tpu.dot_dimension_numbers<[2], [1], [1], [2], [0, 0, 0, 1, 1, 2], [0], [0]>} : vector<2x8x8xf32>, vector<2x8x32xf32>, vector<2x8x32xf32> -> vector<2x8x32xf32>
    "tpu.trace_stop"() : () -> ()
    %109 = vector.shape_cast %108 : vector<2x8x32xf32> to vector<16x32xf32>
    %cst_61 = arith.constant dense<0.000000e+00> : vector<16x32xf32>
    %110 = tpu.matmul %109, %104, %cst_61 {dimension_numbers = #tpu.dot_dimension_numbers<[1], [0], [0], [1], [0, 0, 1, 1], [], []>} : vector<16x32xf32>, vector<32x32xf32>, vector<16x32xf32> -> vector<16x32xf32>
    %111 = vector.broadcast %105 : vector<1x32xf32> to vector<16x32xf32>
    %112 = arith.addf %110, %111 : vector<16x32xf32>
    %cst_62 = arith.constant 0.000000e+00 : f32
    %113 = vector.broadcast %cst_62 : f32 to vector<16x32xf32>
    %114 = arith.maximumf %112, %113 : vector<16x32xf32>
    %cst_63 = arith.constant dense<0.000000e+00> : vector<16x64xf32>
    %115 = tpu.matmul %114, %106, %cst_63 {dimension_numbers = #tpu.dot_dimension_numbers<[1], [0], [0], [1], [0, 0, 1, 1], [], []>} : vector<16x32xf32>, vector<32x64xf32>, vector<16x64xf32> -> vector<16x64xf32>
    %116 = vector.broadcast %107 : vector<1x64xf32> to vector<16x64xf32>
    %117 = arith.addf %115, %116 : vector<16x64xf32>
    %118 = vector.shape_cast %117 : vector<16x64xf32> to vector<2x8x64xf32>
    %cst_64 = arith.constant dense<0.000000e+00> : vector<8x64xf32>
    %119 = vector.multi_reduction <add>, %118, %cst_64 [0] : vector<2x8x64xf32> to vector<8x64xf32>
    %120 = vector.shape_cast %119 : vector<8x64xf32> to vector<1x8x64xf32>
    %cst_65 = arith.constant 2.000000e+00 : f32
    %121 = vector.broadcast %cst_65 : f32 to vector<1x8x64xf32>
    %122 = arith.divf %120, %121 : vector<1x8x64xf32>
    %123 = vector.broadcast %122 : vector<1x8x64xf32> to vector<2x8x64xf32>
    %124 = arith.subf %118, %123 : vector<2x8x64xf32>
    %125 = arith.mulf %124, %124 : vector<2x8x64xf32>
    %cst_66 = arith.constant dense<0.000000e+00> : vector<8x64xf32>
    %126 = vector.multi_reduction <add>, %125, %cst_66 [0] : vector<2x8x64xf32> to vector<8x64xf32>
    %127 = vector.shape_cast %126 : vector<8x64xf32> to vector<1x8x64xf32>
    %cst_67 = arith.constant 1.000000e+00 : f32
    %128 = vector.broadcast %cst_67 : f32 to vector<1x8x64xf32>
    %129 = arith.divf %127, %128 : vector<1x8x64xf32>
    %130 = math.rsqrt %129 : vector<1x8x64xf32>
    %131 = vector.broadcast %130 : vector<1x8x64xf32> to vector<2x8x64xf32>
    %132 = arith.mulf %124, %131 : vector<2x8x64xf32>
    %133 = tpu.concatenate %52, %103, %132 in 2 : vector<2x8x32xf32>, vector<2x8x32xf32>, vector<2x8x64xf32> -> vector<2x8x128xf32>
    %c0_68 = arith.constant 0 : index
    %c0_69 = arith.constant 0 : index
    %134 = vector.load %arg14[%c0_68, %c0_69] : memref<256x512xf32, #tpu.memory_space<vmem>>, vector<256x512xf32>
    %c0_70 = arith.constant 0 : index
    %c0_71 = arith.constant 0 : index
    %135 = vector.load %arg15[%c0_70, %c0_71] : memref<128x512xf32, #tpu.memory_space<vmem>>, vector<128x512xf32>
    %c0_72 = arith.constant 0 : index
    %c0_73 = arith.constant 0 : index
    %136 = vector.load %arg16[%c0_72, %c0_73] : memref<1x512xf32, #tpu.memory_space<vmem>>, vector<1x512xf32>
    %cst_74 = arith.constant 0.000000e+00 : f32
    %137 = vector.broadcast %cst_74 : f32 to vector<2x128xf32>
    %cst_75 = arith.constant 0.000000e+00 : f32
    %138 = vector.broadcast %cst_75 : f32 to vector<2x128xf32>
    %cst_76 = arith.constant 0.000000e+00 : f32
    %139 = vector.broadcast %cst_76 : f32 to vector<2x256xf32>
    %c0_i32 = arith.constant 0 : i32
    %cst_77 = arith.constant dense<0.000000e+00> : vector<2x512xf32>
    %140 = tpu.matmul %139, %134, %cst_77 {dimension_numbers = #tpu.dot_dimension_numbers<[1], [0], [0], [1], [0, 0, 1, 1], [], []>} : vector<2x256xf32>, vector<256x512xf32>, vector<2x512xf32> -> vector<2x512xf32>
    %cst_78 = arith.constant dense<0.000000e+00> : vector<2x512xf32>
    %141 = tpu.matmul %137, %135, %cst_78 {dimension_numbers = #tpu.dot_dimension_numbers<[1], [0], [0], [1], [0, 0, 1, 1], [], []>} : vector<2x128xf32>, vector<128x512xf32>, vector<2x512xf32> -> vector<2x512xf32>
    %142 = arith.addf %140, %141 : vector<2x512xf32>
    %143 = vector.broadcast %136 : vector<1x512xf32> to vector<2x512xf32>
    %144 = arith.addf %142, %143 : vector<2x512xf32>
    %145 = vector.extract_strided_slice %144 {offsets = [0, 0], sizes = [2, 128], strides = [1, 1]} : vector<2x512xf32> to vector<2x128xf32>
    %cst_79 = arith.constant 0.000000e+00 : f32
    %146 = vector.broadcast %cst_79 : f32 to vector<2x128xf32>
    %147 = arith.subf %146, %145 : vector<2x128xf32>
    %148 = math.exp %147 : vector<2x128xf32>
    %cst_80 = arith.constant 1.000000e+00 : f32
    %149 = vector.broadcast %cst_80 : f32 to vector<2x128xf32>
    %150 = arith.addf %149, %148 : vector<2x128xf32>
    %151 = tpu.reciprocal %150 : vector<2x128xf32> -> vector<2x128xf32>
    %152 = vector.extract_strided_slice %144 {offsets = [0, 128], sizes = [2, 128], strides = [1, 1]} : vector<2x512xf32> to vector<2x128xf32>
    %cst_81 = arith.constant 0.000000e+00 : f32
    %153 = vector.broadcast %cst_81 : f32 to vector<2x128xf32>
    %154 = arith.subf %153, %152 : vector<2x128xf32>
    %155 = math.exp %154 : vector<2x128xf32>
    %cst_82 = arith.constant 1.000000e+00 : f32
    %156 = vector.broadcast %cst_82 : f32 to vector<2x128xf32>
    %157 = arith.addf %156, %155 : vector<2x128xf32>
    %158 = tpu.reciprocal %157 : vector<2x128xf32> -> vector<2x128xf32>
    %159 = vector.extract_strided_slice %144 {offsets = [0, 256], sizes = [2, 128], strides = [1, 1]} : vector<2x512xf32> to vector<2x128xf32>
    %160 = math.tanh %159 : vector<2x128xf32>
    %161 = vector.extract_strided_slice %144 {offsets = [0, 384], sizes = [2, 128], strides = [1, 1]} : vector<2x512xf32> to vector<2x128xf32>
    %cst_83 = arith.constant 0.000000e+00 : f32
    %162 = vector.broadcast %cst_83 : f32 to vector<2x128xf32>
    %163 = arith.subf %162, %161 : vector<2x128xf32>
    %164 = math.exp %163 : vector<2x128xf32>
    %cst_84 = arith.constant 1.000000e+00 : f32
    %165 = vector.broadcast %cst_84 : f32 to vector<2x128xf32>
    %166 = arith.addf %165, %164 : vector<2x128xf32>
    %167 = tpu.reciprocal %166 : vector<2x128xf32> -> vector<2x128xf32>
    %168 = arith.mulf %158, %138 : vector<2x128xf32>
    %169 = arith.mulf %151, %160 : vector<2x128xf32>
    %170 = arith.addf %168, %169 : vector<2x128xf32>
    %171 = math.tanh %170 : vector<2x128xf32>
    %172 = arith.mulf %167, %171 : vector<2x128xf32>
    %173 = vector.shape_cast %172 : vector<2x128xf32> to vector<2x1x128xf32>
    %174 = vector.broadcast %173 : vector<2x1x128xf32> to vector<2x8x128xf32>
    %175 = arith.mulf %133, %174 : vector<2x8x128xf32>
    %cst_85 = arith.constant dense<0.000000e+00> : vector<2x8xf32>
    %176 = vector.multi_reduction <add>, %175, %cst_85 [2] : vector<2x8x128xf32> to vector<2x8xf32>
    %cst_86 = arith.constant dense<0xFF800000> : vector<2xf32>
    %177 = vector.multi_reduction <maximumf>, %176, %cst_86 [1] : vector<2x8xf32> to vector<2xf32>
    %178 = vector.shape_cast %177 : vector<2xf32> to vector<2x1xf32>
    %179 = vector.broadcast %178 : vector<2x1xf32> to vector<2x8xf32>
    %180 = arith.subf %176, %179 : vector<2x8xf32>
    %181 = math.exp %180 : vector<2x8xf32>
    %cst_87 = arith.constant dense<0.000000e+00> : vector<2xf32>
    %182 = vector.multi_reduction <add>, %181, %cst_87 [1] : vector<2x8xf32> to vector<2xf32>
    %183 = vector.shape_cast %182 : vector<2xf32> to vector<2x1xf32>
    %184 = tpu.reciprocal %183 : vector<2x1xf32> -> vector<2x1xf32>
    %185 = vector.broadcast %184 : vector<2x1xf32> to vector<2x8xf32>
    %186 = arith.mulf %181, %185 : vector<2x8xf32>
    %187 = vector.shape_cast %186 : vector<2x8xf32> to vector<2x8x1xf32>
    %188 = vector.broadcast %187 : vector<2x8x1xf32> to vector<2x8x128xf32>
    %189 = arith.mulf %188, %133 : vector<2x8x128xf32>
    %cst_88 = arith.constant dense<0.000000e+00> : vector<2x128xf32>
    %190 = vector.multi_reduction <add>, %189, %cst_88 [1] : vector<2x8x128xf32> to vector<2x128xf32>
    %191 = tpu.concatenate %172, %190 in 1 : vector<2x128xf32>, vector<2x128xf32> -> vector<2x256xf32>
    %c1_i32 = arith.constant 1 : i32
    %cst_89 = arith.constant dense<0.000000e+00> : vector<2x512xf32>
    %192 = tpu.matmul %191, %134, %cst_89 {dimension_numbers = #tpu.dot_dimension_numbers<[1], [0], [0], [1], [0, 0, 1, 1], [], []>} : vector<2x256xf32>, vector<256x512xf32>, vector<2x512xf32> -> vector<2x512xf32>
    %cst_90 = arith.constant dense<0.000000e+00> : vector<2x512xf32>
    %193 = tpu.matmul %172, %135, %cst_90 {dimension_numbers = #tpu.dot_dimension_numbers<[1], [0], [0], [1], [0, 0, 1, 1], [], []>} : vector<2x128xf32>, vector<128x512xf32>, vector<2x512xf32> -> vector<2x512xf32>
    %194 = arith.addf %192, %193 : vector<2x512xf32>
    %195 = vector.broadcast %136 : vector<1x512xf32> to vector<2x512xf32>
    %196 = arith.addf %194, %195 : vector<2x512xf32>
    %197 = vector.extract_strided_slice %196 {offsets = [0, 0], sizes = [2, 128], strides = [1, 1]} : vector<2x512xf32> to vector<2x128xf32>
    %cst_91 = arith.constant 0.000000e+00 : f32
    %198 = vector.broadcast %cst_91 : f32 to vector<2x128xf32>
    %199 = arith.subf %198, %197 : vector<2x128xf32>
    %200 = math.exp %199 : vector<2x128xf32>
    %cst_92 = arith.constant 1.000000e+00 : f32
    %201 = vector.broadcast %cst_92 : f32 to vector<2x128xf32>
    %202 = arith.addf %201, %200 : vector<2x128xf32>
    %203 = tpu.reciprocal %202 : vector<2x128xf32> -> vector<2x128xf32>
    %204 = vector.extract_strided_slice %196 {offsets = [0, 128], sizes = [2, 128], strides = [1, 1]} : vector<2x512xf32> to vector<2x128xf32>
    %cst_93 = arith.constant 0.000000e+00 : f32
    %205 = vector.broadcast %cst_93 : f32 to vector<2x128xf32>
    %206 = arith.subf %205, %204 : vector<2x128xf32>
    %207 = math.exp %206 : vector<2x128xf32>
    %cst_94 = arith.constant 1.000000e+00 : f32
    %208 = vector.broadcast %cst_94 : f32 to vector<2x128xf32>
    %209 = arith.addf %208, %207 : vector<2x128xf32>
    %210 = tpu.reciprocal %209 : vector<2x128xf32> -> vector<2x128xf32>
    %211 = vector.extract_strided_slice %196 {offsets = [0, 256], sizes = [2, 128], strides = [1, 1]} : vector<2x512xf32> to vector<2x128xf32>
    %212 = math.tanh %211 : vector<2x128xf32>
    %213 = vector.extract_strided_slice %196 {offsets = [0, 384], sizes = [2, 128], strides = [1, 1]} : vector<2x512xf32> to vector<2x128xf32>
    %cst_95 = arith.constant 0.000000e+00 : f32
    %214 = vector.broadcast %cst_95 : f32 to vector<2x128xf32>
    %215 = arith.subf %214, %213 : vector<2x128xf32>
    %216 = math.exp %215 : vector<2x128xf32>
    %cst_96 = arith.constant 1.000000e+00 : f32
    %217 = vector.broadcast %cst_96 : f32 to vector<2x128xf32>
    %218 = arith.addf %217, %216 : vector<2x128xf32>
    %219 = tpu.reciprocal %218 : vector<2x128xf32> -> vector<2x128xf32>
    %220 = arith.mulf %210, %170 : vector<2x128xf32>
    %221 = arith.mulf %203, %212 : vector<2x128xf32>
    %222 = arith.addf %220, %221 : vector<2x128xf32>
    %223 = math.tanh %222 : vector<2x128xf32>
    %224 = arith.mulf %219, %223 : vector<2x128xf32>
    %225 = vector.shape_cast %224 : vector<2x128xf32> to vector<2x1x128xf32>
    %226 = vector.broadcast %225 : vector<2x1x128xf32> to vector<2x8x128xf32>
    %227 = arith.mulf %133, %226 : vector<2x8x128xf32>
    %cst_97 = arith.constant dense<0.000000e+00> : vector<2x8xf32>
    %228 = vector.multi_reduction <add>, %227, %cst_97 [2] : vector<2x8x128xf32> to vector<2x8xf32>
    %cst_98 = arith.constant dense<0xFF800000> : vector<2xf32>
    %229 = vector.multi_reduction <maximumf>, %228, %cst_98 [1] : vector<2x8xf32> to vector<2xf32>
    %230 = vector.shape_cast %229 : vector<2xf32> to vector<2x1xf32>
    %231 = vector.broadcast %230 : vector<2x1xf32> to vector<2x8xf32>
    %232 = arith.subf %228, %231 : vector<2x8xf32>
    %233 = math.exp %232 : vector<2x8xf32>
    %cst_99 = arith.constant dense<0.000000e+00> : vector<2xf32>
    %234 = vector.multi_reduction <add>, %233, %cst_99 [1] : vector<2x8xf32> to vector<2xf32>
    %235 = vector.shape_cast %234 : vector<2xf32> to vector<2x1xf32>
    %236 = tpu.reciprocal %235 : vector<2x1xf32> -> vector<2x1xf32>
    %237 = vector.broadcast %236 : vector<2x1xf32> to vector<2x8xf32>
    %238 = arith.mulf %233, %237 : vector<2x8xf32>
    %239 = vector.shape_cast %238 : vector<2x8xf32> to vector<2x8x1xf32>
    %240 = vector.broadcast %239 : vector<2x8x1xf32> to vector<2x8x128xf32>
    %241 = arith.mulf %240, %133 : vector<2x8x128xf32>
    %cst_100 = arith.constant dense<0.000000e+00> : vector<2x128xf32>
    %242 = vector.multi_reduction <add>, %241, %cst_100 [1] : vector<2x8x128xf32> to vector<2x128xf32>
    %243 = tpu.concatenate %224, %242 in 1 : vector<2x128xf32>, vector<2x128xf32> -> vector<2x256xf32>
    %c2_i32 = arith.constant 2 : i32
    %cst_101 = arith.constant dense<0.000000e+00> : vector<2x512xf32>
    %244 = tpu.matmul %243, %134, %cst_101 {dimension_numbers = #tpu.dot_dimension_numbers<[1], [0], [0], [1], [0, 0, 1, 1], [], []>} : vector<2x256xf32>, vector<256x512xf32>, vector<2x512xf32> -> vector<2x512xf32>
    %cst_102 = arith.constant dense<0.000000e+00> : vector<2x512xf32>
    %245 = tpu.matmul %224, %135, %cst_102 {dimension_numbers = #tpu.dot_dimension_numbers<[1], [0], [0], [1], [0, 0, 1, 1], [], []>} : vector<2x128xf32>, vector<128x512xf32>, vector<2x512xf32> -> vector<2x512xf32>
    %246 = arith.addf %244, %245 : vector<2x512xf32>
    %247 = vector.broadcast %136 : vector<1x512xf32> to vector<2x512xf32>
    %248 = arith.addf %246, %247 : vector<2x512xf32>
    %249 = vector.extract_strided_slice %248 {offsets = [0, 0], sizes = [2, 128], strides = [1, 1]} : vector<2x512xf32> to vector<2x128xf32>
    %cst_103 = arith.constant 0.000000e+00 : f32
    %250 = vector.broadcast %cst_103 : f32 to vector<2x128xf32>
    %251 = arith.subf %250, %249 : vector<2x128xf32>
    %252 = math.exp %251 : vector<2x128xf32>
    %cst_104 = arith.constant 1.000000e+00 : f32
    %253 = vector.broadcast %cst_104 : f32 to vector<2x128xf32>
    %254 = arith.addf %253, %252 : vector<2x128xf32>
    %255 = tpu.reciprocal %254 : vector<2x128xf32> -> vector<2x128xf32>
    %256 = vector.extract_strided_slice %248 {offsets = [0, 128], sizes = [2, 128], strides = [1, 1]} : vector<2x512xf32> to vector<2x128xf32>
    %cst_105 = arith.constant 0.000000e+00 : f32
    %257 = vector.broadcast %cst_105 : f32 to vector<2x128xf32>
    %258 = arith.subf %257, %256 : vector<2x128xf32>
    %259 = math.exp %258 : vector<2x128xf32>
    %cst_106 = arith.constant 1.000000e+00 : f32
    %260 = vector.broadcast %cst_106 : f32 to vector<2x128xf32>
    %261 = arith.addf %260, %259 : vector<2x128xf32>
    %262 = tpu.reciprocal %261 : vector<2x128xf32> -> vector<2x128xf32>
    %263 = vector.extract_strided_slice %248 {offsets = [0, 256], sizes = [2, 128], strides = [1, 1]} : vector<2x512xf32> to vector<2x128xf32>
    %264 = math.tanh %263 : vector<2x128xf32>
    %265 = vector.extract_strided_slice %248 {offsets = [0, 384], sizes = [2, 128], strides = [1, 1]} : vector<2x512xf32> to vector<2x128xf32>
    %cst_107 = arith.constant 0.000000e+00 : f32
    %266 = vector.broadcast %cst_107 : f32 to vector<2x128xf32>
    %267 = arith.subf %266, %265 : vector<2x128xf32>
    %268 = math.exp %267 : vector<2x128xf32>
    %cst_108 = arith.constant 1.000000e+00 : f32
    %269 = vector.broadcast %cst_108 : f32 to vector<2x128xf32>
    %270 = arith.addf %269, %268 : vector<2x128xf32>
    %271 = tpu.reciprocal %270 : vector<2x128xf32> -> vector<2x128xf32>
    %272 = arith.mulf %262, %222 : vector<2x128xf32>
    %273 = arith.mulf %255, %264 : vector<2x128xf32>
    %274 = arith.addf %272, %273 : vector<2x128xf32>
    %275 = math.tanh %274 : vector<2x128xf32>
    %276 = arith.mulf %271, %275 : vector<2x128xf32>
    %277 = vector.shape_cast %276 : vector<2x128xf32> to vector<2x1x128xf32>
    %278 = vector.broadcast %277 : vector<2x1x128xf32> to vector<2x8x128xf32>
    %279 = arith.mulf %133, %278 : vector<2x8x128xf32>
    %cst_109 = arith.constant dense<0.000000e+00> : vector<2x8xf32>
    %280 = vector.multi_reduction <add>, %279, %cst_109 [2] : vector<2x8x128xf32> to vector<2x8xf32>
    %cst_110 = arith.constant dense<0xFF800000> : vector<2xf32>
    %281 = vector.multi_reduction <maximumf>, %280, %cst_110 [1] : vector<2x8xf32> to vector<2xf32>
    %282 = vector.shape_cast %281 : vector<2xf32> to vector<2x1xf32>
    %283 = vector.broadcast %282 : vector<2x1xf32> to vector<2x8xf32>
    %284 = arith.subf %280, %283 : vector<2x8xf32>
    %285 = math.exp %284 : vector<2x8xf32>
    %cst_111 = arith.constant dense<0.000000e+00> : vector<2xf32>
    %286 = vector.multi_reduction <add>, %285, %cst_111 [1] : vector<2x8xf32> to vector<2xf32>
    %287 = vector.shape_cast %286 : vector<2xf32> to vector<2x1xf32>
    %288 = tpu.reciprocal %287 : vector<2x1xf32> -> vector<2x1xf32>
    %289 = vector.broadcast %288 : vector<2x1xf32> to vector<2x8xf32>
    %290 = arith.mulf %285, %289 : vector<2x8xf32>
    %291 = vector.shape_cast %290 : vector<2x8xf32> to vector<2x8x1xf32>
    %292 = vector.broadcast %291 : vector<2x8x1xf32> to vector<2x8x128xf32>
    %293 = arith.mulf %292, %133 : vector<2x8x128xf32>
    %cst_112 = arith.constant dense<0.000000e+00> : vector<2x128xf32>
    %294 = vector.multi_reduction <add>, %293, %cst_112 [1] : vector<2x8x128xf32> to vector<2x128xf32>
    %295 = tpu.concatenate %276, %294 in 1 : vector<2x128xf32>, vector<2x128xf32> -> vector<2x256xf32>
    %c3_i32 = arith.constant 3 : i32
    %cst_113 = arith.constant dense<0.000000e+00> : vector<2x512xf32>
    %296 = tpu.matmul %295, %134, %cst_113 {dimension_numbers = #tpu.dot_dimension_numbers<[1], [0], [0], [1], [0, 0, 1, 1], [], []>} : vector<2x256xf32>, vector<256x512xf32>, vector<2x512xf32> -> vector<2x512xf32>
    %cst_114 = arith.constant dense<0.000000e+00> : vector<2x512xf32>
    %297 = tpu.matmul %276, %135, %cst_114 {dimension_numbers = #tpu.dot_dimension_numbers<[1], [0], [0], [1], [0, 0, 1, 1], [], []>} : vector<2x128xf32>, vector<128x512xf32>, vector<2x512xf32> -> vector<2x512xf32>
    %298 = arith.addf %296, %297 : vector<2x512xf32>
    %299 = vector.broadcast %136 : vector<1x512xf32> to vector<2x512xf32>
    %300 = arith.addf %298, %299 : vector<2x512xf32>
    %301 = vector.extract_strided_slice %300 {offsets = [0, 0], sizes = [2, 128], strides = [1, 1]} : vector<2x512xf32> to vector<2x128xf32>
    %cst_115 = arith.constant 0.000000e+00 : f32
    %302 = vector.broadcast %cst_115 : f32 to vector<2x128xf32>
    %303 = arith.subf %302, %301 : vector<2x128xf32>
    %304 = math.exp %303 : vector<2x128xf32>
    %cst_116 = arith.constant 1.000000e+00 : f32
    %305 = vector.broadcast %cst_116 : f32 to vector<2x128xf32>
    %306 = arith.addf %305, %304 : vector<2x128xf32>
    %307 = tpu.reciprocal %306 : vector<2x128xf32> -> vector<2x128xf32>
    %308 = vector.extract_strided_slice %300 {offsets = [0, 128], sizes = [2, 128], strides = [1, 1]} : vector<2x512xf32> to vector<2x128xf32>
    %cst_117 = arith.constant 0.000000e+00 : f32
    %309 = vector.broadcast %cst_117 : f32 to vector<2x128xf32>
    %310 = arith.subf %309, %308 : vector<2x128xf32>
    %311 = math.exp %310 : vector<2x128xf32>
    %cst_118 = arith.constant 1.000000e+00 : f32
    %312 = vector.broadcast %cst_118 : f32 to vector<2x128xf32>
    %313 = arith.addf %312, %311 : vector<2x128xf32>
    %314 = tpu.reciprocal %313 : vector<2x128xf32> -> vector<2x128xf32>
    %315 = vector.extract_strided_slice %300 {offsets = [0, 256], sizes = [2, 128], strides = [1, 1]} : vector<2x512xf32> to vector<2x128xf32>
    %316 = math.tanh %315 : vector<2x128xf32>
    %317 = vector.extract_strided_slice %300 {offsets = [0, 384], sizes = [2, 128], strides = [1, 1]} : vector<2x512xf32> to vector<2x128xf32>
    %cst_119 = arith.constant 0.000000e+00 : f32
    %318 = vector.broadcast %cst_119 : f32 to vector<2x128xf32>
    %319 = arith.subf %318, %317 : vector<2x128xf32>
    %320 = math.exp %319 : vector<2x128xf32>
    %cst_120 = arith.constant 1.000000e+00 : f32
    %321 = vector.broadcast %cst_120 : f32 to vector<2x128xf32>
    %322 = arith.addf %321, %320 : vector<2x128xf32>
    %323 = tpu.reciprocal %322 : vector<2x128xf32> -> vector<2x128xf32>
    %324 = arith.mulf %314, %274 : vector<2x128xf32>
    %325 = arith.mulf %307, %316 : vector<2x128xf32>
    %326 = arith.addf %324, %325 : vector<2x128xf32>
    %327 = math.tanh %326 : vector<2x128xf32>
    %328 = arith.mulf %323, %327 : vector<2x128xf32>
    %329 = vector.shape_cast %328 : vector<2x128xf32> to vector<2x1x128xf32>
    %330 = vector.broadcast %329 : vector<2x1x128xf32> to vector<2x8x128xf32>
    %331 = arith.mulf %133, %330 : vector<2x8x128xf32>
    %cst_121 = arith.constant dense<0.000000e+00> : vector<2x8xf32>
    %332 = vector.multi_reduction <add>, %331, %cst_121 [2] : vector<2x8x128xf32> to vector<2x8xf32>
    %cst_122 = arith.constant dense<0xFF800000> : vector<2xf32>
    %333 = vector.multi_reduction <maximumf>, %332, %cst_122 [1] : vector<2x8xf32> to vector<2xf32>
    %334 = vector.shape_cast %333 : vector<2xf32> to vector<2x1xf32>
    %335 = vector.broadcast %334 : vector<2x1xf32> to vector<2x8xf32>
    %336 = arith.subf %332, %335 : vector<2x8xf32>
    %337 = math.exp %336 : vector<2x8xf32>
    %cst_123 = arith.constant dense<0.000000e+00> : vector<2xf32>
    %338 = vector.multi_reduction <add>, %337, %cst_123 [1] : vector<2x8xf32> to vector<2xf32>
    %339 = vector.shape_cast %338 : vector<2xf32> to vector<2x1xf32>
    %340 = tpu.reciprocal %339 : vector<2x1xf32> -> vector<2x1xf32>
    %341 = vector.broadcast %340 : vector<2x1xf32> to vector<2x8xf32>
    %342 = arith.mulf %337, %341 : vector<2x8xf32>
    %343 = vector.shape_cast %342 : vector<2x8xf32> to vector<2x8x1xf32>
    %344 = vector.broadcast %343 : vector<2x8x1xf32> to vector<2x8x128xf32>
    %345 = arith.mulf %344, %133 : vector<2x8x128xf32>
    %cst_124 = arith.constant dense<0.000000e+00> : vector<2x128xf32>
    %346 = vector.multi_reduction <add>, %345, %cst_124 [1] : vector<2x8x128xf32> to vector<2x128xf32>
    %347 = tpu.concatenate %328, %346 in 1 : vector<2x128xf32>, vector<2x128xf32> -> vector<2x256xf32>
    %c4_i32 = arith.constant 4 : i32
    %cst_125 = arith.constant dense<0.000000e+00> : vector<2x512xf32>
    %348 = tpu.matmul %347, %134, %cst_125 {dimension_numbers = #tpu.dot_dimension_numbers<[1], [0], [0], [1], [0, 0, 1, 1], [], []>} : vector<2x256xf32>, vector<256x512xf32>, vector<2x512xf32> -> vector<2x512xf32>
    %cst_126 = arith.constant dense<0.000000e+00> : vector<2x512xf32>
    %349 = tpu.matmul %328, %135, %cst_126 {dimension_numbers = #tpu.dot_dimension_numbers<[1], [0], [0], [1], [0, 0, 1, 1], [], []>} : vector<2x128xf32>, vector<128x512xf32>, vector<2x512xf32> -> vector<2x512xf32>
    %350 = arith.addf %348, %349 : vector<2x512xf32>
    %351 = vector.broadcast %136 : vector<1x512xf32> to vector<2x512xf32>
    %352 = arith.addf %350, %351 : vector<2x512xf32>
    %353 = vector.extract_strided_slice %352 {offsets = [0, 0], sizes = [2, 128], strides = [1, 1]} : vector<2x512xf32> to vector<2x128xf32>
    %cst_127 = arith.constant 0.000000e+00 : f32
    %354 = vector.broadcast %cst_127 : f32 to vector<2x128xf32>
    %355 = arith.subf %354, %353 : vector<2x128xf32>
    %356 = math.exp %355 : vector<2x128xf32>
    %cst_128 = arith.constant 1.000000e+00 : f32
    %357 = vector.broadcast %cst_128 : f32 to vector<2x128xf32>
    %358 = arith.addf %357, %356 : vector<2x128xf32>
    %359 = tpu.reciprocal %358 : vector<2x128xf32> -> vector<2x128xf32>
    %360 = vector.extract_strided_slice %352 {offsets = [0, 128], sizes = [2, 128], strides = [1, 1]} : vector<2x512xf32> to vector<2x128xf32>
    %cst_129 = arith.constant 0.000000e+00 : f32
    %361 = vector.broadcast %cst_129 : f32 to vector<2x128xf32>
    %362 = arith.subf %361, %360 : vector<2x128xf32>
    %363 = math.exp %362 : vector<2x128xf32>
    %cst_130 = arith.constant 1.000000e+00 : f32
    %364 = vector.broadcast %cst_130 : f32 to vector<2x128xf32>
    %365 = arith.addf %364, %363 : vector<2x128xf32>
    %366 = tpu.reciprocal %365 : vector<2x128xf32> -> vector<2x128xf32>
    %367 = vector.extract_strided_slice %352 {offsets = [0, 256], sizes = [2, 128], strides = [1, 1]} : vector<2x512xf32> to vector<2x128xf32>
    %368 = math.tanh %367 : vector<2x128xf32>
    %369 = vector.extract_strided_slice %352 {offsets = [0, 384], sizes = [2, 128], strides = [1, 1]} : vector<2x512xf32> to vector<2x128xf32>
    %cst_131 = arith.constant 0.000000e+00 : f32
    %370 = vector.broadcast %cst_131 : f32 to vector<2x128xf32>
    %371 = arith.subf %370, %369 : vector<2x128xf32>
    %372 = math.exp %371 : vector<2x128xf32>
    %cst_132 = arith.constant 1.000000e+00 : f32
    %373 = vector.broadcast %cst_132 : f32 to vector<2x128xf32>
    %374 = arith.addf %373, %372 : vector<2x128xf32>
    %375 = tpu.reciprocal %374 : vector<2x128xf32> -> vector<2x128xf32>
    %376 = arith.mulf %366, %326 : vector<2x128xf32>
    %377 = arith.mulf %359, %368 : vector<2x128xf32>
    %378 = arith.addf %376, %377 : vector<2x128xf32>
    %379 = math.tanh %378 : vector<2x128xf32>
    %380 = arith.mulf %375, %379 : vector<2x128xf32>
    %381 = vector.shape_cast %380 : vector<2x128xf32> to vector<2x1x128xf32>
    %382 = vector.broadcast %381 : vector<2x1x128xf32> to vector<2x8x128xf32>
    %383 = arith.mulf %133, %382 : vector<2x8x128xf32>
    %cst_133 = arith.constant dense<0.000000e+00> : vector<2x8xf32>
    %384 = vector.multi_reduction <add>, %383, %cst_133 [2] : vector<2x8x128xf32> to vector<2x8xf32>
    %cst_134 = arith.constant dense<0xFF800000> : vector<2xf32>
    %385 = vector.multi_reduction <maximumf>, %384, %cst_134 [1] : vector<2x8xf32> to vector<2xf32>
    %386 = vector.shape_cast %385 : vector<2xf32> to vector<2x1xf32>
    %387 = vector.broadcast %386 : vector<2x1xf32> to vector<2x8xf32>
    %388 = arith.subf %384, %387 : vector<2x8xf32>
    %389 = math.exp %388 : vector<2x8xf32>
    %cst_135 = arith.constant dense<0.000000e+00> : vector<2xf32>
    %390 = vector.multi_reduction <add>, %389, %cst_135 [1] : vector<2x8xf32> to vector<2xf32>
    %391 = vector.shape_cast %390 : vector<2xf32> to vector<2x1xf32>
    %392 = tpu.reciprocal %391 : vector<2x1xf32> -> vector<2x1xf32>
    %393 = vector.broadcast %392 : vector<2x1xf32> to vector<2x8xf32>
    %394 = arith.mulf %389, %393 : vector<2x8xf32>
    %395 = vector.shape_cast %394 : vector<2x8xf32> to vector<2x8x1xf32>
    %396 = vector.broadcast %395 : vector<2x8x1xf32> to vector<2x8x128xf32>
    %397 = arith.mulf %396, %133 : vector<2x8x128xf32>
    %cst_136 = arith.constant dense<0.000000e+00> : vector<2x128xf32>
    %398 = vector.multi_reduction <add>, %397, %cst_136 [1] : vector<2x8x128xf32> to vector<2x128xf32>
    %399 = tpu.concatenate %380, %398 in 1 : vector<2x128xf32>, vector<2x128xf32> -> vector<2x256xf32>
    %c5_i32 = arith.constant 5 : i32
    %cst_137 = arith.constant dense<0.000000e+00> : vector<2x512xf32>
    %400 = tpu.matmul %399, %134, %cst_137 {dimension_numbers = #tpu.dot_dimension_numbers<[1], [0], [0], [1], [0, 0, 1, 1], [], []>} : vector<2x256xf32>, vector<256x512xf32>, vector<2x512xf32> -> vector<2x512xf32>
    %cst_138 = arith.constant dense<0.000000e+00> : vector<2x512xf32>
    %401 = tpu.matmul %380, %135, %cst_138 {dimension_numbers = #tpu.dot_dimension_numbers<[1], [0], [0], [1], [0, 0, 1, 1], [], []>} : vector<2x128xf32>, vector<128x512xf32>, vector<2x512xf32> -> vector<2x512xf32>
    %402 = arith.addf %400, %401 : vector<2x512xf32>
    %403 = vector.broadcast %136 : vector<1x512xf32> to vector<2x512xf32>
    %404 = arith.addf %402, %403 : vector<2x512xf32>
    %405 = vector.extract_strided_slice %404 {offsets = [0, 0], sizes = [2, 128], strides = [1, 1]} : vector<2x512xf32> to vector<2x128xf32>
    %cst_139 = arith.constant 0.000000e+00 : f32
    %406 = vector.broadcast %cst_139 : f32 to vector<2x128xf32>
    %407 = arith.subf %406, %405 : vector<2x128xf32>
    %408 = math.exp %407 : vector<2x128xf32>
    %cst_140 = arith.constant 1.000000e+00 : f32
    %409 = vector.broadcast %cst_140 : f32 to vector<2x128xf32>
    %410 = arith.addf %409, %408 : vector<2x128xf32>
    %411 = tpu.reciprocal %410 : vector<2x128xf32> -> vector<2x128xf32>
    %412 = vector.extract_strided_slice %404 {offsets = [0, 128], sizes = [2, 128], strides = [1, 1]} : vector<2x512xf32> to vector<2x128xf32>
    %cst_141 = arith.constant 0.000000e+00 : f32
    %413 = vector.broadcast %cst_141 : f32 to vector<2x128xf32>
    %414 = arith.subf %413, %412 : vector<2x128xf32>
    %415 = math.exp %414 : vector<2x128xf32>
    %cst_142 = arith.constant 1.000000e+00 : f32
    %416 = vector.broadcast %cst_142 : f32 to vector<2x128xf32>
    %417 = arith.addf %416, %415 : vector<2x128xf32>
    %418 = tpu.reciprocal %417 : vector<2x128xf32> -> vector<2x128xf32>
    %419 = vector.extract_strided_slice %404 {offsets = [0, 256], sizes = [2, 128], strides = [1, 1]} : vector<2x512xf32> to vector<2x128xf32>
    %420 = math.tanh %419 : vector<2x128xf32>
    %421 = vector.extract_strided_slice %404 {offsets = [0, 384], sizes = [2, 128], strides = [1, 1]} : vector<2x512xf32> to vector<2x128xf32>
    %cst_143 = arith.constant 0.000000e+00 : f32
    %422 = vector.broadcast %cst_143 : f32 to vector<2x128xf32>
    %423 = arith.subf %422, %421 : vector<2x128xf32>
    %424 = math.exp %423 : vector<2x128xf32>
    %cst_144 = arith.constant 1.000000e+00 : f32
    %425 = vector.broadcast %cst_144 : f32 to vector<2x128xf32>
    %426 = arith.addf %425, %424 : vector<2x128xf32>
    %427 = tpu.reciprocal %426 : vector<2x128xf32> -> vector<2x128xf32>
    %428 = arith.mulf %418, %378 : vector<2x128xf32>
    %429 = arith.mulf %411, %420 : vector<2x128xf32>
    %430 = arith.addf %428, %429 : vector<2x128xf32>
    %431 = math.tanh %430 : vector<2x128xf32>
    %432 = arith.mulf %427, %431 : vector<2x128xf32>
    %433 = vector.shape_cast %432 : vector<2x128xf32> to vector<2x1x128xf32>
    %434 = vector.broadcast %433 : vector<2x1x128xf32> to vector<2x8x128xf32>
    %435 = arith.mulf %133, %434 : vector<2x8x128xf32>
    %cst_145 = arith.constant dense<0.000000e+00> : vector<2x8xf32>
    %436 = vector.multi_reduction <add>, %435, %cst_145 [2] : vector<2x8x128xf32> to vector<2x8xf32>
    %cst_146 = arith.constant dense<0xFF800000> : vector<2xf32>
    %437 = vector.multi_reduction <maximumf>, %436, %cst_146 [1] : vector<2x8xf32> to vector<2xf32>
    %438 = vector.shape_cast %437 : vector<2xf32> to vector<2x1xf32>
    %439 = vector.broadcast %438 : vector<2x1xf32> to vector<2x8xf32>
    %440 = arith.subf %436, %439 : vector<2x8xf32>
    %441 = math.exp %440 : vector<2x8xf32>
    %cst_147 = arith.constant dense<0.000000e+00> : vector<2xf32>
    %442 = vector.multi_reduction <add>, %441, %cst_147 [1] : vector<2x8xf32> to vector<2xf32>
    %443 = vector.shape_cast %442 : vector<2xf32> to vector<2x1xf32>
    %444 = tpu.reciprocal %443 : vector<2x1xf32> -> vector<2x1xf32>
    %445 = vector.broadcast %444 : vector<2x1xf32> to vector<2x8xf32>
    %446 = arith.mulf %441, %445 : vector<2x8xf32>
    %447 = vector.shape_cast %446 : vector<2x8xf32> to vector<2x8x1xf32>
    %448 = vector.broadcast %447 : vector<2x8x1xf32> to vector<2x8x128xf32>
    %449 = arith.mulf %448, %133 : vector<2x8x128xf32>
    %cst_148 = arith.constant dense<0.000000e+00> : vector<2x128xf32>
    %450 = vector.multi_reduction <add>, %449, %cst_148 [1] : vector<2x8x128xf32> to vector<2x128xf32>
    %451 = tpu.concatenate %432, %450 in 1 : vector<2x128xf32>, vector<2x128xf32> -> vector<2x256xf32>
    %c6_i32 = arith.constant 6 : i32
    %cst_149 = arith.constant dense<0.000000e+00> : vector<2x512xf32>
    %452 = tpu.matmul %451, %134, %cst_149 {dimension_numbers = #tpu.dot_dimension_numbers<[1], [0], [0], [1], [0, 0, 1, 1], [], []>} : vector<2x256xf32>, vector<256x512xf32>, vector<2x512xf32> -> vector<2x512xf32>
    %cst_150 = arith.constant dense<0.000000e+00> : vector<2x512xf32>
    %453 = tpu.matmul %432, %135, %cst_150 {dimension_numbers = #tpu.dot_dimension_numbers<[1], [0], [0], [1], [0, 0, 1, 1], [], []>} : vector<2x128xf32>, vector<128x512xf32>, vector<2x512xf32> -> vector<2x512xf32>
    %454 = arith.addf %452, %453 : vector<2x512xf32>
    %455 = vector.broadcast %136 : vector<1x512xf32> to vector<2x512xf32>
    %456 = arith.addf %454, %455 : vector<2x512xf32>
    %457 = vector.extract_strided_slice %456 {offsets = [0, 0], sizes = [2, 128], strides = [1, 1]} : vector<2x512xf32> to vector<2x128xf32>
    %cst_151 = arith.constant 0.000000e+00 : f32
    %458 = vector.broadcast %cst_151 : f32 to vector<2x128xf32>
    %459 = arith.subf %458, %457 : vector<2x128xf32>
    %460 = math.exp %459 : vector<2x128xf32>
    %cst_152 = arith.constant 1.000000e+00 : f32
    %461 = vector.broadcast %cst_152 : f32 to vector<2x128xf32>
    %462 = arith.addf %461, %460 : vector<2x128xf32>
    %463 = tpu.reciprocal %462 : vector<2x128xf32> -> vector<2x128xf32>
    %464 = vector.extract_strided_slice %456 {offsets = [0, 128], sizes = [2, 128], strides = [1, 1]} : vector<2x512xf32> to vector<2x128xf32>
    %cst_153 = arith.constant 0.000000e+00 : f32
    %465 = vector.broadcast %cst_153 : f32 to vector<2x128xf32>
    %466 = arith.subf %465, %464 : vector<2x128xf32>
    %467 = math.exp %466 : vector<2x128xf32>
    %cst_154 = arith.constant 1.000000e+00 : f32
    %468 = vector.broadcast %cst_154 : f32 to vector<2x128xf32>
    %469 = arith.addf %468, %467 : vector<2x128xf32>
    %470 = tpu.reciprocal %469 : vector<2x128xf32> -> vector<2x128xf32>
    %471 = vector.extract_strided_slice %456 {offsets = [0, 256], sizes = [2, 128], strides = [1, 1]} : vector<2x512xf32> to vector<2x128xf32>
    %472 = math.tanh %471 : vector<2x128xf32>
    %473 = vector.extract_strided_slice %456 {offsets = [0, 384], sizes = [2, 128], strides = [1, 1]} : vector<2x512xf32> to vector<2x128xf32>
    %cst_155 = arith.constant 0.000000e+00 : f32
    %474 = vector.broadcast %cst_155 : f32 to vector<2x128xf32>
    %475 = arith.subf %474, %473 : vector<2x128xf32>
    %476 = math.exp %475 : vector<2x128xf32>
    %cst_156 = arith.constant 1.000000e+00 : f32
    %477 = vector.broadcast %cst_156 : f32 to vector<2x128xf32>
    %478 = arith.addf %477, %476 : vector<2x128xf32>
    %479 = tpu.reciprocal %478 : vector<2x128xf32> -> vector<2x128xf32>
    %480 = arith.mulf %470, %430 : vector<2x128xf32>
    %481 = arith.mulf %463, %472 : vector<2x128xf32>
    %482 = arith.addf %480, %481 : vector<2x128xf32>
    %483 = math.tanh %482 : vector<2x128xf32>
    %484 = arith.mulf %479, %483 : vector<2x128xf32>
    %485 = vector.shape_cast %484 : vector<2x128xf32> to vector<2x1x128xf32>
    %486 = vector.broadcast %485 : vector<2x1x128xf32> to vector<2x8x128xf32>
    %487 = arith.mulf %133, %486 : vector<2x8x128xf32>
    %cst_157 = arith.constant dense<0.000000e+00> : vector<2x8xf32>
    %488 = vector.multi_reduction <add>, %487, %cst_157 [2] : vector<2x8x128xf32> to vector<2x8xf32>
    %cst_158 = arith.constant dense<0xFF800000> : vector<2xf32>
    %489 = vector.multi_reduction <maximumf>, %488, %cst_158 [1] : vector<2x8xf32> to vector<2xf32>
    %490 = vector.shape_cast %489 : vector<2xf32> to vector<2x1xf32>
    %491 = vector.broadcast %490 : vector<2x1xf32> to vector<2x8xf32>
    %492 = arith.subf %488, %491 : vector<2x8xf32>
    %493 = math.exp %492 : vector<2x8xf32>
    %cst_159 = arith.constant dense<0.000000e+00> : vector<2xf32>
    %494 = vector.multi_reduction <add>, %493, %cst_159 [1] : vector<2x8xf32> to vector<2xf32>
    %495 = vector.shape_cast %494 : vector<2xf32> to vector<2x1xf32>
    %496 = tpu.reciprocal %495 : vector<2x1xf32> -> vector<2x1xf32>
    %497 = vector.broadcast %496 : vector<2x1xf32> to vector<2x8xf32>
    %498 = arith.mulf %493, %497 : vector<2x8xf32>
    %499 = vector.shape_cast %498 : vector<2x8xf32> to vector<2x8x1xf32>
    %500 = vector.broadcast %499 : vector<2x8x1xf32> to vector<2x8x128xf32>
    %501 = arith.mulf %500, %133 : vector<2x8x128xf32>
    %cst_160 = arith.constant dense<0.000000e+00> : vector<2x128xf32>
    %502 = vector.multi_reduction <add>, %501, %cst_160 [1] : vector<2x8x128xf32> to vector<2x128xf32>
    %503 = tpu.concatenate %484, %502 in 1 : vector<2x128xf32>, vector<2x128xf32> -> vector<2x256xf32>
    %c7_i32 = arith.constant 7 : i32
    %cst_161 = arith.constant dense<0.000000e+00> : vector<2x512xf32>
    %504 = tpu.matmul %503, %134, %cst_161 {dimension_numbers = #tpu.dot_dimension_numbers<[1], [0], [0], [1], [0, 0, 1, 1], [], []>} : vector<2x256xf32>, vector<256x512xf32>, vector<2x512xf32> -> vector<2x512xf32>
    %cst_162 = arith.constant dense<0.000000e+00> : vector<2x512xf32>
    %505 = tpu.matmul %484, %135, %cst_162 {dimension_numbers = #tpu.dot_dimension_numbers<[1], [0], [0], [1], [0, 0, 1, 1], [], []>} : vector<2x128xf32>, vector<128x512xf32>, vector<2x512xf32> -> vector<2x512xf32>
    %506 = arith.addf %504, %505 : vector<2x512xf32>
    %507 = vector.broadcast %136 : vector<1x512xf32> to vector<2x512xf32>
    %508 = arith.addf %506, %507 : vector<2x512xf32>
    %509 = vector.extract_strided_slice %508 {offsets = [0, 0], sizes = [2, 128], strides = [1, 1]} : vector<2x512xf32> to vector<2x128xf32>
    %cst_163 = arith.constant 0.000000e+00 : f32
    %510 = vector.broadcast %cst_163 : f32 to vector<2x128xf32>
    %511 = arith.subf %510, %509 : vector<2x128xf32>
    %512 = math.exp %511 : vector<2x128xf32>
    %cst_164 = arith.constant 1.000000e+00 : f32
    %513 = vector.broadcast %cst_164 : f32 to vector<2x128xf32>
    %514 = arith.addf %513, %512 : vector<2x128xf32>
    %515 = tpu.reciprocal %514 : vector<2x128xf32> -> vector<2x128xf32>
    %516 = vector.extract_strided_slice %508 {offsets = [0, 128], sizes = [2, 128], strides = [1, 1]} : vector<2x512xf32> to vector<2x128xf32>
    %cst_165 = arith.constant 0.000000e+00 : f32
    %517 = vector.broadcast %cst_165 : f32 to vector<2x128xf32>
    %518 = arith.subf %517, %516 : vector<2x128xf32>
    %519 = math.exp %518 : vector<2x128xf32>
    %cst_166 = arith.constant 1.000000e+00 : f32
    %520 = vector.broadcast %cst_166 : f32 to vector<2x128xf32>
    %521 = arith.addf %520, %519 : vector<2x128xf32>
    %522 = tpu.reciprocal %521 : vector<2x128xf32> -> vector<2x128xf32>
    %523 = vector.extract_strided_slice %508 {offsets = [0, 256], sizes = [2, 128], strides = [1, 1]} : vector<2x512xf32> to vector<2x128xf32>
    %524 = math.tanh %523 : vector<2x128xf32>
    %525 = vector.extract_strided_slice %508 {offsets = [0, 384], sizes = [2, 128], strides = [1, 1]} : vector<2x512xf32> to vector<2x128xf32>
    %cst_167 = arith.constant 0.000000e+00 : f32
    %526 = vector.broadcast %cst_167 : f32 to vector<2x128xf32>
    %527 = arith.subf %526, %525 : vector<2x128xf32>
    %528 = math.exp %527 : vector<2x128xf32>
    %cst_168 = arith.constant 1.000000e+00 : f32
    %529 = vector.broadcast %cst_168 : f32 to vector<2x128xf32>
    %530 = arith.addf %529, %528 : vector<2x128xf32>
    %531 = tpu.reciprocal %530 : vector<2x128xf32> -> vector<2x128xf32>
    %532 = arith.mulf %522, %482 : vector<2x128xf32>
    %533 = arith.mulf %515, %524 : vector<2x128xf32>
    %534 = arith.addf %532, %533 : vector<2x128xf32>
    %535 = math.tanh %534 : vector<2x128xf32>
    %536 = arith.mulf %531, %535 : vector<2x128xf32>
    %537 = vector.shape_cast %536 : vector<2x128xf32> to vector<2x1x128xf32>
    %538 = vector.broadcast %537 : vector<2x1x128xf32> to vector<2x8x128xf32>
    %539 = arith.mulf %133, %538 : vector<2x8x128xf32>
    %cst_169 = arith.constant dense<0.000000e+00> : vector<2x8xf32>
    %540 = vector.multi_reduction <add>, %539, %cst_169 [2] : vector<2x8x128xf32> to vector<2x8xf32>
    %cst_170 = arith.constant dense<0xFF800000> : vector<2xf32>
    %541 = vector.multi_reduction <maximumf>, %540, %cst_170 [1] : vector<2x8xf32> to vector<2xf32>
    %542 = vector.shape_cast %541 : vector<2xf32> to vector<2x1xf32>
    %543 = vector.broadcast %542 : vector<2x1xf32> to vector<2x8xf32>
    %544 = arith.subf %540, %543 : vector<2x8xf32>
    %545 = math.exp %544 : vector<2x8xf32>
    %cst_171 = arith.constant dense<0.000000e+00> : vector<2xf32>
    %546 = vector.multi_reduction <add>, %545, %cst_171 [1] : vector<2x8xf32> to vector<2xf32>
    %547 = vector.shape_cast %546 : vector<2xf32> to vector<2x1xf32>
    %548 = tpu.reciprocal %547 : vector<2x1xf32> -> vector<2x1xf32>
    %549 = vector.broadcast %548 : vector<2x1xf32> to vector<2x8xf32>
    %550 = arith.mulf %545, %549 : vector<2x8xf32>
    %551 = vector.shape_cast %550 : vector<2x8xf32> to vector<2x8x1xf32>
    %552 = vector.broadcast %551 : vector<2x8x1xf32> to vector<2x8x128xf32>
    %553 = arith.mulf %552, %133 : vector<2x8x128xf32>
    %cst_172 = arith.constant dense<0.000000e+00> : vector<2x128xf32>
    %554 = vector.multi_reduction <add>, %553, %cst_172 [1] : vector<2x8x128xf32> to vector<2x128xf32>
    %555 = tpu.concatenate %536, %554 in 1 : vector<2x128xf32>, vector<2x128xf32> -> vector<2x256xf32>
    %c0_173 = arith.constant 0 : index
    %c0_174 = arith.constant 0 : index
    %556 = vector.load %arg17[%c0_173, %c0_174] : memref<256x128xf32, #tpu.memory_space<vmem>>, vector<256x128xf32>
    %cst_175 = arith.constant dense<0.000000e+00> : vector<2x128xf32>
    %557 = tpu.matmul %555, %556, %cst_175 {dimension_numbers = #tpu.dot_dimension_numbers<[1], [0], [0], [1], [0, 0, 1, 1], [], []>} : vector<2x256xf32>, vector<256x128xf32>, vector<2x128xf32> -> vector<2x128xf32>
    %c0_176 = arith.constant 0 : index
    %c0_177 = arith.constant 0 : index
    %558 = vector.load %arg18[%c0_176, %c0_177] : memref<1x128xf32, #tpu.memory_space<vmem>>, vector<1x128xf32>
    %559 = vector.broadcast %558 : vector<1x128xf32> to vector<2x128xf32>
    %560 = arith.addf %557, %559 : vector<2x128xf32>
    %c0_178 = arith.constant 0 : index
    %c0_179 = arith.constant 0 : index
    %561 = vector.load %arg19[%c0_178, %c0_179] : memref<128x128xf32, #tpu.memory_space<vmem>>, vector<128x128xf32>
    %cst_180 = arith.constant dense<0.000000e+00> : vector<2x128xf32>
    %562 = tpu.matmul %560, %561, %cst_180 {dimension_numbers = #tpu.dot_dimension_numbers<[1], [0], [0], [1], [0, 0, 1, 1], [], []>} : vector<2x128xf32>, vector<128x128xf32>, vector<2x128xf32> -> vector<2x128xf32>
    %c0_181 = arith.constant 0 : index
    %c0_182 = arith.constant 0 : index
    %563 = vector.load %arg20[%c0_181, %c0_182] : memref<1x128xf32, #tpu.memory_space<vmem>>, vector<1x128xf32>
    %564 = vector.broadcast %563 : vector<1x128xf32> to vector<2x128xf32>
    %565 = arith.addf %562, %564 : vector<2x128xf32>
    %c0_183 = arith.constant 0 : index
    %c0_184 = arith.constant 0 : index
    %566 = vector.load %arg21[%c0_183, %c0_184] : memref<2x128xf32, #tpu.memory_space<vmem>>, vector<2x128xf32>
    tpu.vector_store %arg21[%c0_183, %c0_184], %565 {strides = array<i32>} : memref<2x128xf32, #tpu.memory_space<vmem>>, vector<2x128xf32>,
    return
  }
}

</mosaic_0001>

<bundles_post_ra>
// kernel: tpu_custom_call.1
= control target key start
LH: loop header
LB: loop body
LE: loop exit
PB: predicated region body
PF: predicated region fallthrough
CT: control target
= control target key end

     0   :  { %s9601_s0 = inlined_call_operand.hbm [shape: f32[2,8,16], index: 0, kind: input, shape index: {}]   ;;  %s9602_s1 = inlined_call_operand.hbm [shape: f32[2,8,8], index: 1, kind: input, shape index: {}]   ;;  %s9603_s2 = inlined_call_operand.hbm [shape: f32[16,32], index: 2, kind: input, shape index: {}]   ;;  %s9604_s3 = inlined_call_operand.vmem [shape: f32[1,32], index: 3, kind: input, shape index: {}]   ;;  %s9605_s4 = inlined_call_operand.hbm [shape: f32[32,32], index: 4, kind: input, shape index: {}]   ;;  %s9606_s5 = inlined_call_operand.hbm [shape: f32[1,32], index: 5, kind: input, shape index: {}]   ;;  %s9607_s6 = inlined_call_operand.hbm [shape: f32[32,32], index: 6, kind: input, shape index: {}]   ;;  %s9608_s7 = inlined_call_operand.hbm [shape: f32[1,32], index: 7, kind: input, shape index: {}]   ;;  %s9609_s8 = inlined_call_operand.hbm [shape: f32[32,32], index: 8, kind: input, shape index: {}]   ;;  %s9610_s9 = inlined_call_operand.hbm [shape: f32[1,32], index: 9, kind: input, shape index: {}]   ;;  %s9611_s10 = inlined_call_operand.vmem [shape: f32[32,32], index: 10, kind: input, shape index: {}]   ;;  %s9612_s11 = inlined_call_operand.vmem [shape: f32[1,32], index: 11, kind: input, shape index: {}]   ;;  %s9613_s12 = inlined_call_operand.hbm [shape: f32[32,64], index: 12, kind: input, shape index: {}]   ;;  %s9614_s13 = inlined_call_operand.vmem [shape: f32[1,64], index: 13, kind: input, shape index: {}]   ;;  %s9615_s14 = inlined_call_operand.hbm [shape: f32[256,512], index: 14, kind: input, shape index: {}]   ;;  %s9616_s15 = inlined_call_operand.hbm [shape: f32[128,512], index: 15, kind: input, shape index: {}]   ;;  %s9617_s16 = inlined_call_operand.vmem [shape: f32[1,512], index: 16, kind: input, shape index: {}]   ;;  %s9618_s17 = inlined_call_operand.hbm [shape: f32[256,128], index: 17, kind: input, shape index: {}]   ;;  %s9619_s18 = inlined_call_operand.vmem [shape: f32[1,128], index: 18, kind: input, shape index: {}]   ;;  %s9620_s19 = inlined_call_operand.hbm [shape: f32[128,128], index: 19, kind: input, shape index: {}]   ;;  %s9621_s20 = inlined_call_operand.vmem [shape: f32[1,128], index: 20, kind: input, shape index: {}]   ;;  %s9622_s21 = inlined_call_operand.hbm [shape: f32[2,128], index: 21, kind: output, shape index: {}]  }
   0x1   :  { %9800 = sst [smem:[#allocation117_spill]] %s9601_s0 }
   0x2   :  { %9801 = sst [smem:[#allocation118_spill]] %s9602_s1 }
   0x3   :  { %9802 = sst [smem:[#allocation119_spill]] %s9603_s2 }
   0x4   :  { %9803 = sst [smem:[#allocation120_spill]] %s9604_s3 }
   0x5   :  { %9804 = sst [smem:[#allocation121_spill]] %s9605_s4 }
   0x6   :  { %9805 = sst [smem:[#allocation122_spill]] %s9606_s5 }
   0x7   :  { %9806 = sst [smem:[#allocation123_spill]] %s9621_s20 }
   0x8   :  { %9807 = sst [smem:[#allocation124_spill]] %s9622_s21 }
   0x9   :  { %26 = vsyncpa [#allocation3], 0 }
   0xa   :  { %27 = vsyncpa [#allocation6], 0 }
   0xb   :  { %28 = vsyncpa [#allocation9], 0 }
   0xc   :  { %29 = vsyncpa [#allocation12], 0 }
   0xd   :  { %30 = vsyncpa [#allocation15], 0 }
   0xe   :  { %31 = vsyncpa [#allocation18], 0 }
   0xf   :  { %32 = vsyncpa [#allocation21], 0 }
  0x10   :  { %33 = vsyncpa [#allocation24], 0 }
  0x11   :  { %34 = vsyncpa [#allocation4], 0  ;;  %s7826_s2 = smov [#allocation5]   ;;  %s7827_s26 = smov [#allocation8]  }
  0x12   :  { %s52_s25 = sshll.u32 %s7826_s2, 4  ;;  %s78_s27 = sshll.u32 %s7827_s26, 4  ;;  %s53_s25 = int_to_ptr.vmem [resolvable:$true] %s52_s25  ;;  %s7961_s27 = int_to_ptr.vmem [resolvable:$true] %s78_s27 }
  0x13   :  { %s9808_s29 = sld [smem:[#allocation118_spill]] }
  0x19   :  { %s7478_s0 = scalar_lea.hbm %s9808_s29, 256 }
  0x1a   :  { %p7479_p0 = scmp.ne.s32.totalorder %s9808_s29, %s7478_s0  ;;  %p7482_p1 = scmp.lt.u32.totalorder %s7478_s0, %s9808_s29 }
  0x1c   :  { %p7484_p2 = pnand %p7482_p1, %p7479_p0 }
  0x1e   :  { %7487 = shalt.err (!%p7484_p2)
}
  0x1f   :  { %s7488_s23 = scalar_lea.vmem %s53_s25, 256  ;;  %p7493_p4 = scmp.lt.s32.totalorder %s53_s25, %s53_s25 }
  0x20   :  { %p7489_p3 = scmp.ne.s32.totalorder %s53_s25, %s7488_s23  ;;  %p7494_p5 = scmp.lt.s32.totalorder %s7488_s23, %s7488_s23 }
  0x22   :  { %p7495_p6 = por %p7494_p5, %p7493_p4 }
  0x24   :  { %p7496_p7 = pnand %p7495_p6, %p7489_p3 }
  0x26   :  { %7499 = shalt.err (!%p7496_p7)
}
  0x27   :  { %s7828_s1 = smov 128   ;;  %s7829_s24 = smov 8  }
  0x28   :  { %58 = dma.hbm_to_vmem [thread:$0]  %s9808_s29, 256, %s53_s25, [#allocation6], %s7828_s1, %s7828_s1, %s7829_s24  }
  0x29   :  { %s9809_s0 = sld [smem:[#allocation121_spill]] }
  0x2f   :  { %s7500_s4 = scalar_lea.hbm %s9809_s0, 512 }
  0x30   :  { %p7501_p8 = scmp.ne.s32.totalorder %s9809_s0, %s7500_s4  ;;  %p7504_p9 = scmp.lt.u32.totalorder %s7500_s4, %s9809_s0 }
  0x32   :  { %p7506_p10 = pnand %p7504_p9, %p7501_p8 }
  0x34   :  { %7509 = shalt.err (!%p7506_p10)
}
  0x35   :  { %s7510_s21 = scalar_lea.vmem %s7961_s27, 512  ;;  %p7515_p12 = scmp.lt.s32.totalorder %s7961_s27, %s7961_s27 }
  0x36   :  { %p7511_p11 = scmp.ne.s32.totalorder %s7961_s27, %s7510_s21  ;;  %p7516_p13 = scmp.lt.s32.totalorder %s7510_s21, %s7510_s21 }
  0x38   :  { %p7517_p0 = por %p7516_p13, %p7515_p12 }
  0x3a   :  { %p7518_p1 = pnand %p7517_p0, %p7511_p11 }
  0x3c   :  { %7521 = shalt.err (!%p7518_p1)
}
  0x3d   :  { %84 = dma.hbm_to_vmem [thread:$0]  %s9809_s0, 512, %s7961_s27, [#allocation9], %s7828_s1, %s7828_s1, %s7829_s24  }
  0x3e   :  { %s7830_s2 = smov [#allocation11]   ;;  %s7831_s3 = smov [#allocation14]  }
  0x3f   :  { %s100_s26 = sshll.u32 %s7830_s2, 4  ;;  %s122_s28 = sshll.u32 %s7831_s3, 4  ;;  %s101_s26 = int_to_ptr.vmem [resolvable:$true] %s100_s26  ;;  %s7998_s28 = int_to_ptr.vmem [resolvable:$true] %s122_s28 }
  0x40   :  { %s7522_s30 = scalar_lea.hbm %s9607_s6, 512 }
  0x41   :  { %p7523_p2 = scmp.ne.s32.totalorder %s9607_s6, %s7522_s30  ;;  %p7526_p3 = scmp.lt.u32.totalorder %s7522_s30, %s9607_s6 }
  0x43   :  { %p7528_p4 = pnand %p7526_p3, %p7523_p2 }
  0x45   :  { %7531 = shalt.err (!%p7528_p4)
}
  0x46   :  { %s7532_s27 = scalar_lea.vmem %s101_s26, 512  ;;  %p7537_p6 = scmp.lt.s32.totalorder %s101_s26, %s101_s26 }
  0x47   :  { %p7533_p5 = scmp.ne.s32.totalorder %s101_s26, %s7532_s27  ;;  %p7538_p7 = scmp.lt.s32.totalorder %s7532_s27, %s7532_s27 }
  0x49   :  { %p7539_p8 = por %p7538_p7, %p7537_p6 }
  0x4b   :  { %p7540_p9 = pnand %p7539_p8, %p7533_p5 }
  0x4d   :  { %7543 = shalt.err (!%p7540_p9)
}
  0x4e   :  { %106 = dma.hbm_to_vmem [thread:$0]  %s9607_s6, 512, %s101_s26, [#allocation12], %s7828_s1, %s7828_s1, %s7829_s24  }
  0x4f   :  { %s7544_s20 = scalar_lea.hbm %s9609_s8, 512 }
  0x50   :  { %p7545_p10 = scmp.ne.s32.totalorder %s9609_s8, %s7544_s20  ;;  %p7548_p11 = scmp.lt.u32.totalorder %s7544_s20, %s9609_s8 }
  0x52   :  { %p7550_p12 = pnand %p7548_p11, %p7545_p10 }
  0x54   :  { %7553 = shalt.err (!%p7550_p12)
}
  0x55   :  { %s7554_s5 = scalar_lea.vmem %s7998_s28, 512  ;;  %p7559_p0 = scmp.lt.s32.totalorder %s7998_s28, %s7998_s28 }
  0x56   :  { %p7555_p13 = scmp.ne.s32.totalorder %s7998_s28, %s7554_s5  ;;  %p7560_p1 = scmp.lt.s32.totalorder %s7554_s5, %s7554_s5 }
  0x58   :  { %p7561_p2 = por %p7560_p1, %p7559_p0 }
  0x5a   :  { %p7562_p3 = pnand %p7561_p2, %p7555_p13 }
  0x5c   :  { %7565 = shalt.err (!%p7562_p3)
}
  0x5d   :  { %128 = dma.hbm_to_vmem [thread:$0]  %s9609_s8, 512, %s7998_s28, [#allocation15], %s7828_s1, %s7828_s1, %s7829_s24  }
  0x5e   :  { %s7832_s22 = smov [#allocation17]   ;;  %s7566_s25 = scalar_lea.hbm %s9613_s12, 512 }
  0x5f   :  { %s148_s23 = sshll.u32 %s7832_s22, 4  ;;  %p7567_p4 = scmp.ne.s32.totalorder %s9613_s12, %s7566_s25  ;;  %s149_s23 = int_to_ptr.vmem [resolvable:$true] %s148_s23 }
  0x60   :  { %p7570_p5 = scmp.lt.u32.totalorder %s7566_s25, %s9613_s12 }
  0x62   :  { %p7572_p6 = pnand %p7570_p5, %p7567_p4 }
  0x64   :  { %7575 = shalt.err (!%p7572_p6)
}
  0x65   :  { %s7576_s4 = scalar_lea.vmem %s149_s23, 512  ;;  %p7581_p8 = scmp.lt.s32.totalorder %s149_s23, %s149_s23 }
  0x66   :  { %p7577_p7 = scmp.ne.s32.totalorder %s149_s23, %s7576_s4  ;;  %p7582_p9 = scmp.lt.s32.totalorder %s7576_s4, %s7576_s4 }
  0x68   :  { %p7583_p10 = por %p7582_p9, %p7581_p8 }
  0x6a   :  { %p7584_p11 = pnand %p7583_p10, %p7577_p7 }
  0x6c   :  { %7587 = shalt.err (!%p7584_p11)
}
  0x6d   :  { %154 = dma.hbm_to_vmem [thread:$0]  %s9613_s12, 512, %s149_s23, [#allocation18], %s7828_s1, %s7828_s1, %s7829_s24  }
  0x6e   :  { %s7833_s21 = smov [#allocation20]   ;;  %s7834_s5 = smov [#allocation2]  }
  0x6f   :  { %s174_s30 = sshll.u32 %s7833_s21, 4  ;;  %s40_s6 = sshll.u32 %s7834_s5, 4  ;;  %s175_s30 = int_to_ptr.vmem [resolvable:$true] %s174_s30  ;;  %s41_s6 = int_to_ptr.vmem [resolvable:$true] %s40_s6 }
  0x70   :  { %s7588_s27 = scalar_lea.hbm %s9616_s15, 8192 }
  0x71   :  { %p7589_p12 = scmp.ne.s32.totalorder %s9616_s15, %s7588_s27  ;;  %p7592_p13 = scmp.lt.u32.totalorder %s7588_s27, %s9616_s15 }
  0x73   :  { %p7594_p0 = pnand %p7592_p13, %p7589_p12 }
  0x75   :  { %7597 = shalt.err (!%p7594_p0)
}
  0x76   :  { %s7598_s12 = scalar_lea.vmem %s175_s30, 8192  ;;  %p7603_p2 = scmp.lt.s32.totalorder %s175_s30, %s175_s30 }
  0x77   :  { %p7599_p1 = scmp.ne.s32.totalorder %s175_s30, %s7598_s12  ;;  %p7604_p3 = scmp.lt.s32.totalorder %s7598_s12, %s7598_s12 }
  0x79   :  { %p7605_p4 = por %p7604_p3, %p7603_p2 }
  0x7b   :  { %p7606_p5 = pnand %p7605_p4, %p7599_p1 }
  0x7d   :  { %7609 = shalt.err (!%p7606_p5)
}
  0x7e   :  { %s7835_s23 = smov 512   ;;  %s7836_s20 = smov 32  }
  0x7f   :  { %180 = dma.hbm_to_vmem [thread:$0]  %s9616_s15, 8192, %s175_s30, [#allocation21], %s7835_s23, %s7835_s23, %s7836_s20  }
  0x80   :  { %s9810_s21 = sld [smem:[#allocation117_spill]] }
  0x86   :  { %s7610_s5 = scalar_lea.hbm %s9810_s21, 256 }
  0x87   :  { %p7611_p6 = scmp.ne.s32.totalorder %s9810_s21, %s7610_s5  ;;  %p7614_p7 = scmp.lt.u32.totalorder %s7610_s5, %s9810_s21 }
  0x89   :  { %p7616_p8 = pnand %p7614_p7, %p7611_p6 }
  0x8b   :  { %7619 = shalt.err (!%p7616_p8)
}
  0x8c   :  { %s7620_s25 = scalar_lea.vmem %s41_s6, 256  ;;  %p7625_p10 = scmp.lt.s32.totalorder %s41_s6, %s41_s6 }
  0x8d   :  { %p7621_p9 = scmp.ne.s32.totalorder %s41_s6, %s7620_s25  ;;  %p7626_p11 = scmp.lt.s32.totalorder %s7620_s25, %s7620_s25 }
  0x8f   :  { %p7627_p12 = por %p7626_p11, %p7625_p10 }
  0x91   :  { %p7628_p13 = pnand %p7627_p12, %p7621_p9 }
  0x93   :  { %7631 = shalt.err (!%p7628_p13)
}
  0x94   :  { %46 = dma.hbm_to_vmem [thread:$0]  %s9810_s21, 256, %s41_s6, [#allocation3], %s7828_s1, %s7828_s1, %s7829_s24  }
  0x95   :  { %s7837_s29 = smov [#allocation7]   ;;  %s7838_s12 = smov [#allocation10]  }
  0x96   :  { %s64_s2 = sshll.u32 %s7837_s29, 4  ;;  %s91_s3 = sshll.u32 %s7838_s12, 4  ;;  %s65_s2 = int_to_ptr.vmem [resolvable:$true] %s64_s2  ;;  %s92_s3 = int_to_ptr.vmem [resolvable:$true] %s91_s3 }
  0x97   :  { %s9811_s28 = sld [smem:[#allocation119_spill]] }
  0x9d   :  { %s7632_s5 = scalar_lea.hbm %s9811_s28, 256 }
  0x9e   :  { %p7633_p0 = scmp.ne.s32.totalorder %s9811_s28, %s7632_s5  ;;  %p7636_p1 = scmp.lt.u32.totalorder %s7632_s5, %s9811_s28 }
  0xa0   :  { %p7638_p2 = pnand %p7636_p1, %p7633_p0 }
  0xa2   :  { %7641 = shalt.err (!%p7638_p2)
}
  0xa3   :  { %s7642_s6 = scalar_lea.vmem %s65_s2, 256  ;;  %p7647_p4 = scmp.lt.s32.totalorder %s65_s2, %s65_s2 }
  0xa4   :  { %p7643_p3 = scmp.ne.s32.totalorder %s65_s2, %s7642_s6  ;;  %p7648_p5 = scmp.lt.s32.totalorder %s7642_s6, %s7642_s6 }
  0xa6   :  { %p7649_p6 = por %p7648_p5, %p7647_p4 }
  0xa8   :  { %p7650_p7 = pnand %p7649_p6, %p7643_p3 }
  0xaa   :  { %7653 = shalt.err (!%p7650_p7)
}
  0xab   :  { %70 = dma.hbm_to_vmem [thread:$0]  %s9811_s28, 256, %s65_s2, [#allocation6], %s7828_s1, %s7828_s1, %s7829_s24  }
  0xac   :  { %s9812_s29 = sld [smem:[#allocation122_spill]] }
  0xb2   :  { %s7654_s12 = scalar_lea.hbm %s9812_s29, 16 }
  0xb3   :  { %p7655_p8 = scmp.ne.s32.totalorder %s9812_s29, %s7654_s12  ;;  %p7658_p9 = scmp.lt.u32.totalorder %s7654_s12, %s9812_s29 }
  0xb5   :  { %p7660_p10 = pnand %p7658_p9, %p7655_p8 }
  0xb7   :  { %7663 = shalt.err (!%p7660_p10)
}
  0xb8   :  { %s7664_s22 = scalar_lea.vmem %s92_s3, 16  ;;  %s7668_s27 = scalar_lea.vmem %s92_s3, 32 }
  0xb9   :  { %p7665_p11 = scmp.ne.s32.totalorder %s92_s3, %s7664_s22  ;;  %p7669_p12 = scmp.lt.s32.totalorder %s92_s3, %s92_s3 }
  0xba   :  { %p7670_p13 = scmp.lt.s32.totalorder %s7668_s27, %s7664_s22 }
  0xbc   :  { %p7671_p0 = por %p7670_p13, %p7669_p12 }
  0xbe   :  { %p7672_p1 = pnand %p7671_p0, %p7665_p11 }
  0xc0   :  { %7675 = shalt.err (!%p7672_p1)
}
  0xc1   :  { %94 = dma.hbm_to_vmem [thread:$0]  %s9812_s29, 16, %s92_s3, [#allocation9]  }
  0xc2   :  { %s7839_s0 = smov [#allocation13]   ;;  %s7840_s21 = smov [#allocation16]  }
  0xc3   :  { %s113_s6 = sshll.u32 %s7839_s0, 4  ;;  %s135_s25 = sshll.u32 %s7840_s21, 4  ;;  %s114_s6 = int_to_ptr.vmem [resolvable:$true] %s113_s6  ;;  %s136_s25 = int_to_ptr.vmem [resolvable:$true] %s135_s25 }
  0xc4   :  { %s7676_s12 = scalar_lea.hbm %s9608_s7, 16 }
  0xc5   :  { %p7677_p2 = scmp.ne.s32.totalorder %s9608_s7, %s7676_s12  ;;  %p7680_p3 = scmp.lt.u32.totalorder %s7676_s12, %s9608_s7 }
  0xc7   :  { %p7682_p4 = pnand %p7680_p3, %p7677_p2 }
  0xc9   :  { %7685 = shalt.err (!%p7682_p4)
}
  0xca   :  { %s7686_s3 = scalar_lea.vmem %s114_s6, 16  ;;  %s7690_s29 = scalar_lea.vmem %s114_s6, 32 }
  0xcb   :  { %p7687_p5 = scmp.ne.s32.totalorder %s114_s6, %s7686_s3  ;;  %p7691_p6 = scmp.lt.s32.totalorder %s114_s6, %s114_s6 }
  0xcc   :  { %p7692_p7 = scmp.lt.s32.totalorder %s7690_s29, %s7686_s3 }
  0xce   :  { %p7693_p8 = por %p7692_p7, %p7691_p6 }
  0xd0   :  { %p7694_p9 = pnand %p7693_p8, %p7687_p5 }
  0xd2   :  { %7697 = shalt.err (!%p7694_p9)
}
  0xd3   :  { %116 = dma.hbm_to_vmem [thread:$0]  %s9608_s7, 16, %s114_s6, [#allocation12]  }
  0xd4   :  { %s7698_s0 = scalar_lea.hbm %s9610_s9, 16 }
  0xd5   :  { %p7699_p10 = scmp.ne.s32.totalorder %s9610_s9, %s7698_s0  ;;  %p7702_p11 = scmp.lt.u32.totalorder %s7698_s0, %s9610_s9 }
  0xd7   :  { %p7704_p12 = pnand %p7702_p11, %p7699_p10 }
  0xd9   :  { %7707 = shalt.err (!%p7704_p12)
}
  0xda   :  { %s7708_s4 = scalar_lea.vmem %s136_s25, 16  ;;  %s7712_s8 = scalar_lea.vmem %s136_s25, 32 }
  0xdb   :  { %p7709_p13 = scmp.ne.s32.totalorder %s136_s25, %s7708_s4  ;;  %p7713_p0 = scmp.lt.s32.totalorder %s136_s25, %s136_s25 }
  0xdc   :  { %p7714_p1 = scmp.lt.s32.totalorder %s7712_s8, %s7708_s4 }
  0xde   :  { %p7715_p2 = por %p7714_p1, %p7713_p0 }
  0xe0   :  { %p7716_p3 = pnand %p7715_p2, %p7709_p13 }
  0xe2   :  { %7719 = shalt.err (!%p7716_p3)
}
  0xe3   :  { %138 = dma.hbm_to_vmem [thread:$0]  %s9610_s9, 16, %s136_s25, [#allocation15]  }
  0xe4   :  { %s7841_s5 = smov [#allocation19]   ;;  %s7842_s3 = smov [#allocation22]  }
  0xe5   :  { %s162_s26 = sshll.u32 %s7841_s5, 4  ;;  %s188_s29 = sshll.u32 %s7842_s3, 4  ;;  %s163_s26 = int_to_ptr.vmem [resolvable:$true] %s162_s26  ;;  %s189_s29 = int_to_ptr.vmem [resolvable:$true] %s188_s29 }
  0xe6   :  { %s7720_s2 = scalar_lea.hbm %s9615_s14, 16384 }
  0xe7   :  { %p7721_p4 = scmp.ne.s32.totalorder %s9615_s14, %s7720_s2  ;;  %p7724_p5 = scmp.lt.u32.totalorder %s7720_s2, %s9615_s14 }
  0xe9   :  { %p7726_p6 = pnand %p7724_p5, %p7721_p4 }
  0xeb   :  { %7729 = shalt.err (!%p7726_p6)
}
  0xec   :  { %s7730_s9 = scalar_lea.vmem %s163_s26, 16384  ;;  %p7735_p8 = scmp.lt.s32.totalorder %s163_s26, %s163_s26 }
  0xed   :  { %p7731_p7 = scmp.ne.s32.totalorder %s163_s26, %s7730_s9  ;;  %p7736_p9 = scmp.lt.s32.totalorder %s7730_s9, %s7730_s9 }
  0xef   :  { %p7737_p10 = por %p7736_p9, %p7735_p8 }
  0xf1   :  { %p7738_p11 = pnand %p7737_p10, %p7731_p7 }
  0xf3   :  { %7741 = shalt.err (!%p7738_p11)
}
  0xf4   :  { %168 = dma.hbm_to_vmem [thread:$0]  %s9615_s14, 16384, %s163_s26, [#allocation18], %s7835_s23, %s7835_s23, %s7836_s20  }
  0xf5   :  { %s7742_s8 = scalar_lea.hbm %s9618_s17, 4096 }
  0xf6   :  { %p7743_p12 = scmp.ne.s32.totalorder %s9618_s17, %s7742_s8  ;;  %p7746_p13 = scmp.lt.u32.totalorder %s7742_s8, %s9618_s17 }
  0xf8   :  { %p7748_p0 = pnand %p7746_p13, %p7743_p12 }
  0xfa   :  { %7751 = shalt.err (!%p7748_p0)
}
  0xfb   :  { %s7752_s22 = scalar_lea.vmem %s189_s29, 4096  ;;  %p7757_p2 = scmp.lt.s32.totalorder %s189_s29, %s189_s29 }
  0xfc   :  { %p7753_p1 = scmp.ne.s32.totalorder %s189_s29, %s7752_s22  ;;  %p7758_p3 = scmp.lt.s32.totalorder %s7752_s22, %s7752_s22 }
  0xfe   :  { %p7759_p4 = por %p7758_p3, %p7757_p2 }
 0x100   :  { %p7760_p5 = pnand %p7759_p4, %p7753_p1 }
 0x102   :  { %7763 = shalt.err (!%p7760_p5)
}
 0x103   :  { %194 = dma.hbm_to_vmem [thread:$0]  %s9618_s17, 4096, %s189_s29, [#allocation21], %s7828_s1, %s7828_s1, %s7829_s24  }
 0x104   :  { %s7843_s26 = smov [#allocation23]   ;;  %s7764_s0 = scalar_lea.hbm %s9620_s19, 2048 }
 0x105   :  { %s202_s27 = sshll.u32 %s7843_s26, 4  ;;  %p7765_p6 = scmp.ne.s32.totalorder %s9620_s19, %s7764_s0  ;;  %s203_s27 = int_to_ptr.vmem [resolvable:$true] %s202_s27 }
 0x106   :  { %p7768_p7 = scmp.lt.u32.totalorder %s7764_s0, %s9620_s19 }
 0x108   :  { %p7770_p8 = pnand %p7768_p7, %p7765_p6 }
 0x10a   :  { %7773 = shalt.err (!%p7770_p8)
}
 0x10b   :  { %s7774_s30 = scalar_lea.vmem %s203_s27, 2048  ;;  %p7779_p10 = scmp.lt.s32.totalorder %s203_s27, %s203_s27 }
 0x10c   :  { %p7775_p9 = scmp.ne.s32.totalorder %s203_s27, %s7774_s30  ;;  %p7780_p11 = scmp.lt.s32.totalorder %s7774_s30, %s7774_s30 }
 0x10e   :  { %p7781_p12 = por %p7780_p11, %p7779_p10 }
 0x110   :  { %p7782_p13 = pnand %p7781_p12, %p7775_p9 }
 0x112   :  { %7785 = shalt.err (!%p7782_p13)
}
 0x113   :  { %208 = dma.hbm_to_vmem [thread:$0]  %s9620_s19, 2048, %s203_s27, [#allocation24], %s7828_s1, %s7828_s1, %s7829_s24  }
 0x114   :  { %7808 = dma.done.wait [#allocation3], 256  }
 0x115   :  { %7809 = vsyncadd [#allocation3], 4294967040 }
 0x116   :  { %7810 = dma.done.wait [#allocation6], 512  }
 0x117   :  { %7811 = vsyncadd [#allocation6], 4294966784 }
 0x118   :  { %7812 = dma.done.wait [#allocation9], 528  }
 0x119   :  { %7813 = vsyncadd [#allocation9], 4294966768 }
 0x11a   :  { %7814 = dma.done.wait [#allocation12], 528  }
 0x11b   :  { %7815 = vsyncadd [#allocation12], 4294966768 }
 0x11c   :  { %7816 = dma.done.wait [#allocation15], 528  }
 0x11d   :  { %7817 = vsyncadd [#allocation15], 4294966768 }
 0x11e   :  { %7818 = dma.done.wait [#allocation18], 16896  }
 0x11f   :  { %7819 = vsyncadd [#allocation18], 4294950400 }
 0x120   :  { %7820 = dma.done.wait [#allocation21], 12288  }
 0x121   :  { %7821 = vsyncadd [#allocation21], 4294955008 }
 0x122   :  { %7822 = dma.done.wait [#allocation24], 2048  }
 0x123   :  { %7823 = vsyncadd [#allocation24], 4294965248  ;;  %v9629_v0 = vmov 0.0   ;;  %vm7845_vm0 = vmmov 0   ;;  %vm265_vm1 = vcmask 64512   ;;  %v253_v1 = vld [vmem:[#allocation2] sm:$0xff] }
 0x124   :  { %5470 = vmatprep.subr.mxu0 %v9629_v0  ;;  %5475 = vmatprep.subr.mxu1 %v9629_v0  ;;  %v254_v2 = vld [vmem:[#allocation2 + $0x8] sm:$0xff]  ;;  %v8182_v3 = vld [vmem:[#allocation5] sm:$0xff]  ;;  %v8184_v4 = vld [vmem:[#allocation5 + $0x8] sm:$0xff]  ;;  %vm418_vm2 = vcmask 130048   ;;  %s9813_s24 = sld [smem:[#allocation120_spill]]  ;;  %vm508_vm3 = vcmask 261120  }
 0x125   :  { %5472 = vmatprep.mubr.msk.f32.mxu0 %vm7845_vm0, %v9629_v0  ;;  %5477 = vmatprep.mubr.msk.f32.mxu1 %vm7845_vm0, %v9629_v0  ;;  %v257_v5 = vld [vmem:[#allocation7] sm:$0xff]  ;;  %v258_v6 = vld [vmem:[#allocation7 + $0x8] sm:$0xff]  ;;  %v260_v8 = vld [vmem:[#allocation8] sm:$0xff]  ;;  %vm1324_vm4 = vcmask 523264   ;;  %vm1933_vm5 = vcmask 1041409   ;;  %vm1936_vm6 = vcmask 58368  }
 0x126   :  { %5471 = vmatpush3.msra.mxu0 %v253_v1  ;;  %5476 = vmatpush3.msra.mxu1 %v254_v2  ;;  %v5597_v7 = vpack.c.bf16 %v258_v6, %v257_v5  ;;  %v261_v9 = vld [vmem:[#allocation8 + $0x8] sm:$0xff]  ;;  %v262_v15 = vld [vmem:[#allocation8 + $0x10] sm:$0xff]  ;;  %v263_v16 = vld [vmem:[#allocation8 + $0x18] sm:$0xff]  ;;  %s10309_s0 = sld [smem:[#allocation123_spill]]  ;;  %s7850_s21 = smov [#allocation25]  }
 0x127   :  { %5473 = vmatmul.mubr.msk.f32.vlgmr.msra.gmra.mrb[0].mxu0 %vm265_vm1, %v8182_v3  ;;  %5478 = vmatmul.mubr.msk.f32.vlgmr.msra.gmra.mrb[0].mxu1 %vm265_vm1, %v8184_v4  ;;  %v5601_v10 = vpack.c.bf16 %v261_v9, %v260_v8  ;;  %v5605_v17 = vpack.c.bf16 %v263_v16, %v262_v15  ;;  %v5351_v25 = vld [vmem:[#allocation10] ss:$0 sm:$0xff]  ;;  %v632_v58 = vld [vmem:[#allocation11] sm:$0xff]  ;;  %v633_v59 = vld [vmem:[#allocation11 + $0x8] sm:$0xff]  ;;  %s5330_s15 = sshll.u32 %s7850_s21, 4  ;;  %s5331_s15 = int_to_ptr.vmem [resolvable:$true] %s5330_s15 }
 0x128   :  { %5598 = vmatprep.subr.bf16.mxu0 %v5597_v7  ;;  %v5609_v60 = vpack.c.bf16 %v633_v59, %v632_v58  ;;  %v634_v8 = vld [vmem:[#allocation11 + $0x10] sm:$0xff]  ;;  %v635_v9 = vld [vmem:[#allocation11 + $0x18] sm:$0xff]  ;;  %s7786_s9 = scalar_lea.vmem %s5331_s15, 32  ;;  %p7791_p1 = scmp.lt.s32.totalorder %s5331_s15, %s5331_s15 }
 0x129   :  { %5600 = vmatpush3.bf16.msra.mxu0 %v5597_v7  ;;  %5602 = vmatprep.subr.bf16.mxu1 %v5601_v10  ;;  %p7787_p0 = scmp.ne.s32.totalorder %s5331_s15, %s7786_s9  ;;  %p7792_p2 = scmp.lt.s32.totalorder %s7786_s9, %s7786_s9 }
 0x12a   :  { %5498 = vmatprep.subr.mxu0 %v9629_v0  ;;  %5604 = vmatpush3.bf16.msra.mxu1 %v5601_v10  ;;  %v5348_v18 = vld [vmem:[%s9813_s24] ss:$0 sm:$0xff]  ;;  %v5613_v10 = vpack.c.bf16 %v635_v9, %v634_v8  ;;  %v999_v8 = vld [vmem:[%s9611_s10 + $0x8] sm:$0xff] }
 0x12b   :  { %5606 = vmatprep.subr.bf16.mxu1 %v5605_v17  ;;  %p7793_p3 = por %p7792_p2, %p7791_p1 }
 0x12d   :  { %p7794_p4 = pnand %p7793_p3, %p7787_p0 }
 0x12e   :  { %5608 = vmatpush3.bf16.msra.mxu1 %v5605_v17 }
 0x12f   :  { %5610 = vmatprep.subr.bf16.mxu1 %v5609_v60 }
 0x1fa   :  { %v335_v11 = vpop.f32.mrb[0].mxu0  ;;  %v408_v12 = vpop.f32.mrb[0].mxu1 }
 0x1fb   :  { %v5474_v13 = vpop.f32.mrb[1].mxu0  ;;  %v5479_v14 = vpop.f32.mrb[1].mxu1  ;;  %5484 = vmatprep.mubr.msk.f32.mxu0 %vm418_vm2, %v335_v11  ;;  %v637_v11 = vld [vmem:[#allocation14] sm:$0xff] }
 0x1fc   :  { %5485 = vmatmul.mubr.msk.f32.vlgmr.msra.gmra.mrb[2].mxu0 %vm418_vm2, %v408_v12  ;;  %v638_v12 = vld [vmem:[#allocation14 + $0x8] sm:$0xff] }
 0x1fd   :  { %5500 = vmatprep.mubr.msk.f32.mxu0 %vm7845_vm0, %v9629_v0  ;;  %v5617_v13 = vpack.c.bf16 %v638_v12, %v637_v11  ;;  %v1000_v12 = vld [vmem:[%s9611_s10 + $0x10] sm:$0xff] }
 0x2cf   :  { %v5486_v19 = vpop.f32.mrb[2].mxu0 }
 0x2d0   :  { %v497_v20 = vadd.f32 %v5486_v19, %v5348_v18  ;;  %v491_v21 = vpop.f32.mrb[3].mxu0  ;;  %v640_v19 = vld [vmem:[#allocation14 + $0x18] sm:$0xff] }
 0x2d1   :  { %v492_v22 = vadd.f32 %v5348_v18, %v491_v21  ;;  %v639_v18 = vld [vmem:[#allocation14 + $0x10] sm:$0xff]  ;;  %v5356_v21 = vld [vmem:[#allocation13] ss:$0 sm:$0xff] }
 0x2d2   :  { %v501_v24 = vmax.f32 %v497_v20, 0.0  ;;  %v5621_v20 = vpack.c.bf16 %v640_v19, %v639_v18  ;;  %v1003_v19 = vld [vmem:[#allocation17] sm:$0xff] }
 0x2d3   :  { %v500_v23 = vmax.f32 %v492_v22, 0.0 }
 0x2d5   :  { %5495 = vmatprep.mubr.msk.f32.mxu1 %vm508_vm3, %v500_v23 }
 0x2d6   :  { %5496 = vmatmul.mubr.msk.f32.vlgmr.msra.gmra.mrb[2].mxu1 %vm508_vm3, %v501_v24 }
 0x2d7   :  { %5612 = vmatpush3.bf16.msra.mxu1 %v5609_v60 }
 0x2d8   :  { %5614 = vmatprep.subr.bf16.mxu1 %v5613_v10 }
 0x2db   :  { %5616 = vmatpush3.bf16.msra.mxu1 %v5613_v10 }
 0x2dc   :  { %5530 = vmatprep.subr.mxu1 %v9629_v0 }
 0x3a9   :  { %v5497_v26 = vpop.f32.mrb[2].mxu1 }
 0x3aa   :  { %v587_v27 = vadd.f32 %v5497_v26, %v5351_v25  ;;  %v581_v28 = vpop.f32.mrb[3].mxu1 }
 0x3ab   :  { %v582_v29 = vadd.f32 %v5351_v25, %v581_v28  ;;  %v5359_v28 = vld [vmem:[#allocation16] ss:$0 sm:$0xff] }
 0x3ac   :  { %v591_v30 = vsel %vm508_vm3, %v587_v27, 0.0 }
 0x3ad   :  { %v590_v31 = vsel %vm508_vm3, %v582_v29, 0.0 }
 0x3ae   :  { %v592_v32 = vadd.f32 %v591_v30, %v590_v31 }
 0x3b0   :  { %v594_v33 = vmul.f32 0.5, %v592_v32 }
 0x3b2   :  { %v595_v34 = vsub.f32 %v582_v29, %v594_v33  ;;  %v596_v35 = vsub.f32 %v587_v27, %v594_v33 }
 0x3b4   :  { %v597_v36 = vmul.f32 %v595_v34, %v595_v34  ;;  %v598_v37 = vmul.f32 %v596_v35, %v596_v35 }
 0x3b6   :  { %v599_v38 = vsel %vm508_vm3, %v597_v36, 0.0  ;;  %v600_v39 = vsel %vm508_vm3, %v598_v37, 0.0 }
 0x3b7   :  { %v601_v40 = vadd.f32 %v600_v39, %v599_v38 }
 0x3b9   :  { %7292 = vrsqrt.f32 %v601_v40 }
 0x3c3   :  { %v7293_v41 = vpop.eup %7292 }
 0x3c4   :  { %v603_v42 = vmul.f32 %v7293_v41, %v595_v34  ;;  %v604_v43 = vmul.f32 %v7293_v41, %v596_v35 }
 0x3c6   :  { %v605_v44 = vmax.f32 %v603_v42, 0.0  ;;  %v606_v46 = vmax.f32 %v604_v43, 0.0 }
 0x3c8   :  { %v607_v45 = vsel %vm508_vm3, %v605_v44, 0.0  ;;  %v610_v47 = vsel %vm508_vm3, %v606_v46, 0.0 }
 0x3c9   :  { %608 = vadd.xlane.f32.xlu0 %v607_v45 }
 0x3cd   :  { %611 = vadd.xlane.f32.xlu0 %v610_v47 }
 0x456   :  { %v609_v48 = vpop.xlane.xlu0 %608 }
 0x45a   :  { %v612_v49 = vpop.xlane.xlu0 %611 }
 0x45b   :  { %v613_v50 = vadd.f32 %v612_v49, %v609_v48 }
 0x45d   :  { %v615_v51 = vmul.f32 0.015625, %v613_v50 }
 0x45f   :  { %v616_v52 = vsub.f32 %v605_v44, %v615_v51  ;;  %v617_v53 = vsub.f32 %v606_v46, %v615_v51 }
 0x461   :  { %v618_v54 = vmul.f32 %v616_v52, %v616_v52  ;;  %v619_v56 = vmul.f32 %v617_v53, %v617_v53 }
 0x463   :  { %v620_v55 = vsel %vm508_vm3, %v618_v54, 0.0  ;;  %v623_v57 = vsel %vm508_vm3, %v619_v56, 0.0 }
 0x464   :  { %621 = vadd.xlane.f32.xlu1 %v620_v55 }
 0x468   :  { %624 = vadd.xlane.f32.xlu1 %v623_v57 }
 0x4f1   :  { %v622_v61 = vpop.xlane.xlu1 %621 }
 0x4f5   :  { %v625_v62 = vpop.xlane.xlu1 %624 }
 0x4f6   :  { %v626_v63 = vadd.f32 %v625_v62, %v622_v61 }
 0x4f8   :  { %v627_v1 = vmul.f32 0.015625, %v626_v63 }
 0x4fa   :  { %v628_v2 = vadd.f32 1e-05, %v627_v1 }
 0x4fc   :  { %7294 = vrsqrt.f32 %v628_v2 }
 0x506   :  { %v7295_v5 = vpop.eup %7294 }
 0x507   :  { %v8206_v6 = vmul.f32 %v7295_v5, %v616_v52  ;;  %v8209_v7 = vmul.f32 %v7295_v5, %v617_v53  ;;  %v998_v5 = vld [vmem:[%s9611_s10] sm:$0xff] }
 0x509   :  { %5499 = vmatpush3.msra.mxu0 %v8206_v6 }
 0x50a   :  { %5501 = vmatmul.mubr.msk.f32.vlgmr.msra.gmra.mrb[4].mxu0 %vm265_vm1, %v8182_v3  ;;  %5503 = vmatprep.subr.mxu0 %v9629_v0 }
 0x50b   :  { %5504 = vmatpush3.msra.mxu0 %v8209_v7  ;;  %5505 = vmatprep.mubr.msk.f32.mxu0 %vm7845_vm0, %v9629_v0 }
 0x50c   :  { %5618 = vmatprep.subr.bf16.mxu0 %v5617_v13 }
 0x50e   :  { %5506 = vmatmul.mubr.msk.f32.vlgmr.msra.gmra.mrb[6].mxu0 %vm265_vm1, %v8184_v4 }
 0x50f   :  { %5620 = vmatpush3.bf16.msra.mxu0 %v5617_v13  ;;  %v1001_v13 = vld [vmem:[%s9611_s10 + $0x18] sm:$0xff] }
 0x510   :  { %5622 = vmatprep.subr.bf16.mxu0 %v5621_v20 }
 0x513   :  { %5624 = vmatpush3.bf16.msra.mxu0 %v5621_v20  ;;  %v1004_v20 = vld [vmem:[#allocation17 + $0x8] sm:$0xff] }
 0x514   :  { %5535 = vmatprep.subr.mxu0 %v9629_v0 }
 0x5dd   :  { %v708_v14 = vpop.f32.mrb[4].mxu0 }
 0x5de   :  { %v5502_v15 = vpop.f32.mrb[5].mxu0  ;;  %5516 = vmatprep.mubr.msk.f32.mxu1 %vm508_vm3, %v708_v14  ;;  %v5625_v14 = vpack.c.bf16 %v999_v8, %v998_v5  ;;  %v1543_v5 = vld [vmem:[#allocation20 + $0x1c0] sm:$0xff] }
 0x5df   :  { %v5629_v15 = vpack.c.bf16 %v1001_v13, %v1000_v12  ;;  %v1547_v8 = vld [vmem:[#allocation20 + $0x1e0] sm:$0xff] }
 0x5e0   :  { %v1359_v13 = vld [vmem:[#allocation19] sm:$0xff] }
 0x5e1   :  { %v778_v16 = vpop.f32.mrb[6].mxu0 }
 0x5e2   :  { %v5507_v17 = vpop.f32.mrb[7].mxu0  ;;  %5517 = vmatmul.mubr.msk.f32.vlgmr.msra.gmra.mrb[4].mxu1 %vm508_vm3, %v778_v16  ;;  %v1488_v16 = vld [vmem:[#allocation20 + $0x8] sm:$0xff] }
 0x5e3   :  { %5532 = vmatprep.mubr.msk.f32.mxu1 %vm7845_vm0, %v9629_v0  ;;  %v1492_v17 = vld [vmem:[#allocation20 + $0x28] sm:$0xff] }
 0x5e4   :  { %v8255_v18 = vpack.c.bf16 %v1492_v17, %v1488_v16  ;;  %v1372_v16 = vld [vmem:[#allocation19 + $0x68] sm:$0xff] }
 0x5e6   :  { %9814 = vst [vmem:[#allocation35_spill] sm:$0xff] %v8255_v18 }
 0x6b5   :  { %v5518_v22 = vpop.f32.mrb[4].mxu1 }
 0x6b6   :  { %v866_v23 = vadd.f32 %v5518_v22, %v5356_v21  ;;  %v860_v24 = vpop.f32.mrb[5].mxu1  ;;  %v1487_v22 = vld [vmem:[#allocation20] sm:$0xff] }
 0x6b7   :  { %v861_v25 = vadd.f32 %v5356_v21, %v860_v24  ;;  %v5633_v21 = vpack.c.bf16 %v1004_v20, %v1003_v19  ;;  %v1500_v24 = vld [vmem:[#allocation20 + $0x68] sm:$0xff]  ;;  %v1367_v20 = vld [vmem:[#allocation19 + $0x40] sm:$0xff] }
 0x6b8   :  { %v870_v27 = vmax.f32 %v866_v23, 0.0  ;;  %v1496_v23 = vld [vmem:[#allocation20 + $0x48] sm:$0xff] }
 0x6b9   :  { %v869_v26 = vmax.f32 %v861_v25, 0.0 }
 0x6bb   :  { %5527 = vmatprep.mubr.msk.f32.mxu0 %vm508_vm3, %v869_v26 }
 0x6bc   :  { %5528 = vmatmul.mubr.msk.f32.vlgmr.msra.gmra.mrb[8].mxu0 %vm508_vm3, %v870_v27  ;;  %v8260_v27 = vpack.c.bf16 %v1500_v24, %v1496_v23 }
 0x6bd   :  { %5537 = vmatprep.mubr.msk.f32.mxu0 %vm7845_vm0, %v9629_v0 }
 0x6be   :  { %9816 = vst [vmem:[#allocation37_spill] sm:$0xff] %v8260_v27 }
 0x78f   :  { %v5529_v29 = vpop.f32.mrb[8].mxu0 }
 0x790   :  { %v955_v30 = vadd.f32 %v5529_v29, %v5359_v28  ;;  %v949_v31 = vpop.f32.mrb[9].mxu0  ;;  %v1499_v29 = vld [vmem:[#allocation20 + $0x60] sm:$0xff] }
 0x791   :  { %v950_v32 = vadd.f32 %v5359_v28, %v949_v31  ;;  %v1495_v28 = vld [vmem:[#allocation20 + $0x40] sm:$0xff] }
 0x792   :  { %v959_v33 = vsel %vm508_vm3, %v955_v30, 0.0 }
 0x793   :  { %v958_v34 = vsel %vm508_vm3, %v950_v32, 0.0 }
 0x794   :  { %v960_v35 = vadd.f32 %v959_v33, %v958_v34  ;;  %v1508_v33 = vld [vmem:[#allocation20 + $0xa8] sm:$0xff]  ;;  %v8265_v34 = vpack.c.bf16 %v1499_v29, %v1495_v28 }
 0x795   :  { %v1384_v28 = vld [vmem:[#allocation19 + $0xc8] sm:$0xff] }
 0x796   :  { %v961_v36 = vmul.f32 0.5, %v960_v35  ;;  %9817 = vst [vmem:[#allocation38_spill] sm:$0xff] %v8265_v34  ;;  %v1388_v29 = vld [vmem:[#allocation19 + $0xe8] sm:$0xff] }
 0x798   :  { %v962_v37 = vsub.f32 %v950_v32, %v961_v36  ;;  %v963_v38 = vsub.f32 %v955_v30, %v961_v36  ;;  %v1504_v32 = vld [vmem:[#allocation20 + $0x88] sm:$0xff]  ;;  %v1503_v36 = vld [vmem:[#allocation20 + $0x80] sm:$0xff] }
 0x799   :  { %v8269_v35 = vpack.c.bf16 %v1508_v33, %v1504_v32  ;;  %v1383_v32 = vld [vmem:[#allocation19 + $0xc0] sm:$0xff] }
 0x79a   :  { %v964_v39 = vmul.f32 %v962_v37, %v962_v37  ;;  %v965_v40 = vmul.f32 %v963_v38, %v963_v38  ;;  %v1387_v33 = vld [vmem:[#allocation19 + $0xe0] sm:$0xff] }
 0x79b   :  { %9818 = vst [vmem:[#allocation39_spill] sm:$0xff] %v8269_v35 }
 0x79c   :  { %v966_v41 = vsel %vm508_vm3, %v964_v39, 0.0  ;;  %v967_v42 = vsel %vm508_vm3, %v965_v40, 0.0  ;;  %v1516_v39 = vld [vmem:[#allocation20 + $0xe8] sm:$0xff] }
 0x79d   :  { %v968_v43 = vadd.f32 %v967_v42, %v966_v41  ;;  %v1511_v42 = vld [vmem:[#allocation20 + $0xc0] sm:$0xff] }
 0x79f   :  { %7296 = vrsqrt.f32 %v968_v43  ;;  %v1515_v43 = vld [vmem:[#allocation20 + $0xe0] sm:$0xff] }
 0x7a9   :  { %v7297_v44 = vpop.eup %7296 }
 0x7aa   :  { %v971_v45 = vmul.f32 %v7297_v44, %v963_v38  ;;  %v970_v46 = vmul.f32 %v7297_v44, %v962_v37  ;;  %v1507_v37 = vld [vmem:[#allocation20 + $0xa0] sm:$0xff]  ;;  %v1512_v38 = vld [vmem:[#allocation20 + $0xc8] sm:$0xff] }
 0x7ab   :  { %v8272_v40 = vpack.c.bf16 %v1507_v37, %v1503_v36  ;;  %v8275_v41 = vpack.c.bf16 %v1516_v39, %v1512_v38  ;;  %v1520_v44 = vld [vmem:[#allocation20 + $0x108] sm:$0xff]  ;;  %v8328_v38 = vpack.c.bf16 %v1387_v33, %v1383_v32 }
 0x7ac   :  { %v973_v47 = vmax.f32 %v971_v45, 0.0  ;;  %v972_v48 = vmax.f32 %v970_v46, 0.0  ;;  %v1524_v45 = vld [vmem:[#allocation20 + $0x128] sm:$0xff]  ;;  %v8278_v46 = vpack.c.bf16 %v1515_v43, %v1511_v42  ;;  %v1391_v42 = vld [vmem:[#allocation19 + $0x100] sm:$0xff] }
 0x7ad   :  { %9819 = vst [vmem:[#allocation40_spill] sm:$0xff] %v8272_v40  ;;  %9820 = vst [vmem:[#allocation41_spill] sm:$0xff] %v8275_v41  ;;  %v1392_v36 = vld [vmem:[#allocation19 + $0x108] sm:$0xff]  ;;  %v1395_v43 = vld [vmem:[#allocation19 + $0x120] sm:$0xff] }
 0x7ae   :  { %v977_v49 = vsel %vm508_vm3, %v973_v47, 0.0  ;;  %v974_v50 = vsel %vm508_vm3, %v972_v48, 0.0  ;;  %9821 = vst [vmem:[#allocation42_spill] sm:$0xff] %v8278_v46  ;;  %v1396_v37 = vld [vmem:[#allocation19 + $0x128] sm:$0xff] }
 0x7af   :  { %978 = vadd.xlane.f32.xlu1 %v977_v49  ;;  %975 = vadd.xlane.f32.xlu0 %v974_v50  ;;  %v1523_v49 = vld [vmem:[#allocation20 + $0x120] sm:$0xff]  ;;  %v1528_v50 = vld [vmem:[#allocation20 + $0x148] sm:$0xff]  ;;  %v8331_v39 = vpack.c.bf16 %v1396_v37, %v1392_v36 }
 0x7b0   :  { %v1432_v33 = vld [vmem:[#allocation19 + $0x248] sm:$0xff] }
 0x7b1   :  { %v1436_v36 = vld [vmem:[#allocation19 + $0x268] sm:$0xff] }
 0x7b2   :  { %v8365_v37 = vpack.c.bf16 %v1436_v36, %v1432_v33  ;;  %v1463_v33 = vld [vmem:[#allocation19 + $0x340] sm:$0xff] }
 0x7b3   :  { %v1467_v36 = vld [vmem:[#allocation19 + $0x360] sm:$0xff] }
 0x7b4   :  { %9841 = vst [vmem:[#allocation62_spill] sm:$0xff] %v8365_v37 }
 0x83c   :  { %v979_v51 = vpop.xlane.xlu1 %978  ;;  %v976_v52 = vpop.xlane.xlu0 %975 }
 0x83d   :  { %v980_v53 = vadd.f32 %v979_v51, %v976_v52  ;;  %v1532_v51 = vld [vmem:[#allocation20 + $0x168] sm:$0xff] }
 0x83f   :  { %v981_v54 = vmul.f32 0.015625, %v980_v53  ;;  %v8287_v53 = vpack.c.bf16 %v1532_v51, %v1528_v50  ;;  %v1399_v50 = vld [vmem:[#allocation19 + $0x140] sm:$0xff] }
 0x840   :  { %v1403_v51 = vld [vmem:[#allocation19 + $0x160] sm:$0xff] }
 0x841   :  { %v982_v55 = vsub.f32 %v972_v48, %v981_v54  ;;  %v983_v56 = vsub.f32 %v973_v47, %v981_v54  ;;  %v8281_v47 = vpack.c.bf16 %v1524_v45, %v1520_v44  ;;  %v1519_v48 = vld [vmem:[#allocation20 + $0x100] sm:$0xff]  ;;  %9824 = vst [vmem:[#allocation45_spill] sm:$0xff] %v8287_v53  ;;  %v1400_v44 = vld [vmem:[#allocation19 + $0x148] sm:$0xff] }
 0x842   :  { %v8284_v52 = vpack.c.bf16 %v1523_v49, %v1519_v48  ;;  %v1527_v54 = vld [vmem:[#allocation20 + $0x140] sm:$0xff]  ;;  %v1404_v45 = vld [vmem:[#allocation19 + $0x168] sm:$0xff]  ;;  %v8334_v48 = vpack.c.bf16 %v1395_v43, %v1391_v42 }
 0x843   :  { %v985_v57 = vmul.f32 %v983_v56, %v983_v56  ;;  %v984_v58 = vmul.f32 %v982_v55, %v982_v55  ;;  %9822 = vst [vmem:[#allocation43_spill] sm:$0xff] %v8281_v47  ;;  %v8337_v49 = vpack.c.bf16 %v1404_v45, %v1400_v44  ;;  %v1431_v42 = vld [vmem:[#allocation19 + $0x240] sm:$0xff]  ;;  %v1440_v45 = vld [vmem:[#allocation19 + $0x288] sm:$0xff] }
 0x844   :  { %9823 = vst [vmem:[#allocation44_spill] sm:$0xff] %v8284_v52  ;;  %9831 = vst [vmem:[#allocation52_spill] sm:$0xff] %v8334_v48  ;;  %v1435_v43 = vld [vmem:[#allocation19 + $0x260] sm:$0xff] }
 0x845   :  { %v989_v59 = vsel %vm508_vm3, %v985_v57, 0.0  ;;  %v986_v60 = vsel %vm508_vm3, %v984_v58, 0.0  ;;  %v1540_v57 = vld [vmem:[#allocation20 + $0x1a8] sm:$0xff]  ;;  %9832 = vst [vmem:[#allocation53_spill] sm:$0xff] %v8337_v49  ;;  %v8367_v44 = vpack.c.bf16 %v1435_v43, %v1431_v42  ;;  %v8391_v43 = vpack.c.bf16 %v1467_v36, %v1463_v33 }
 0x846   :  { %990 = vadd.xlane.f32.xlu1 %v989_v59  ;;  %987 = vadd.xlane.f32.xlu0 %v986_v60  ;;  %v1535_v60 = vld [vmem:[#allocation20 + $0x180] sm:$0xff] }
 0x847   :  { %9842 = vst [vmem:[#allocation63_spill] sm:$0xff] %v8367_v44  ;;  %9850 = vst [vmem:[#allocation71_spill] sm:$0xff] %v8391_v43 }
 0x8d3   :  { %v991_v61 = vpop.xlane.xlu1 %990  ;;  %v988_v62 = vpop.xlane.xlu0 %987 }
 0x8d4   :  { %v992_v63 = vadd.f32 %v991_v61, %v988_v62  ;;  %v1539_v61 = vld [vmem:[#allocation20 + $0x1a0] sm:$0xff]  ;;  %v1544_v62 = vld [vmem:[#allocation20 + $0x1c8] sm:$0xff] }
 0x8d6   :  { %v993_v1 = vmul.f32 0.015625, %v992_v63  ;;  %v1548_v63 = vld [vmem:[#allocation20 + $0x1e8] sm:$0xff] }
 0x8d8   :  { %v994_v2 = vadd.f32 1e-05, %v993_v1  ;;  %v8296_v1 = vpack.c.bf16 %v1539_v61, %v1535_v60  ;;  %v1407_v60 = vld [vmem:[#allocation19 + $0x180] sm:$0xff] }
 0x8d9   :  { %v1411_v61 = vld [vmem:[#allocation19 + $0x1a0] sm:$0xff] }
 0x8da   :  { %7298 = vrsqrt.f32 %v994_v2  ;;  %9827 = vst [vmem:[#allocation48_spill] sm:$0xff] %v8296_v1  ;;  %v8299_v2 = vpack.c.bf16 %v1548_v63, %v1544_v62  ;;  %v8346_v62 = vpack.c.bf16 %v1411_v61, %v1407_v60  ;;  %v1416_v63 = vld [vmem:[#allocation19 + $0x1c8] sm:$0xff] }
 0x8db   :  { %v1448_v61 = vld [vmem:[#allocation19 + $0x2c8] sm:$0xff] }
 0x8dc   :  { %9828 = vst [vmem:[#allocation49_spill] sm:$0xff] %v8299_v2  ;;  %9835 = vst [vmem:[#allocation56_spill] sm:$0xff] %v8346_v62 }
 0x8e4   :  { %v7299_v9 = vpop.eup %7298 }
 0x8e5   :  { %v997_v10 = vmul.f32 %v7299_v9, %v983_v56  ;;  %v996_v11 = vmul.f32 %v7299_v9, %v982_v55  ;;  %v1531_v55 = vld [vmem:[#allocation20 + $0x160] sm:$0xff]  ;;  %v1536_v56 = vld [vmem:[#allocation20 + $0x188] sm:$0xff] }
 0x8e6   :  { %v8290_v58 = vpack.c.bf16 %v1531_v55, %v1527_v54  ;;  %v8293_v59 = vpack.c.bf16 %v1540_v57, %v1536_v56  ;;  %v1360_v9 = vld [vmem:[#allocation19 + $0x8] sm:$0xff]  ;;  %v8340_v56 = vpack.c.bf16 %v1403_v51, %v1399_v50  ;;  %v1439_v51 = vld [vmem:[#allocation19 + $0x280] sm:$0xff] }
 0x8e7   :  { %1343 = vrot.lane.b32.xlu1 %v997_v10, %s7836_s20  ;;  %5536 = vmatpush3.msra.mxu0 %v997_v10  ;;  %v1364_v10 = vld [vmem:[#allocation19 + $0x28] sm:$0xff] }
 0x8e8   :  { %1341 = vrot.lane.b32.xlu0 %v996_v11, %s7836_s20  ;;  %5531 = vmatpush3.msra.mxu1 %v996_v11  ;;  %9825 = vst [vmem:[#allocation46_spill] sm:$0xff] %v8290_v58  ;;  %9826 = vst [vmem:[#allocation47_spill] sm:$0xff] %v8293_v59  ;;  %v8302_v11 = vpack.c.bf16 %v1547_v8, %v1543_v5  ;;  %v8305_v12 = vpack.c.bf16 %v1364_v10, %v1360_v9  ;;  %v1408_v54 = vld [vmem:[#allocation19 + $0x188] sm:$0xff]  ;;  %v1415_v9 = vld [vmem:[#allocation19 + $0x1c0] sm:$0xff] }
 0x8e9   :  { %5533 = vmatmul.mubr.msk.f32.vlgmr.msra.gmra.mrb[6].mxu1 %vm265_vm1, %v8182_v3  ;;  %5538 = vmatmul.mubr.msk.f32.vlgmr.msra.gmra.mrb[10].mxu0 %vm265_vm1, %v8184_v4  ;;  %v1491_v3 = vld [vmem:[#allocation20 + $0x20] sm:$0xff]  ;;  %v1412_v55 = vld [vmem:[#allocation19 + $0x1a8] sm:$0xff]  ;;  %9833 = vst [vmem:[#allocation54_spill] sm:$0xff] %v8340_v56 }
 0x8ea   :  { %5626 = vmatprep.subr.bf16.mxu1 %v5625_v14  ;;  %5634 = vmatprep.subr.bf16.mxu0 %v5633_v21  ;;  %v8258_v4 = vpack.c.bf16 %v1491_v3, %v1487_v22  ;;  %9829 = vst [vmem:[#allocation50_spill] sm:$0xff] %v8302_v11  ;;  %9830 = vst [vmem:[#allocation51_spill] sm:$0xff] %v8305_v12  ;;  %v1376_v22 = vld [vmem:[#allocation19 + $0x88] sm:$0xff]  ;;  %v8343_v57 = vpack.c.bf16 %v1412_v55, %v1408_v54  ;;  %v1419_v10 = vld [vmem:[#allocation19 + $0x1e0] sm:$0xff] }
 0x8eb   :  { %5628 = vmatpush3.bf16.msra.mxu1 %v5625_v14  ;;  %5636 = vmatpush3.bf16.msra.mxu0 %v5633_v21  ;;  %v1363_v14 = vld [vmem:[#allocation19 + $0x20] sm:$0xff]  ;;  %v1380_v3 = vld [vmem:[#allocation19 + $0xa8] sm:$0xff] }
 0x8ec   :  { %5630 = vmatprep.subr.bf16.mxu1 %v5629_v15  ;;  %9815 = vst [vmem:[#allocation36_spill] sm:$0xff] %v8258_v4  ;;  %v8308_v17 = vpack.c.bf16 %v1363_v14, %v1359_v13  ;;  %v1371_v21 = vld [vmem:[#allocation19 + $0x60] sm:$0xff]  ;;  %v8319_v24 = vpack.c.bf16 %v1380_v3, %v1376_v22  ;;  %9834 = vst [vmem:[#allocation55_spill] sm:$0xff] %v8343_v57  ;;  %v1420_v5 = vld [vmem:[#allocation19 + $0x1e8] sm:$0xff]  ;;  %v8352_v13 = vpack.c.bf16 %v1419_v10, %v1415_v9 }
 0x8ed   :  { %v8315_v23 = vpack.c.bf16 %v1371_v21, %v1367_v20  ;;  %v8350_v8 = vpack.c.bf16 %v1420_v5, %v1416_v63  ;;  %v1005_v14 = vld [vmem:[#allocation17 + $0x10] sm:$0xff]  ;;  %v1424_v20 = vld [vmem:[#allocation19 + $0x208] sm:$0xff]  ;;  %v1423_v3 = vld [vmem:[#allocation19 + $0x200] sm:$0xff] }
 0x8ee   :  { %9837 = vst [vmem:[#allocation58_spill] sm:$0xff] %v8352_v13  ;;  %v1428_v21 = vld [vmem:[#allocation19 + $0x228] sm:$0xff]  ;;  %v1443_v54 = vld [vmem:[#allocation19 + $0x2a0] sm:$0xff] }
 0x8ef   :  { %5632 = vmatpush3.bf16.msra.mxu1 %v5629_v15  ;;  %v1368_v15 = vld [vmem:[#allocation19 + $0x48] sm:$0xff]  ;;  %9836 = vst [vmem:[#allocation57_spill] sm:$0xff] %v8350_v8  ;;  %v8356_v22 = vpack.c.bf16 %v1428_v21, %v1424_v20  ;;  %v8373_v60 = vpack.c.bf16 %v1443_v54, %v1439_v51  ;;  %v1447_v5 = vld [vmem:[#allocation19 + $0x2c0] sm:$0xff] }
 0x8f0   :  { %5642 = vmatprep.subr.bf16.mxu1 %v8255_v18  ;;  %v8311_v19 = vpack.c.bf16 %v1372_v16, %v1368_v15  ;;  %v1006_v15 = vld [vmem:[#allocation17 + $0x18] sm:$0xff]  ;;  %v1444_v50 = vld [vmem:[#allocation19 + $0x2a8] sm:$0xff]  ;;  %v1451_v9 = vld [vmem:[#allocation19 + $0x2e0] sm:$0xff] }
 0x8f1   :  { %v5637_v16 = vpack.c.bf16 %v1006_v15, %v1005_v14  ;;  %9838 = vst [vmem:[#allocation59_spill] sm:$0xff] %v8356_v22  ;;  %v8371_v55 = vpack.c.bf16 %v1444_v50, %v1440_v45  ;;  %9844 = vst [vmem:[#allocation65_spill] sm:$0xff] %v8373_v60  ;;  %v1452_v63 = vld [vmem:[#allocation19 + $0x2e8] sm:$0xff]  ;;  %v8379_v14 = vpack.c.bf16 %v1451_v9, %v1447_v5  ;;  %v1455_v20 = vld [vmem:[#allocation19 + $0x300] sm:$0xff] }
 0x8f2   :  { %v8377_v10 = vpack.c.bf16 %v1452_v63, %v1448_v61  ;;  %v1456_v15 = vld [vmem:[#allocation19 + $0x308] sm:$0xff]  ;;  %v1459_v21 = vld [vmem:[#allocation19 + $0x320] sm:$0xff] }
 0x8f3   :  { %5638 = vmatprep.subr.bf16.mxu0 %v5637_v16  ;;  %9843 = vst [vmem:[#allocation64_spill] sm:$0xff] %v8371_v55  ;;  %9846 = vst [vmem:[#allocation67_spill] sm:$0xff] %v8379_v14  ;;  %v1472_v45 = vld [vmem:[#allocation19 + $0x388] sm:$0xff]  ;;  %v1471_v51 = vld [vmem:[#allocation19 + $0x380] sm:$0xff] }
 0x8f4   :  { %5640 = vmatpush3.bf16.msra.mxu0 %v5637_v16  ;;  %9845 = vst [vmem:[#allocation66_spill] sm:$0xff] %v8377_v10  ;;  %v1460_v16 = vld [vmem:[#allocation19 + $0x328] sm:$0xff]  ;;  %v1475_v54 = vld [vmem:[#allocation19 + $0x3a0] sm:$0xff] }
 0x8f5   :  { %v1476_v50 = vld [vmem:[#allocation19 + $0x3a8] sm:$0xff]  ;;  %v8397_v63 = vpack.c.bf16 %v1475_v54, %v1471_v51  ;;  %v1498_v54 = vld [vmem:[#allocation20 + $0x58] sm:$0xff] }
 0x8f6   :  { %v8395_v61 = vpack.c.bf16 %v1476_v50, %v1472_v45  ;;  %v1480_v5 = vld [vmem:[#allocation19 + $0x3c8] sm:$0xff]  ;;  %v1489_v45 = vld [vmem:[#allocation20 + $0x10] sm:$0xff] }
 0x8f7   :  { %9852 = vst [vmem:[#allocation73_spill] sm:$0xff] %v8397_v63  ;;  %v1484_v9 = vld [vmem:[#allocation19 + $0x3e8] sm:$0xff]  ;;  %v1493_v50 = vld [vmem:[#allocation20 + $0x30] sm:$0xff] }
 0x8f8   :  { %9851 = vst [vmem:[#allocation72_spill] sm:$0xff] %v8395_v61 }
 0x9bc   :  { %v1074_v25 = vpop.f32.mrb[6].mxu1  ;;  %v1144_v26 = vpop.f32.mrb[10].mxu0 }
 0x9bd   :  { %5548 = vmatprep.mubr.msk.f32.mxu1 %vm508_vm3, %v1074_v25  ;;  %v5534_v30 = vpop.f32.mrb[7].mxu1  ;;  %v5539_v31 = vpop.f32.mrb[11].mxu0  ;;  %v1375_v25 = vld [vmem:[#allocation19 + $0x80] sm:$0xff] }
 0x9be   :  { %5549 = vmatmul.mubr.msk.f32.vlgmr.msra.gmra.mrb[8].mxu1 %vm508_vm3, %v1144_v26  ;;  %v1379_v26 = vld [vmem:[#allocation19 + $0xa0] sm:$0xff]  ;;  %v8325_v31 = vpack.c.bf16 %v1388_v29, %v1384_v28  ;;  %v1494_v28 = vld [vmem:[#allocation20 + $0x38] sm:$0xff] }
 0x9bf   :  { %5644 = vmatpush1.bf16.msra.mxu1 %v8258_v4  ;;  %1616 = vmatprep.mubr.f32.mxu1 %v9629_v0  ;;  %v8322_v30 = vpack.c.bf16 %v1379_v26, %v1375_v25  ;;  %v1427_v25 = vld [vmem:[#allocation19 + $0x220] sm:$0xff]  ;;  %v1490_v26 = vld [vmem:[#allocation20 + $0x18] sm:$0xff] }
 0x9c0   :  { %5646 = vmatprep.subr.bf16.mxu1 %v8260_v27  ;;  %v8359_v29 = vpack.c.bf16 %v1427_v25, %v1423_v3  ;;  %v8361_v32 = vpack.c.bf16 %v1494_v28, %v1490_v26  ;;  %v8383_v3 = vpack.c.bf16 %v1460_v16, %v1456_v15  ;;  %v8385_v25 = vpack.c.bf16 %v1459_v21, %v1455_v20  ;;  %v1464_v26 = vld [vmem:[#allocation19 + $0x348] sm:$0xff]  ;;  %v1479_v15 = vld [vmem:[#allocation19 + $0x3c0] sm:$0xff] }
 0x9c1   :  { %v1468_v28 = vld [vmem:[#allocation19 + $0x368] sm:$0xff]  ;;  %v1483_v16 = vld [vmem:[#allocation19 + $0x3e0] sm:$0xff]  ;;  %v8401_v20 = vpack.c.bf16 %v1484_v9, %v1480_v5  ;;  %v1502_v5 = vld [vmem:[#allocation20 + $0x78] sm:$0xff] }
 0x9c2   :  { %9839 = vst [vmem:[#allocation60_spill] sm:$0xff] %v8359_v29  ;;  %9840 = vst [vmem:[#allocation61_spill] sm:$0xff] %v8361_v32  ;;  %5674 = vmatprep.subr.bf16.mxu0 %v8361_v32  ;;  %v8389_v42 = vpack.c.bf16 %v1468_v28, %v1464_v26  ;;  %v8403_v21 = vpack.c.bf16 %v1483_v16, %v1479_v15  ;;  %v5364_v26 = vld [vmem:[%s9612_s11] ss:$0 sm:$0xff]  ;;  %v8429_v15 = vpack.c.bf16 %v1493_v50, %v1489_v45  ;;  %v1509_v45 = vld [vmem:[#allocation20 + $0xb0] sm:$0xff] }
 0x9c3   :  { %5648 = vmatpush1.bf16.msra.mxu1 %v8265_v34  ;;  %9847 = vst [vmem:[#allocation68_spill] sm:$0xff] %v8383_v3  ;;  %9848 = vst [vmem:[#allocation69_spill] sm:$0xff] %v8385_v25  ;;  %v1514_v50 = vld [vmem:[#allocation20 + $0xd8] sm:$0xff] }
 0x9c4   :  { %5650 = vmatprep.subr.bf16.mxu1 %v8269_v35  ;;  %9849 = vst [vmem:[#allocation70_spill] sm:$0xff] %v8389_v42  ;;  %9853 = vst [vmem:[#allocation74_spill] sm:$0xff] %v8401_v20 }
 0x9c5   :  { %9854 = vst [vmem:[#allocation75_spill] sm:$0xff] %v8403_v21 }
 0x9c7   :  { %5652 = vmatpush1.bf16.msra.mxu1 %v8272_v40 }
 0x9c8   :  { %5654 = vmatprep.subr.bf16.mxu1 %v8275_v41 }
 0x9cb   :  { %5656 = vmatpush1.bf16.msra.mxu1 %v8278_v46 }
 0x9cc   :  { %5658 = vmatprep.subr.bf16.mxu1 %v8281_v47 }
 0x9cf   :  { %5660 = vmatpush1.bf16.msra.mxu1 %v8284_v52 }
 0x9d0   :  { %5662 = vmatprep.subr.bf16.mxu1 %v8287_v53 }
 0x9d3   :  { %5664 = vmatpush1.bf16.msra.mxu1 %v8290_v58 }
 0x9d4   :  { %5666 = vmatprep.subr.bf16.mxu1 %v8293_v59 }
 0x9d7   :  { %5668 = vmatpush1.bf16.msra.mxu1 %v8296_v1 }
 0x9d8   :  { %5670 = vmatprep.subr.bf16.mxu1 %v8299_v2 }
 0x9db   :  { %5672 = vmatpush1.bf16.msra.mxu1 %v8302_v11 }
 0x9dc   :  { %5706 = vmatprep.subr.bf16.mxu1 %v8305_v12 }
 0x9de   :  { %1617 = vmatmul.mubr.f32.vlgmr.msra.gmra.mrb[10].mxu1 %v9629_v0 }
 0x9df   :  { %5708 = vmatpush1.bf16.msra.mxu1 %v8308_v17  ;;  %1758 = vmatprep.mubr.f32.mxu1 %v9629_v0 }
 0x9e0   :  { %5710 = vmatprep.subr.bf16.mxu1 %v8311_v19 }
 0x9e3   :  { %5712 = vmatpush1.bf16.msra.mxu1 %v8315_v23 }
 0x9e4   :  { %5714 = vmatprep.subr.bf16.mxu1 %v8319_v24 }
 0x9e7   :  { %5716 = vmatpush1.bf16.msra.mxu1 %v8322_v30 }
 0x9e8   :  { %5718 = vmatprep.subr.bf16.mxu1 %v8325_v31 }
 0x9eb   :  { %5720 = vmatpush1.bf16.msra.mxu1 %v8328_v38 }
 0x9ec   :  { %5722 = vmatprep.subr.bf16.mxu1 %v8331_v39 }
 0x9ef   :  { %5724 = vmatpush1.bf16.msra.mxu1 %v8334_v48 }
 0x9f0   :  { %5726 = vmatprep.subr.bf16.mxu1 %v8337_v49 }
 0x9f3   :  { %5728 = vmatpush1.bf16.msra.mxu1 %v8340_v56 }
 0x9f4   :  { %5730 = vmatprep.subr.bf16.mxu1 %v8343_v57 }
 0x9f7   :  { %5732 = vmatpush1.bf16.msra.mxu1 %v8346_v62 }
 0x9f8   :  { %5734 = vmatprep.subr.bf16.mxu1 %v8350_v8 }
 0x9fb   :  { %5736 = vmatpush1.bf16.msra.mxu1 %v8352_v13 }
 0x9fc   :  { %5738 = vmatprep.subr.bf16.mxu1 %v8356_v22  ;;  %v1441_v22 = vld [vmem:[#allocation19 + $0x290] sm:$0xff] }
 0x9ff   :  { %5740 = vmatpush1.bf16.msra.mxu1 %v8359_v29  ;;  %v1437_v29 = vld [vmem:[#allocation19 + $0x270] sm:$0xff] }
 0xa00   :  { %5742 = vmatprep.subr.bf16.mxu1 %v8365_v37  ;;  %v1433_v37 = vld [vmem:[#allocation19 + $0x250] sm:$0xff] }
 0xa03   :  { %5744 = vmatpush1.bf16.msra.mxu1 %v8367_v44  ;;  %v1429_v44 = vld [vmem:[#allocation19 + $0x230] sm:$0xff] }
 0xa04   :  { %5746 = vmatprep.subr.bf16.mxu1 %v8371_v55  ;;  %v1425_v55 = vld [vmem:[#allocation19 + $0x210] sm:$0xff] }
 0xa07   :  { %5748 = vmatpush1.bf16.msra.mxu1 %v8373_v60  ;;  %v1421_v60 = vld [vmem:[#allocation19 + $0x1f0] sm:$0xff] }
 0xa08   :  { %5750 = vmatprep.subr.bf16.mxu1 %v8377_v10  ;;  %v1417_v10 = vld [vmem:[#allocation19 + $0x1d0] sm:$0xff] }
 0xa0b   :  { %5752 = vmatpush1.bf16.msra.mxu1 %v8379_v14  ;;  %v1413_v14 = vld [vmem:[#allocation19 + $0x1b0] sm:$0xff] }
 0xa0c   :  { %5754 = vmatprep.subr.bf16.mxu1 %v8383_v3  ;;  %v1409_v3 = vld [vmem:[#allocation19 + $0x190] sm:$0xff] }
 0xa0f   :  { %5756 = vmatpush1.bf16.msra.mxu1 %v8385_v25  ;;  %v1405_v25 = vld [vmem:[#allocation19 + $0x170] sm:$0xff] }
 0xa10   :  { %5758 = vmatprep.subr.bf16.mxu1 %v8389_v42  ;;  %v1401_v42 = vld [vmem:[#allocation19 + $0x150] sm:$0xff] }
 0xa13   :  { %5760 = vmatpush1.bf16.msra.mxu1 %v8391_v43  ;;  %v1397_v43 = vld [vmem:[#allocation19 + $0x130] sm:$0xff] }
 0xa14   :  { %5762 = vmatprep.subr.bf16.mxu1 %v8395_v61  ;;  %v1393_v61 = vld [vmem:[#allocation19 + $0x110] sm:$0xff] }
 0xa17   :  { %5764 = vmatpush1.bf16.msra.mxu1 %v8397_v63  ;;  %v1398_v63 = vld [vmem:[#allocation19 + $0x138] sm:$0xff] }
 0xa18   :  { %5766 = vmatprep.subr.bf16.mxu1 %v8401_v20  ;;  %v1394_v20 = vld [vmem:[#allocation19 + $0x118] sm:$0xff] }
 0xa1b   :  { %5768 = vmatpush1.bf16.msra.mxu1 %v8403_v21 }
 0xa1c   :  { %5834 = vmatprep.subr.bf16.mxu1 %v8255_v18 }
 0xa1e   :  { %1759 = vmatmul.mubr.f32.vlgmr.msra.gmra.mrb[10].mxu1 %v9629_v0 }
 0xa1f   :  { %5836 = vmatpush1.bf16.msra.mxu1 %v8258_v4  ;;  %2084 = vmatprep.mubr.f32.mxu1 %v9629_v0  ;;  %v8431_v0 = vpack.c.bf16 %v1502_v5, %v1498_v54  ;;  %v1373_v4 = vld [vmem:[#allocation19 + $0x70] sm:$0xff] }
 0xa20   :  { %5838 = vmatprep.subr.bf16.mxu1 %v8260_v27  ;;  %v1369_v27 = vld [vmem:[#allocation19 + $0x50] sm:$0xff] }
 0xa23   :  { %5840 = vmatpush1.bf16.msra.mxu1 %v8265_v34  ;;  %v1365_v34 = vld [vmem:[#allocation19 + $0x30] sm:$0xff] }
 0xa24   :  { %5842 = vmatprep.subr.bf16.mxu1 %v8269_v35  ;;  %v1361_v35 = vld [vmem:[#allocation19 + $0x10] sm:$0xff] }
 0xa27   :  { %5844 = vmatpush1.bf16.msra.mxu1 %v8272_v40  ;;  %v1549_v40 = vld [vmem:[#allocation20 + $0x1f0] sm:$0xff] }
 0xa28   :  { %5846 = vmatprep.subr.bf16.mxu1 %v8275_v41  ;;  %v1545_v41 = vld [vmem:[#allocation20 + $0x1d0] sm:$0xff] }
 0xa2b   :  { %5848 = vmatpush1.bf16.msra.mxu1 %v8278_v46  ;;  %v1541_v46 = vld [vmem:[#allocation20 + $0x1b0] sm:$0xff] }
 0xa2c   :  { %5850 = vmatprep.subr.bf16.mxu1 %v8281_v47  ;;  %v1537_v47 = vld [vmem:[#allocation20 + $0x190] sm:$0xff] }
 0xa2f   :  { %5852 = vmatpush1.bf16.msra.mxu1 %v8284_v52  ;;  %v1533_v52 = vld [vmem:[#allocation20 + $0x170] sm:$0xff] }
 0xa30   :  { %5854 = vmatprep.subr.bf16.mxu1 %v8287_v53  ;;  %v1529_v53 = vld [vmem:[#allocation20 + $0x150] sm:$0xff] }
 0xa33   :  { %5856 = vmatpush1.bf16.msra.mxu1 %v8290_v58  ;;  %v1525_v58 = vld [vmem:[#allocation20 + $0x130] sm:$0xff] }
 0xa34   :  { %5858 = vmatprep.subr.bf16.mxu1 %v8293_v59  ;;  %v1521_v59 = vld [vmem:[#allocation20 + $0x110] sm:$0xff] }
 0xa37   :  { %5860 = vmatpush1.bf16.msra.mxu1 %v8296_v1  ;;  %v1510_v1 = vld [vmem:[#allocation20 + $0xb8] sm:$0xff] }
 0xa38   :  { %5862 = vmatprep.subr.bf16.mxu1 %v8299_v2  ;;  %v1506_v2 = vld [vmem:[#allocation20 + $0x98] sm:$0xff] }
 0xa3b   :  { %5864 = vmatpush1.bf16.msra.mxu1 %v8302_v11  ;;  %v1497_v11 = vld [vmem:[#allocation20 + $0x50] sm:$0xff] }
 0xa3c   :  { %5898 = vmatprep.subr.bf16.mxu1 %v8305_v12  ;;  %v1501_v12 = vld [vmem:[#allocation20 + $0x70] sm:$0xff] }
 0xa91   :  { %v5550_v28 = vpop.f32.mrb[8].mxu1 }
 0xa92   :  { %v1232_v33 = vadd.f32 %v5550_v28, %v5364_v26  ;;  %v1226_v36 = vpop.f32.mrb[9].mxu1  ;;  %v8436_v28 = vpack.c.bf16 %v1501_v12, %v1497_v11  ;;  %v1513_v11 = vld [vmem:[#allocation20 + $0xd0] sm:$0xff] }
 0xa93   :  { %v1227_v51 = vadd.f32 %v5364_v26, %v1226_v36  ;;  %v9856_v26 = vmov 0.0   ;;  %v8440_v36 = vpack.c.bf16 %v1510_v1, %v1506_v2  ;;  %v1517_v12 = vld [vmem:[#allocation20 + $0xf0] sm:$0xff] }
 0xa94   :  { %v1236_v16 = vmax.f32 %v1232_v33, 0.0  ;;  %9855 = vst [vmem:[#allocation76_spill] sm:$0xff] %v8436_v28  ;;  %v1505_v33 = vld [vmem:[#allocation20 + $0x90] sm:$0xff]  ;;  %v8449_v1 = vpack.c.bf16 %v1517_v12, %v1513_v11  ;;  %v1538_v11 = vld [vmem:[#allocation20 + $0x198] sm:$0xff] }
 0xa95   :  { %v1235_v9 = vmax.f32 %v1227_v51, 0.0  ;;  %9857 = vst [vmem:[#allocation77_spill] sm:$0xff] %v8440_v36  ;;  %v1518_v51 = vld [vmem:[#allocation20 + $0xf8] sm:$0xff]  ;;  %v8443_v54 = vpack.c.bf16 %v1509_v45, %v1505_v33 }
 0xa96   :  { %v8446_v5 = vpack.c.bf16 %v1518_v51, %v1514_v50  ;;  %9860 = vst [vmem:[#allocation80_spill] sm:$0xff] %v8449_v1  ;;  %v1530_v33 = vld [vmem:[#allocation20 + $0x158] sm:$0xff]  ;;  %v8455_v50 = vpack.c.bf16 %v1525_v58, %v1521_v59 }
 0xa97   :  { %5559 = vmatprep.mubr.msk.f32.mxu0 %vm508_vm3, %v1235_v9  ;;  %9858 = vst [vmem:[#allocation78_spill] sm:$0xff] %v8443_v54  ;;  %v1522_v9 = vld [vmem:[#allocation20 + $0x118] sm:$0xff] }
 0xa98   :  { %5560 = vmatmul.mubr.msk.f32.vlgmr.msra.gmra.mrb[12].mxu0 %vm508_vm3, %v1236_v16  ;;  %9859 = vst [vmem:[#allocation79_spill] sm:$0xff] %v8446_v5  ;;  %v1526_v16 = vld [vmem:[#allocation20 + $0x138] sm:$0xff]  ;;  %9862 = vst [vmem:[#allocation82_spill] sm:$0xff] %v8455_v50 }
 0xa99   :  { %5676 = vmatpush1.bf16.msra.mxu0 %v8429_v15  ;;  %1687 = vmatprep.mubr.f32.mxu0 %v9856_v26  ;;  %v8452_v2 = vpack.c.bf16 %v1526_v16, %v1522_v9  ;;  %v1534_v45 = vld [vmem:[#allocation20 + $0x178] sm:$0xff]  ;;  %v8461_v9 = vpack.c.bf16 %v1533_v52, %v1529_v53 }
 0xa9a   :  { %5678 = vmatprep.subr.bf16.mxu0 %v8431_v0  ;;  %v8458_v51 = vpack.c.bf16 %v1534_v45, %v1530_v33  ;;  %v1542_v12 = vld [vmem:[#allocation20 + $0x1b8] sm:$0xff]  ;;  %v8467_v33 = vpack.c.bf16 %v1541_v46, %v1537_v47 }
 0xa9b   :  { %9861 = vst [vmem:[#allocation81_spill] sm:$0xff] %v8452_v2  ;;  %9864 = vst [vmem:[#allocation84_spill] sm:$0xff] %v8461_v9  ;;  %v8464_v16 = vpack.c.bf16 %v1542_v12, %v1538_v11  ;;  %v1546_v58 = vld [vmem:[#allocation20 + $0x1d8] sm:$0xff]  ;;  %v8473_v11 = vpack.c.bf16 %v1549_v40, %v1545_v41 }
 0xa9c   :  { %9863 = vst [vmem:[#allocation83_spill] sm:$0xff] %v8458_v51  ;;  %v1550_v59 = vld [vmem:[#allocation20 + $0x1f8] sm:$0xff]  ;;  %9866 = vst [vmem:[#allocation86_spill] sm:$0xff] %v8467_v33 }
 0xa9d   :  { %5680 = vmatpush1.bf16.msra.mxu0 %v8436_v28  ;;  %9865 = vst [vmem:[#allocation85_spill] sm:$0xff] %v8464_v16  ;;  %v8470_v45 = vpack.c.bf16 %v1550_v59, %v1546_v58  ;;  %v1362_v52 = vld [vmem:[#allocation19 + $0x18] sm:$0xff]  ;;  %9868 = vst [vmem:[#allocation88_spill] sm:$0xff] %v8473_v11  ;;  %v8479_v58 = vpack.c.bf16 %v1365_v34, %v1361_v35  ;;  %v1377_v35 = vld [vmem:[#allocation19 + $0x90] sm:$0xff] }
 0xa9e   :  { %5682 = vmatprep.subr.bf16.mxu0 %v8440_v36  ;;  %v1366_v53 = vld [vmem:[#allocation19 + $0x38] sm:$0xff] }
 0xa9f   :  { %9867 = vst [vmem:[#allocation87_spill] sm:$0xff] %v8470_v45  ;;  %v8476_v12 = vpack.c.bf16 %v1366_v53, %v1362_v52  ;;  %v1370_v46 = vld [vmem:[#allocation19 + $0x58] sm:$0xff]  ;;  %v8486_v52 = vpack.c.bf16 %v1373_v4, %v1369_v27  ;;  %v1381_v53 = vld [vmem:[#allocation19 + $0xb0] sm:$0xff] }
 0xaa0   :  { %v1374_v47 = vld [vmem:[#allocation19 + $0x78] sm:$0xff]  ;;  %v8493_v18 = vpack.c.bf16 %v1381_v53, %v1377_v35  ;;  %v1385_v4 = vld [vmem:[#allocation19 + $0xd0] sm:$0xff] }
 0xaa1   :  { %5684 = vmatpush1.bf16.msra.mxu0 %v8443_v54  ;;  %9869 = vst [vmem:[#allocation89_spill] sm:$0xff] %v8476_v12  ;;  %v8482_v59 = vpack.c.bf16 %v1374_v47, %v1370_v46  ;;  %v1378_v40 = vld [vmem:[#allocation19 + $0x98] sm:$0xff]  ;;  %v1389_v27 = vld [vmem:[#allocation19 + $0xf0] sm:$0xff] }
 0xaa2   :  { %5686 = vmatprep.subr.bf16.mxu0 %v8446_v5  ;;  %v1382_v41 = vld [vmem:[#allocation19 + $0xb8] sm:$0xff] }
 0xaa3   :  { %v8490_v34 = vpack.c.bf16 %v1382_v41, %v1378_v40  ;;  %v1386_v46 = vld [vmem:[#allocation19 + $0xd8] sm:$0xff]  ;;  %v8499_v40 = vpack.c.bf16 %v1389_v27, %v1385_v4  ;;  %v8502_v41 = vpack.c.bf16 %v1398_v63, %v1394_v20  ;;  %v8511_v63 = vpack.c.bf16 %v1405_v25, %v1401_v42 }
 0xaa4   :  { %v1390_v47 = vld [vmem:[#allocation19 + $0xf8] sm:$0xff] }
 0xaa5   :  { %5688 = vmatpush1.bf16.msra.mxu0 %v8449_v1  ;;  %v8496_v21 = vpack.c.bf16 %v1390_v47, %v1386_v46  ;;  %9870 = vst [vmem:[#allocation90_spill] sm:$0xff] %v8502_v41  ;;  %v1402_v35 = vld [vmem:[#allocation19 + $0x158] sm:$0xff]  ;;  %v8505_v46 = vpack.c.bf16 %v1397_v43, %v1393_v61  ;;  %9873 = vst [vmem:[#allocation93_spill] sm:$0xff] %v8511_v63 }
 0xaa6   :  { %5690 = vmatprep.subr.bf16.mxu0 %v8452_v2  ;;  %v1406_v53 = vld [vmem:[#allocation19 + $0x178] sm:$0xff] }
 0xaa7   :  { %9871 = vst [vmem:[#allocation91_spill] sm:$0xff] %v8505_v46  ;;  %v8508_v47 = vpack.c.bf16 %v1406_v53, %v1402_v35  ;;  %v1410_v4 = vld [vmem:[#allocation19 + $0x198] sm:$0xff]  ;;  %v8517_v35 = vpack.c.bf16 %v1413_v14, %v1409_v3 }
 0xaa8   :  { %v1414_v27 = vld [vmem:[#allocation19 + $0x1b8] sm:$0xff] }
 0xaa9   :  { %5692 = vmatpush1.bf16.msra.mxu0 %v8455_v50  ;;  %9872 = vst [vmem:[#allocation92_spill] sm:$0xff] %v8508_v47  ;;  %v8514_v20 = vpack.c.bf16 %v1414_v27, %v1410_v4  ;;  %v1418_v43 = vld [vmem:[#allocation19 + $0x1d8] sm:$0xff]  ;;  %9875 = vst [vmem:[#allocation95_spill] sm:$0xff] %v8517_v35  ;;  %v8523_v4 = vpack.c.bf16 %v1421_v60, %v1417_v10 }
 0xaaa   :  { %5694 = vmatprep.subr.bf16.mxu0 %v8458_v51  ;;  %v1422_v61 = vld [vmem:[#allocation19 + $0x1f8] sm:$0xff] }
 0xaab   :  { %9874 = vst [vmem:[#allocation94_spill] sm:$0xff] %v8514_v20  ;;  %v8520_v53 = vpack.c.bf16 %v1422_v61, %v1418_v43  ;;  %v1426_v25 = vld [vmem:[#allocation19 + $0x218] sm:$0xff]  ;;  %9877 = vst [vmem:[#allocation97_spill] sm:$0xff] %v8523_v4  ;;  %v8529_v43 = vpack.c.bf16 %v1429_v44, %v1425_v55 }
 0xaac   :  { %v1430_v42 = vld [vmem:[#allocation19 + $0x238] sm:$0xff] }
 0xaad   :  { %5696 = vmatpush1.bf16.msra.mxu0 %v8461_v9  ;;  %9876 = vst [vmem:[#allocation96_spill] sm:$0xff] %v8520_v53  ;;  %v8526_v27 = vpack.c.bf16 %v1430_v42, %v1426_v25  ;;  %v1434_v14 = vld [vmem:[#allocation19 + $0x258] sm:$0xff]  ;;  %9879 = vst [vmem:[#allocation99_spill] sm:$0xff] %v8529_v43  ;;  %v8535_v25 = vpack.c.bf16 %v1437_v29, %v1433_v37 }
 0xaae   :  { %5698 = vmatprep.subr.bf16.mxu0 %v8464_v16  ;;  %v1438_v3 = vld [vmem:[#allocation19 + $0x278] sm:$0xff] }
 0xaaf   :  { %9878 = vst [vmem:[#allocation98_spill] sm:$0xff] %v8526_v27  ;;  %v8532_v61 = vpack.c.bf16 %v1438_v3, %v1434_v14  ;;  %v1442_v60 = vld [vmem:[#allocation19 + $0x298] sm:$0xff]  ;;  %9881 = vst [vmem:[#allocation101_spill] sm:$0xff] %v8535_v25 }
 0xab0   :  { %v1446_v10 = vld [vmem:[#allocation19 + $0x2b8] sm:$0xff] }
 0xab1   :  { %5700 = vmatpush1.bf16.msra.mxu0 %v8467_v33  ;;  %9880 = vst [vmem:[#allocation100_spill] sm:$0xff] %v8532_v61  ;;  %v8538_v42 = vpack.c.bf16 %v1446_v10, %v1442_v60  ;;  %v1450_v44 = vld [vmem:[#allocation19 + $0x2d8] sm:$0xff] }
 0xab2   :  { %5702 = vmatprep.subr.bf16.mxu0 %v8470_v45  ;;  %v1454_v55 = vld [vmem:[#allocation19 + $0x2f8] sm:$0xff] }
 0xab3   :  { %9882 = vst [vmem:[#allocation102_spill] sm:$0xff] %v8538_v42  ;;  %v8544_v3 = vpack.c.bf16 %v1454_v55, %v1450_v44  ;;  %v1458_v29 = vld [vmem:[#allocation19 + $0x318] sm:$0xff] }
 0xab4   :  { %v1462_v37 = vld [vmem:[#allocation19 + $0x338] sm:$0xff] }
 0xab5   :  { %5704 = vmatpush1.bf16.msra.mxu0 %v8473_v11  ;;  %9884 = vst [vmem:[#allocation104_spill] sm:$0xff] %v8544_v3  ;;  %v8550_v10 = vpack.c.bf16 %v1462_v37, %v1458_v29 }
 0xab6   :  { %5770 = vmatprep.subr.bf16.mxu0 %v8476_v12 }
 0xab7   :  { %9886 = vst [vmem:[#allocation106_spill] sm:$0xff] %v8550_v10 }
 0xab8   :  { %1688 = vmatmul.mubr.f32.vlgmr.msra.gmra.mrb[14].mxu0 %v9856_v26 }
 0xab9   :  { %5772 = vmatpush1.bf16.msra.mxu0 %v8479_v58  ;;  %1829 = vmatprep.mubr.f32.mxu0 %v9856_v26 }
 0xaba   :  { %5774 = vmatprep.subr.bf16.mxu0 %v8482_v59 }
 0xabd   :  { %5776 = vmatpush1.bf16.msra.mxu0 %v8486_v52 }
 0xabe   :  { %5778 = vmatprep.subr.bf16.mxu0 %v8490_v34 }
 0xac1   :  { %5780 = vmatpush1.bf16.msra.mxu0 %v8493_v18 }
 0xac2   :  { %5782 = vmatprep.subr.bf16.mxu0 %v8496_v21 }
 0xac5   :  { %5784 = vmatpush1.bf16.msra.mxu0 %v8499_v40 }
 0xac6   :  { %5786 = vmatprep.subr.bf16.mxu0 %v8502_v41 }
 0xac9   :  { %5788 = vmatpush1.bf16.msra.mxu0 %v8505_v46 }
 0xaca   :  { %5790 = vmatprep.subr.bf16.mxu0 %v8508_v47 }
 0xacd   :  { %5792 = vmatpush1.bf16.msra.mxu0 %v8511_v63 }
 0xace   :  { %5794 = vmatprep.subr.bf16.mxu0 %v8514_v20 }
 0xad1   :  { %5796 = vmatpush1.bf16.msra.mxu0 %v8517_v35 }
 0xad2   :  { %5798 = vmatprep.subr.bf16.mxu0 %v8520_v53 }
 0xad5   :  { %5800 = vmatpush1.bf16.msra.mxu0 %v8523_v4  ;;  %v1445_v4 = vld [vmem:[#allocation19 + $0x2b0] sm:$0xff] }
 0xad6   :  { %5802 = vmatprep.subr.bf16.mxu0 %v8526_v27  ;;  %v8541_v14 = vpack.c.bf16 %v1445_v4, %v1441_v22  ;;  %v1449_v27 = vld [vmem:[#allocation19 + $0x2d0] sm:$0xff]  ;;  %v1466_v22 = vld [vmem:[#allocation19 + $0x358] sm:$0xff] }
 0xad7   :  { %v1470_v4 = vld [vmem:[#allocation19 + $0x378] sm:$0xff] }
 0xad8   :  { %9883 = vst [vmem:[#allocation103_spill] sm:$0xff] %v8541_v14  ;;  %v8556_v55 = vpack.c.bf16 %v1470_v4, %v1466_v22 }
 0xad9   :  { %5804 = vmatpush1.bf16.msra.mxu0 %v8529_v43  ;;  %v1453_v43 = vld [vmem:[#allocation19 + $0x2f0] sm:$0xff] }
 0xada   :  { %5806 = vmatprep.subr.bf16.mxu0 %v8532_v61  ;;  %v8547_v60 = vpack.c.bf16 %v1453_v43, %v1449_v27  ;;  %v1457_v61 = vld [vmem:[#allocation19 + $0x310] sm:$0xff]  ;;  %9888 = vst [vmem:[#allocation108_spill] sm:$0xff] %v8556_v55  ;;  %v1474_v27 = vld [vmem:[#allocation19 + $0x398] sm:$0xff] }
 0xadb   :  { %v1478_v43 = vld [vmem:[#allocation19 + $0x3b8] sm:$0xff] }
 0xadc   :  { %9885 = vst [vmem:[#allocation105_spill] sm:$0xff] %v8547_v60  ;;  %v8562_v37 = vpack.c.bf16 %v1478_v43, %v1474_v27 }
 0xadd   :  { %5808 = vmatpush1.bf16.msra.mxu0 %v8535_v25  ;;  %v1461_v25 = vld [vmem:[#allocation19 + $0x330] sm:$0xff] }
 0xade   :  { %5810 = vmatprep.subr.bf16.mxu0 %v8538_v42  ;;  %v8553_v44 = vpack.c.bf16 %v1461_v25, %v1457_v61  ;;  %v1465_v42 = vld [vmem:[#allocation19 + $0x350] sm:$0xff]  ;;  %9890 = vst [vmem:[#allocation110_spill] sm:$0xff] %v8562_v37  ;;  %v1482_v61 = vld [vmem:[#allocation19 + $0x3d8] sm:$0xff] }
 0xadf   :  { %v1486_v25 = vld [vmem:[#allocation19 + $0x3f8] sm:$0xff] }
 0xae0   :  { %9887 = vst [vmem:[#allocation107_spill] sm:$0xff] %v8553_v44  ;;  %v8568_v4 = vpack.c.bf16 %v1486_v25, %v1482_v61 }
 0xae1   :  { %5812 = vmatpush1.bf16.msra.mxu0 %v8541_v14  ;;  %v1469_v14 = vld [vmem:[#allocation19 + $0x370] sm:$0xff] }
 0xae2   :  { %5814 = vmatprep.subr.bf16.mxu0 %v8544_v3  ;;  %v8559_v29 = vpack.c.bf16 %v1469_v14, %v1465_v42  ;;  %v1473_v3 = vld [vmem:[#allocation19 + $0x390] sm:$0xff]  ;;  %9892 = vst [vmem:[#allocation112_spill] sm:$0xff] %v8568_v4 }
 0xae4   :  { %9889 = vst [vmem:[#allocation109_spill] sm:$0xff] %v8559_v29 }
 0xae5   :  { %5816 = vmatpush1.bf16.msra.mxu0 %v8547_v60  ;;  %v1477_v60 = vld [vmem:[#allocation19 + $0x3b0] sm:$0xff] }
 0xae6   :  { %5818 = vmatprep.subr.bf16.mxu0 %v8550_v10  ;;  %v8565_v22 = vpack.c.bf16 %v1477_v60, %v1473_v3  ;;  %v1481_v10 = vld [vmem:[#allocation19 + $0x3d0] sm:$0xff]  ;;  %v5367_v60 = vld [vmem:[%s9614_s13] ss:$0 sm:$0xff]  ;;  %s7846_s13 = smov 64  }
 0xae8   :  { %9891 = vst [vmem:[#allocation111_spill] sm:$0xff] %v8565_v22 }
 0xae9   :  { %5820 = vmatpush1.bf16.msra.mxu0 %v8553_v44  ;;  %v1485_v44 = vld [vmem:[#allocation19 + $0x3f0] sm:$0xff] }
 0xaea   :  { %5822 = vmatprep.subr.bf16.mxu0 %v8556_v55  ;;  %v8571_v42 = vpack.c.bf16 %v1485_v44, %v1481_v10 }
 0xaec   :  { %9893 = vst [vmem:[#allocation113_spill] sm:$0xff] %v8571_v42 }
 0xaed   :  { %5824 = vmatpush1.bf16.msra.mxu0 %v8559_v29 }
 0xaee   :  { %5826 = vmatprep.subr.bf16.mxu0 %v8562_v37 }
 0xaf1   :  { %5828 = vmatpush1.bf16.msra.mxu0 %v8565_v22  ;;  %v1760_v14 = vpop.f32.mrb[10].mxu1 }
 0xaf2   :  { %5830 = vmatprep.subr.bf16.mxu0 %v8568_v4  ;;  %v1762_v3 = vpop.f32.mrb[11].mxu1 }
 0xaf5   :  { %5832 = vmatpush1.bf16.msra.mxu0 %v8571_v42 }
 0xaf6   :  { %5866 = vmatprep.subr.bf16.mxu0 %v8361_v32 }
 0xaf8   :  { %1830 = vmatmul.mubr.f32.vlgmr.msra.gmra.mrb[14].mxu0 %v9856_v26 }
 0xaf9   :  { %5868 = vmatpush1.bf16.msra.mxu0 %v8429_v15  ;;  %2155 = vmatprep.mubr.f32.mxu0 %v9856_v26 }
 0xafa   :  { %5870 = vmatprep.subr.bf16.mxu0 %v8431_v0 }
 0xafd   :  { %5872 = vmatpush1.bf16.msra.mxu0 %v8436_v28 }
 0xafe   :  { %5874 = vmatprep.subr.bf16.mxu0 %v8440_v36 }
 0xb01   :  { %5876 = vmatpush1.bf16.msra.mxu0 %v8443_v54 }
 0xb02   :  { %5878 = vmatprep.subr.bf16.mxu0 %v8446_v5 }
 0xb05   :  { %5880 = vmatpush1.bf16.msra.mxu0 %v8449_v1 }
 0xb06   :  { %5882 = vmatprep.subr.bf16.mxu0 %v8452_v2 }
 0xb09   :  { %5884 = vmatpush1.bf16.msra.mxu0 %v8455_v50 }
 0xb0a   :  { %5886 = vmatprep.subr.bf16.mxu0 %v8458_v51 }
 0xb0d   :  { %5888 = vmatpush1.bf16.msra.mxu0 %v8461_v9 }
 0xb0e   :  { %5890 = vmatprep.subr.bf16.mxu0 %v8464_v16 }
 0xb11   :  { %5892 = vmatpush1.bf16.msra.mxu0 %v8467_v33 }
 0xb12   :  { %5894 = vmatprep.subr.bf16.mxu0 %v8470_v45 }
 0xb15   :  { %5896 = vmatpush1.bf16.msra.mxu0 %v8473_v11 }
 0xb16   :  { %5962 = vmatprep.subr.bf16.mxu0 %v8476_v12 }
 0xb6b   :  { %v5561_v10 = vpop.f32.mrb[12].mxu0 }
 0xb6c   :  { %v1321_v44 = vadd.f32 %v5561_v10, %v5367_v60  ;;  %v1315_v27 = vpop.f32.mrb[13].mxu0 }
 0xb6d   :  { %v1316_v43 = vadd.f32 %v5367_v60, %v1315_v27  ;;  %v9741_v60 = vlaneseq }
 0xb6e   :  { %v1326_v61 = vsel %vm1324_vm4, %v1321_v44, 0.0 }
 0xb6f   :  { %v1325_v25 = vsel %vm1324_vm4, %v1316_v43, 0.0  ;;  %v8602_v27 = vshrl.u32 %v9741_v60, 7 }
 0xb70   :  { %v1327_v33 = vadd.f32 %v1326_v61, %v1325_v25 }
 0xb71   :  { %v1851_v61 = vsub.s32 3, %v8602_v27 }
 0xb72   :  { %v1328_v16 = vmul.f32 0.5, %v1327_v33  ;;  %v1551_v33 = vld [vmem:[%s9617_s16] sm:$0xf] }
 0xb73   :  { %v8625_v36 = vrot.slane %v1551_v33, %v1851_v61 }
 0xb74   :  { %v1329_v45 = vsub.f32 %v1316_v43, %v1328_v16  ;;  %v1330_v9 = vsub.f32 %v1321_v44, %v1328_v16  ;;  %v8605_v16 = vsub.s32 1, %v8602_v27  ;;  %v1847_v44 = vsub.s32 2, %v8602_v27 }
 0xb76   :  { %v1331_v11 = vmul.f32 %v1329_v45, %v1329_v45  ;;  %v1332_v51 = vmul.f32 %v1330_v9, %v1330_v9  ;;  %9894 = vst [vmem:[#allocation114_spill] sm:$0xff] %v8605_v16  ;;  %v8623_v60 = vrot.slane %v1551_v33, %v1847_v44 }
 0xb78   :  { %v1333_v12 = vsel %vm1324_vm4, %v1331_v11, 0.0  ;;  %v1334_v50 = vsel %vm1324_vm4, %v1332_v51, 0.0 }
 0xb79   :  { %v1335_v2 = vadd.f32 %v1334_v50, %v1333_v12  ;;  %v8611_v50 = vsub.s32 0, %v8602_v27 }
 0xb7b   :  { %7300 = vrsqrt.f32 %v1335_v2  ;;  %v8614_v2 = vrot.slane %v1551_v33, %v8605_v16 }
 0xb7d   :  { %9895 = vst [vmem:[#allocation115_spill] sm:$0xff] %v8614_v2 }
 0xb85   :  { %v7301_v1 = vpop.eup %7300 }
 0xb86   :  { %v1337_v10 = vmul.f32 %v7301_v1, %v1329_v45  ;;  %v1338_v5 = vmul.f32 %v7301_v1, %v1330_v9  ;;  %v8617_v1 = vrot.slane %v1551_v33, %v8611_v50 }
 0xb88   :  { %1349 = vrot.lane.b32.xlu1 %v1337_v10, %s7846_s13  ;;  %v1857_v51 = vadd.f32 %v8617_v1, %v1760_v14 }
 0xb8a   :  { %v1861_v45 = vsub.f32 0.0, %v1857_v51 }
 0xb8c   :  { %1351 = vrot.lane.b32.xlu1 %v1338_v5, %s7846_s13  ;;  %v1858_v5 = vadd.f32 %v8614_v2, %v1762_v3  ;;  %v1862_v12 = vmul.f32 1.442695, %v1861_v45 }
 0xb8e   :  { %v1866_v9 = vsub.f32 0.0, %v1858_v5 }
 0xb90   :  { %v1867_v11 = vmul.f32 1.442695, %v1866_v9 }
 0xb92   :  { %7302 = vpow2.f32 %v1867_v11 }
 0xb93   :  { %7304 = vpow2.f32 %v1862_v12 }
 0xb9c   :  { %v7303_v43 = vpop.eup %7302 }
 0xb9d   :  { %v7305_v25 = vpop.eup %7304  ;;  %v1869_v10 = vadd.f32 1.0, %v7303_v43 }
 0xb9e   :  { %v1864_v54 = vadd.f32 1.0, %v7305_v25 }
 0xb9f   :  { %7306 = vrcp.f32 %v1869_v10  ;;  %v7847_v10 = vmov 1966171168  }
 0xba0   :  { %7308 = vrcp.f32 %v1864_v54  ;;  %v1884_v54 = vunpack.c.l.s4 %v7847_v10 }
 0xba9   :  { %v7307_v11 = vpop.eup %7306 }
 0xbaa   :  { %v7309_v12 = vpop.eup %7308  ;;  %v1877_v44 = vmul.f32 0.0, %v7307_v11 }
 0xbcb   :  { %v1831_v3 = vpop.f32.mrb[14].mxu0 }
 0xbcc   :  { %v1859_v14 = vadd.f32 %v8623_v60, %v1831_v3  ;;  %v1833_v5 = vpop.f32.mrb[15].mxu0 }
 0xbcd   :  { %v1860_v51 = vadd.f32 %v8625_v36, %v1833_v5 }
 0xbce   :  { %7310 = vtanh.f32 %v1859_v14  ;;  %v1885_v14 = vunpack.c.0.s8 %v1884_v54 }
 0xbcf   :  { %v1872_v9 = vsub.f32 0.0, %v1860_v51 }
 0xbd1   :  { %v1873_v45 = vmul.f32 1.442695, %v1872_v9  ;;  %v8637_v9 = vsub.s32 %v1885_v14, %v8602_v27 }
 0xbd3   :  { %7312 = vpow2.f32 %v1873_v45  ;;  %v1344_v45 = vpop.permute.xlu1 %1343 }
 0xbd8   :  { %v7311_v43 = vpop.eup %7310 }
 0xbd9   :  { %v1878_v2 = vmul.f32 %v7311_v43, %v7309_v12  ;;  %v1342_v43 = vpop.permute.xlu0 %1341 }
 0xbdb   :  { %v8629_v25 = vadd.f32 %v1878_v2, %v1877_v44  ;;  %v1355_v44 = vsel %vm508_vm3, %v8206_v6, %v1342_v43  ;;  %v1356_v6 = vsel %vm508_vm3, %v8209_v7, %v1344_v45  ;;  %v9896_v7 = vld [vmem:[#allocation97_spill] sm:$0xff]  ;;  %v9897_v45 = vld [vmem:[#allocation59_spill] sm:$0xff]  ;;  %v9899_v43 = vld [vmem:[#allocation60_spill] sm:$0xff] }
 0xbdd   :  { %v7313_v33 = vpop.eup %7312  ;;  %7314 = vtanh.f32 %v8629_v25 }
 0xbde   :  { %v1875_v61 = vadd.f32 1.0, %v7313_v33 }
 0xbe0   :  { %7316 = vrcp.f32 %v1875_v61 }
 0xbe7   :  { %v7315_v3 = vpop.eup %7314 }
 0xbea   :  { %v7317_v5 = vpop.eup %7316 }
 0xbeb   :  { %v8632_v51 = vmul.f32 %v7317_v5, %v7315_v3 }
 0xbed   :  { %2085 = vmatmul.mubr.f32.vlgmr.msra.gmra.mrb[12].mxu1 %v8632_v51  ;;  %2156 = vmatmul.mubr.f32.vlgmr.msra.gmra.mrb[16].mxu0 %v8632_v51  ;;  %v1889_v2 = vrot.slane %v8632_v51, %v8637_v9 }
 0xbee   :  { %5900 = vmatpush1.bf16.msra.mxu1 %v8308_v17  ;;  %5964 = vmatpush1.bf16.msra.mxu0 %v8479_v58 }
 0xbef   :  { %5902 = vmatprep.subr.bf16.mxu1 %v8311_v19  ;;  %5966 = vmatprep.subr.bf16.mxu0 %v8482_v59  ;;  %v1897_v11 = vrot.slane %v1889_v2, %v8637_v9  ;;  %v1890_v12 = vcombine.high %v1889_v2, %v1889_v2 }
 0xbf1   :  { %v1908_v61 = vrot.slane %v1897_v11, %v8611_v50  ;;  %v1904_v10 = vrot.slane %v1890_v12, %v8637_v9  ;;  %v9898_v12 = vld [vmem:[#allocation98_spill] sm:$0xff] }
 0xbf2   :  { %5904 = vmatpush1.bf16.msra.mxu1 %v8315_v23  ;;  %5968 = vmatpush1.bf16.msra.mxu0 %v8486_v52 }
 0xbf3   :  { %5906 = vmatprep.subr.bf16.mxu1 %v8319_v24  ;;  %5970 = vmatprep.subr.bf16.mxu0 %v8490_v34  ;;  %v1912_v14 = vrot.slane %v1904_v10, %v8611_v50  ;;  %v9903_v10 = vld [vmem:[#allocation63_spill] sm:$0xff] }
 0xbf6   :  { %5908 = vmatpush1.bf16.msra.mxu1 %v8322_v30  ;;  %5972 = vmatpush1.bf16.msra.mxu0 %v8493_v18 }
 0xbf7   :  { %5910 = vmatprep.subr.bf16.mxu1 %v8325_v31  ;;  %5974 = vmatprep.subr.bf16.mxu0 %v8496_v21 }
 0xbfa   :  { %v1350_v33 = vpop.permute.xlu1 %1349  ;;  %5912 = vmatpush1.bf16.msra.mxu1 %v8328_v38  ;;  %5976 = vmatpush1.bf16.msra.mxu0 %v8499_v40 }
 0xbfb   :  { %v8661_v54 = vsel %vm1324_vm4, %v1355_v44, %v1350_v33  ;;  %5914 = vmatprep.subr.bf16.mxu1 %v8331_v39  ;;  %5978 = vmatprep.subr.bf16.mxu0 %v8502_v41  ;;  %v9900_v44 = vld [vmem:[#allocation99_spill] sm:$0xff]  ;;  %v9901_v33 = vld [vmem:[#allocation62_spill] sm:$0xff] }
 0xbfc   :  { %v1915_v3 = vmul.f32 %v1908_v61, %v8661_v54  ;;  %v9902_v61 = vld [vmem:[#allocation100_spill] sm:$0xff] }
 0xbfe   :  { %1917 = vadd.xlane.f32.xlu0 %v1915_v3  ;;  %v1352_v5 = vpop.permute.xlu1 %1351  ;;  %5916 = vmatpush1.bf16.msra.mxu1 %v8334_v48  ;;  %v9904_v3 = vld [vmem:[#allocation101_spill] sm:$0xff] }
 0xbff   :  { %v8671_v2 = vsel %vm1324_vm4, %v1356_v6, %v1352_v5  ;;  %5980 = vmatpush1.bf16.msra.mxu0 %v8505_v46  ;;  %5918 = vmatprep.subr.bf16.mxu1 %v8337_v49  ;;  %v9905_v6 = vld [vmem:[#allocation64_spill] sm:$0xff]  ;;  %v9906_v5 = vld [vmem:[#allocation102_spill] sm:$0xff] }
 0xc00   :  { %v1916_v11 = vmul.f32 %v1912_v14, %v8671_v2  ;;  %5982 = vmatprep.subr.bf16.mxu0 %v8508_v47  ;;  %v9907_v14 = vld [vmem:[#allocation65_spill] sm:$0xff] }
 0xc02   :  { %1919 = vadd.xlane.f32.xlu1 %v1916_v11  ;;  %5920 = vmatpush1.bf16.msra.mxu1 %v8340_v56  ;;  %v9908_v11 = vld [vmem:[#allocation103_spill] sm:$0xff] }
 0xc03   :  { %5984 = vmatpush1.bf16.msra.mxu0 %v8511_v63  ;;  %5922 = vmatprep.subr.bf16.mxu1 %v8343_v57 }
 0xc04   :  { %5986 = vmatprep.subr.bf16.mxu0 %v8514_v20 }
 0xc06   :  { %5924 = vmatpush1.bf16.msra.mxu1 %v8346_v62 }
 0xc07   :  { %5988 = vmatpush1.bf16.msra.mxu0 %v8517_v35  ;;  %5926 = vmatprep.subr.bf16.mxu1 %v8350_v8 }
 0xc08   :  { %5990 = vmatprep.subr.bf16.mxu0 %v8520_v53 }
 0xc0a   :  { %5928 = vmatpush1.bf16.msra.mxu1 %v8352_v13 }
 0xc0b   :  { %5992 = vmatpush1.bf16.msra.mxu0 %v9896_v7  ;;  %5930 = vmatprep.subr.bf16.mxu1 %v9897_v45 }
 0xc0c   :  { %5994 = vmatprep.subr.bf16.mxu0 %v9898_v12  ;;  %v9909_v12 = vld [vmem:[#allocation66_spill] sm:$0xff] }
 0xc0e   :  { %5932 = vmatpush1.bf16.msra.mxu1 %v9899_v43  ;;  %v9910_v43 = vld [vmem:[#allocation104_spill] sm:$0xff] }
 0xc0f   :  { %5996 = vmatpush1.bf16.msra.mxu0 %v9900_v44  ;;  %5934 = vmatprep.subr.bf16.mxu1 %v9901_v33  ;;  %v9911_v44 = vld [vmem:[#allocation67_spill] sm:$0xff]  ;;  %v9912_v33 = vld [vmem:[#allocation105_spill] sm:$0xff] }
 0xc10   :  { %5998 = vmatprep.subr.bf16.mxu0 %v9902_v61  ;;  %v9913_v61 = vld [vmem:[#allocation68_spill] sm:$0xff] }
 0xc12   :  { %5936 = vmatpush1.bf16.msra.mxu1 %v9903_v10  ;;  %v9914_v10 = vld [vmem:[#allocation106_spill] sm:$0xff] }
 0xc13   :  { %6000 = vmatpush1.bf16.msra.mxu0 %v9904_v3  ;;  %5938 = vmatprep.subr.bf16.mxu1 %v9905_v6  ;;  %v9915_v3 = vld [vmem:[#allocation69_spill] sm:$0xff]  ;;  %v9916_v6 = vld [vmem:[#allocation107_spill] sm:$0xff] }
 0xc14   :  { %6002 = vmatprep.subr.bf16.mxu0 %v9906_v5  ;;  %v9917_v5 = vld [vmem:[#allocation70_spill] sm:$0xff] }
 0xc16   :  { %5940 = vmatpush1.bf16.msra.mxu1 %v9907_v14 }
 0xc17   :  { %6004 = vmatpush1.bf16.msra.mxu0 %v9908_v11  ;;  %5942 = vmatprep.subr.bf16.mxu1 %v9909_v12  ;;  %v9918_v11 = vld [vmem:[#allocation71_spill] sm:$0xff] }
 0xc18   :  { %6006 = vmatprep.subr.bf16.mxu0 %v9910_v43  ;;  %v9919_v43 = vld [vmem:[#allocation72_spill] sm:$0xff] }
 0xc1a   :  { %5944 = vmatpush1.bf16.msra.mxu1 %v9911_v44 }
 0xc1b   :  { %6008 = vmatpush1.bf16.msra.mxu0 %v9912_v33  ;;  %5946 = vmatprep.subr.bf16.mxu1 %v9913_v61  ;;  %v9920_v33 = vld [vmem:[#allocation73_spill] sm:$0xff] }
 0xc1c   :  { %6010 = vmatprep.subr.bf16.mxu0 %v9914_v10  ;;  %v9921_v10 = vld [vmem:[#allocation74_spill] sm:$0xff] }
 0xc1e   :  { %5948 = vmatpush1.bf16.msra.mxu1 %v9915_v3 }
 0xc1f   :  { %6012 = vmatpush1.bf16.msra.mxu0 %v9916_v6  ;;  %5950 = vmatprep.subr.bf16.mxu1 %v9917_v5  ;;  %v9922_v6 = vld [vmem:[#allocation75_spill] sm:$0xff] }
 0xc20   :  { %6014 = vmatprep.subr.bf16.mxu0 %v8556_v55  ;;  %v9923_v55 = vld [vmem:[#allocation35_spill] sm:$0xff] }
 0xc22   :  { %5952 = vmatpush1.bf16.msra.mxu1 %v9918_v11 }
 0xc23   :  { %6016 = vmatpush1.bf16.msra.mxu0 %v8559_v29  ;;  %5954 = vmatprep.subr.bf16.mxu1 %v9919_v43  ;;  %v9924_v29 = vlaneseq }
 0xc24   :  { %6018 = vmatprep.subr.bf16.mxu0 %v8562_v37 }
 0xc25   :  { %v1924_v43 = vand.u32 127, %v9924_v29 }
 0xc26   :  { %5956 = vmatpush1.bf16.msra.mxu1 %v9920_v33 }
 0xc27   :  { %6020 = vmatpush1.bf16.msra.mxu0 %v8565_v22  ;;  %5958 = vmatprep.subr.bf16.mxu1 %v9921_v10  ;;  %v8723_v37 = vsub.s32 %v1924_v43, %v8602_v27 }
 0xc28   :  { %6022 = vmatprep.subr.bf16.mxu0 %v8568_v4 }
 0xc29   :  { %9925 = vst [vmem:[#allocation116_spill] sm:$0xff] %v8723_v37 }
 0xc2a   :  { %5960 = vmatpush1.bf16.msra.mxu1 %v9922_v6 }
 0xc2b   :  { %6024 = vmatpush1.bf16.msra.mxu0 %v8571_v42  ;;  %6026 = vmatprep.subr.bf16.mxu1 %v9923_v55  ;;  %v7848_v55 = vmov 0  }
 0xc2c   :  { %6058 = vmatprep.subr.bf16.mxu0 %v8361_v32  ;;  %7291 = vset.pattern.permute.xlu1 %v7848_v55 }
 0xc2d   :  { %7290 = vset.pattern.permute.xlu0 %v7848_v55 }
 0xc8b   :  { %v1918_v33 = vpop.xlane.xlu0 %1917 }
 0xc8c   :  { %v1928_v10 = vrot.slane %v1918_v33, %v8723_v37 }
 0xc8f   :  { %v1920_v11 = vpop.xlane.xlu1 %1919 }
 0xc90   :  { %v1932_v4 = vrot.slane %v1920_v11, %v8723_v37 }
 0xc92   :  { %v1934_v6 = vsel %vm1933_vm5, %v1932_v4, %v1928_v10 }
 0xc93   :  { %v1937_v42 = vsel %vm1936_vm6, %v1934_v6, -inf }
 0xc94   :  { %1938 = vmax.xlane.f32.xlu0 %v1937_v42 }
 0xd21   :  { %v1939_v29 = vpop.xlane.xlu0 %1938 }
 0xd22   :  { %v1944_v27 = vrot.slane %v1939_v29, %v8611_v50  ;;  %v1948_v43 = vrot.slane %v1939_v29, %v8605_v16 }
 0xd24   :  { %v1951_v32 = vsub.f32 %v1918_v33, %v1944_v27  ;;  %v1952_v22 = vsub.f32 %v1920_v11, %v1948_v43 }
 0xd26   :  { %v1953_v5 = vmul.f32 1.442695, %v1951_v32  ;;  %v1955_v3 = vmul.f32 1.442695, %v1952_v22 }
 0xd28   :  { %7318 = vpow2.f32 %v1953_v5 }
 0xd29   :  { %7320 = vpow2.f32 %v1955_v3 }
 0xd32   :  { %v7319_v61 = vpop.eup %7318 }
 0xd33   :  { %v7321_v44 = vpop.eup %7320  ;;  %1960 = vperm.xlu0 %7290, %v7319_v61  }
 0xd34   :  { %1963 = vperm.xlu1 %7291, %v7321_v44  }
 0xdb2   :  { %v1961_v4 = vpop.permute.xlu0 %1960 }
 0xdb3   :  { %v1964_v42 = vpop.permute.xlu1 %1963  ;;  %v1968_v10 = vrot.slane %v1961_v4, %v8723_v37 }
 0xdb4   :  { %v1972_v55 = vrot.slane %v1964_v42, %v8723_v37 }
 0xdb6   :  { %v1973_v6 = vsel %vm1933_vm5, %v1972_v55, %v1968_v10 }
 0xdb7   :  { %v1975_v29 = vsel %vm1936_vm6, %v1973_v6, 0.0 }
 0xdb8   :  { %1976 = vadd.xlane.f32.xlu1 %v1975_v29 }
 0xe45   :  { %v1977_v33 = vpop.xlane.xlu1 %1976 }
 0xe46   :  { %7322 = vrcp.f32 %v1977_v33 }
 0xe50   :  { %v7323_v32 = vpop.eup %7322 }
 0xe51   :  { %v1983_v22 = vrot.slane %v7323_v32, %v8611_v50  ;;  %v1987_v5 = vrot.slane %v7323_v32, %v8605_v16 }
 0xe53   :  { %v1990_v3 = vmul.f32 %v7319_v61, %v1983_v22  ;;  %v1991_v11 = vmul.f32 %v7321_v44, %v1987_v5  ;;  %v9926_v5 = vld [vmem:[#allocation36_spill] sm:$0xff] }
 0xe55   :  { %1994 = vperm.xlu0 %7290, %v1990_v3  }
 0xe59   :  { %1999 = vperm.xlu0 %7290, %v1991_v11   ;;  %v9927_v11 = vld [vmem:[#allocation37_spill] sm:$0xff] }
 0xed4   :  { %v1995_v27 = vpop.permute.xlu0 %1994 }
 0xed5   :  { %v2002_v43 = vmul.f32 %v1995_v27, %v8661_v54  ;;  %v9932_v27 = vld [vmem:[#allocation78_spill] sm:$0xff] }
 0xed7   :  { %v2004_v4 = vrot.slane %v2002_v43, 4 }
 0xed8   :  { %v2000_v42 = vpop.permute.xlu0 %1999 }
 0xed9   :  { %v2005_v10 = vadd.f32 %v2004_v4, %v2002_v43  ;;  %v2003_v55 = vmul.f32 %v2000_v42, %v8671_v2  ;;  %v9933_v43 = vld [vmem:[#allocation41_spill] sm:$0xff]  ;;  %v9934_v4 = vld [vmem:[#allocation79_spill] sm:$0xff]  ;;  %v9935_v42 = vld [vmem:[#allocation42_spill] sm:$0xff] }
 0xedb   :  { %v2006_v6 = vrot.slane %v2005_v10, 2  ;;  %v2010_v29 = vrot.slane %v2003_v55, 4 }
 0xedd   :  { %v2007_v33 = vadd.f32 %v2006_v6, %v2005_v10  ;;  %v2011_v37 = vadd.f32 %v2010_v29, %v2003_v55  ;;  %v9936_v10 = vld [vmem:[#allocation80_spill] sm:$0xff]  ;;  %v9937_v55 = vld [vmem:[#allocation43_spill] sm:$0xff]  ;;  %v9938_v6 = vld [vmem:[#allocation81_spill] sm:$0xff] }
 0xede   :  { %v9939_v29 = vld [vmem:[#allocation44_spill] sm:$0xff] }
 0xedf   :  { %v2012_v12 = vrot.slane %v2011_v37, 2  ;;  %v2008_v14 = vrot.slane %v2007_v33, 1 }
 0xee1   :  { %v2013_v61 = vadd.f32 %v2012_v12, %v2011_v37  ;;  %v2009_v32 = vadd.f32 %v2008_v14, %v2007_v33  ;;  %v9928_v37 = vld [vmem:[#allocation38_spill] sm:$0xff]  ;;  %v9929_v12 = vld [vmem:[#allocation39_spill] sm:$0xff]  ;;  %v9930_v14 = vld [vmem:[#allocation77_spill] sm:$0xff] }
 0xee2   :  { %v9940_v33 = vld [vmem:[#allocation82_spill] sm:$0xff] }
 0xee3   :  { %v2014_v22 = vrot.slane %v2013_v61, 1 }
 0xee5   :  { %v2015_v3 = vadd.f32 %v2014_v22, %v2013_v61  ;;  %v9941_v61 = vld [vmem:[#allocation45_spill] sm:$0xff]  ;;  %v9942_v22 = vld [vmem:[#allocation83_spill] sm:$0xff] }
 0xee7   :  { %v2018_v44 = vsel %vm1933_vm5, %v2015_v3, %v2009_v32  ;;  %v9943_v32 = vld [vmem:[#allocation46_spill] sm:$0xff]  ;;  %v9944_v3 = vld [vmem:[#allocation84_spill] sm:$0xff] }
 0xee8   :  { %2226 = vmatprep.mubr.f32.mxu1 %v2018_v44  ;;  %2297 = vmatprep.mubr.f32.mxu0 %v2018_v44  ;;  %v9945_v44 = vld [vmem:[#allocation47_spill] sm:$0xff] }
 0xee9   :  { %2227 = vmatmul.mubr.f32.vlgmr.msra.gmra.mrb[12].mxu1 %v8632_v51  ;;  %2298 = vmatmul.mubr.f32.vlgmr.msra.gmra.mrb[16].mxu0 %v8632_v51  ;;  %v9931_v51 = vld [vmem:[#allocation40_spill] sm:$0xff] }
 0xeea   :  { %6028 = vmatpush1.bf16.msra.mxu1 %v9926_v5  ;;  %6060 = vmatpush1.bf16.msra.mxu0 %v8429_v15 }
 0xeeb   :  { %6030 = vmatprep.subr.bf16.mxu1 %v9927_v11  ;;  %6062 = vmatprep.subr.bf16.mxu0 %v8431_v0 }
 0xeec   :  { %2527 = vmatprep.mubr.f32.mxu1 %v9856_v26  ;;  %2598 = vmatprep.mubr.f32.mxu0 %v9856_v26 }
 0xeee   :  { %6032 = vmatpush1.bf16.msra.mxu1 %v9928_v37  ;;  %6064 = vmatpush1.bf16.msra.mxu0 %v8436_v28 }
 0xeef   :  { %6034 = vmatprep.subr.bf16.mxu1 %v9929_v12  ;;  %6066 = vmatprep.subr.bf16.mxu0 %v9930_v14 }
 0xef2   :  { %6036 = vmatpush1.bf16.msra.mxu1 %v9931_v51  ;;  %6068 = vmatpush1.bf16.msra.mxu0 %v9932_v27 }
 0xef3   :  { %6038 = vmatprep.subr.bf16.mxu1 %v9933_v43  ;;  %6070 = vmatprep.subr.bf16.mxu0 %v9934_v4  ;;  %v9955_v43 = vld [vmem:[#allocation115_spill] sm:$0xff] }
 0xef6   :  { %6040 = vmatpush1.bf16.msra.mxu1 %v9935_v42  ;;  %6072 = vmatpush1.bf16.msra.mxu0 %v9936_v10  ;;  %v9946_v42 = vld [vmem:[#allocation85_spill] sm:$0xff]  ;;  %v9947_v10 = vld [vmem:[#allocation48_spill] sm:$0xff] }
 0xef7   :  { %6042 = vmatprep.subr.bf16.mxu1 %v9937_v55  ;;  %6074 = vmatprep.subr.bf16.mxu0 %v9938_v6  ;;  %v9948_v55 = vld [vmem:[#allocation86_spill] sm:$0xff]  ;;  %v9949_v6 = vld [vmem:[#allocation49_spill] sm:$0xff] }
 0xefa   :  { %6044 = vmatpush1.bf16.msra.mxu1 %v9939_v29  ;;  %6076 = vmatpush1.bf16.msra.mxu0 %v9940_v33  ;;  %v9950_v29 = vld [vmem:[#allocation87_spill] sm:$0xff]  ;;  %v9951_v33 = vld [vmem:[#allocation50_spill] sm:$0xff] }
 0xefb   :  { %6046 = vmatprep.subr.bf16.mxu1 %v9941_v61  ;;  %6078 = vmatprep.subr.bf16.mxu0 %v9942_v22  ;;  %v9952_v61 = vld [vmem:[#allocation88_spill] sm:$0xff]  ;;  %v9953_v22 = vld [vmem:[#allocation51_spill] sm:$0xff] }
 0xefe   :  { %6048 = vmatpush1.bf16.msra.mxu1 %v9943_v32  ;;  %6080 = vmatpush1.bf16.msra.mxu0 %v9944_v3  ;;  %v9954_v32 = vld [vmem:[#allocation89_spill] sm:$0xff] }
 0xeff   :  { %6050 = vmatprep.subr.bf16.mxu1 %v9945_v44  ;;  %6082 = vmatprep.subr.bf16.mxu0 %v9946_v42 }
 0xf02   :  { %6052 = vmatpush1.bf16.msra.mxu1 %v9947_v10  ;;  %6084 = vmatpush1.bf16.msra.mxu0 %v9948_v55 }
 0xf03   :  { %6054 = vmatprep.subr.bf16.mxu1 %v9949_v6  ;;  %6086 = vmatprep.subr.bf16.mxu0 %v9950_v29 }
 0xf06   :  { %6056 = vmatpush1.bf16.msra.mxu1 %v9951_v33  ;;  %6088 = vmatpush1.bf16.msra.mxu0 %v9952_v61 }
 0xf07   :  { %6090 = vmatprep.subr.bf16.mxu1 %v9953_v22  ;;  %6154 = vmatprep.subr.bf16.mxu0 %v9954_v32 }
 0xfbc   :  { %v2228_v3 = vpop.f32.mrb[12].mxu1  ;;  %v2299_v44 = vpop.f32.mrb[16].mxu0 }
 0xfbd   :  { %v2304_v42 = vadd.f32 %v2228_v3, %v8617_v1  ;;  %v2230_v4 = vpop.f32.mrb[13].mxu1  ;;  %v2301_v10 = vpop.f32.mrb[17].mxu0  ;;  %v2306_v32 = vadd.f32 %v2299_v44, %v8623_v60 }
 0xfbe   :  { %v2305_v55 = vadd.f32 %v2230_v4, %v9955_v43  ;;  %v2307_v33 = vadd.f32 %v2301_v10, %v8625_v36 }
 0xfbf   :  { %v2308_v27 = vsub.f32 0.0, %v2304_v42 }
 0xfc0   :  { %v2313_v6 = vsub.f32 0.0, %v2305_v55  ;;  %v2319_v61 = vsub.f32 0.0, %v2307_v33 }
 0xfc1   :  { %v2309_v51 = vmul.f32 1.442695, %v2308_v27 }
 0xfc2   :  { %v2314_v29 = vmul.f32 1.442695, %v2313_v6  ;;  %v2320_v22 = vmul.f32 1.442695, %v2319_v61 }
 0xfc3   :  { %7324 = vpow2.f32 %v2309_v51 }
 0xfc4   :  { %7326 = vpow2.f32 %v2314_v29 }
 0xfc5   :  { %7328 = vpow2.f32 %v2320_v22 }
 0xfc6   :  { %7330 = vtanh.f32 %v2306_v32 }
 0xfcd   :  { %v7325_v14 = vpop.eup %7324 }
 0xfce   :  { %v7327_v12 = vpop.eup %7326  ;;  %v2311_v28 = vadd.f32 1.0, %v7325_v14 }
 0xfcf   :  { %v2316_v3 = vadd.f32 1.0, %v7327_v12  ;;  %v7329_v4 = vpop.eup %7328 }
 0xfd0   :  { %7332 = vrcp.f32 %v2311_v28  ;;  %v7331_v42 = vpop.eup %7330  ;;  %v2322_v10 = vadd.f32 1.0, %v7329_v4 }
 0xfd1   :  { %7334 = vrcp.f32 %v2316_v3 }
 0xfd2   :  { %7336 = vrcp.f32 %v2322_v10  ;;  %v9960_v10 = vld [vmem:[#allocation100_spill] sm:$0xff] }
 0xfda   :  { %v7333_v27 = vpop.eup %7332 }
 0xfdb   :  { %v7335_v55 = vpop.eup %7334  ;;  %v2325_v6 = vmul.f32 %v7333_v27, %v7331_v42  ;;  %v9956_v42 = vld [vmem:[#allocation98_spill] sm:$0xff]  ;;  %v9957_v27 = vld [vmem:[#allocation60_spill] sm:$0xff] }
 0xfdc   :  { %v2324_v51 = vmul.f32 %v7335_v55, %v8629_v25  ;;  %v7337_v33 = vpop.eup %7336  ;;  %v9958_v55 = vld [vmem:[#allocation99_spill] sm:$0xff] }
 0xfde   :  { %v8781_v29 = vadd.f32 %v2325_v6, %v2324_v51  ;;  %v9959_v6 = vld [vmem:[#allocation62_spill] sm:$0xff]  ;;  %v9961_v51 = vld [vmem:[#allocation63_spill] sm:$0xff] }
 0xfe0   :  { %7338 = vtanh.f32 %v8781_v29 }
 0xfea   :  { %v7339_v14 = vpop.eup %7338 }
 0xfeb   :  { %v8784_v61 = vmul.f32 %v7339_v14, %v7337_v33  ;;  %v9962_v33 = vld [vmem:[#allocation101_spill] sm:$0xff]  ;;  %v9963_v14 = vld [vmem:[#allocation64_spill] sm:$0xff] }
 0xfed   :  { %2528 = vmatmul.mubr.f32.vlgmr.msra.gmra.mrb[14].mxu1 %v8784_v61  ;;  %2599 = vmatmul.mubr.f32.vlgmr.msra.gmra.mrb[18].mxu0 %v8784_v61  ;;  %v2336_v28 = vrot.slane %v8784_v61, %v8637_v9 }
 0xfee   :  { %6092 = vmatpush1.bf16.msra.mxu1 %v8308_v17  ;;  %6156 = vmatpush1.bf16.msra.mxu0 %v8479_v58 }
 0xfef   :  { %v2344_v25 = vrot.slane %v2336_v28, %v8637_v9  ;;  %v2337_v12 = vcombine.high %v2336_v28, %v2336_v28  ;;  %6094 = vmatprep.subr.bf16.mxu1 %v8311_v19  ;;  %6158 = vmatprep.subr.bf16.mxu0 %v8482_v59  ;;  %v9964_v28 = vld [vmem:[#allocation102_spill] sm:$0xff] }
 0xff1   :  { %v2355_v22 = vrot.slane %v2344_v25, %v8611_v50  ;;  %v2351_v32 = vrot.slane %v2337_v12, %v8637_v9  ;;  %v9965_v25 = vld [vmem:[#allocation65_spill] sm:$0xff]  ;;  %v9966_v12 = vld [vmem:[#allocation103_spill] sm:$0xff] }
 0xff2   :  { %6096 = vmatpush1.bf16.msra.mxu1 %v8315_v23  ;;  %6160 = vmatpush1.bf16.msra.mxu0 %v8486_v52 }
 0xff3   :  { %v2362_v44 = vmul.f32 %v2355_v22, %v8661_v54  ;;  %v2359_v3 = vrot.slane %v2351_v32, %v8611_v50  ;;  %6098 = vmatprep.subr.bf16.mxu1 %v8319_v24  ;;  %6162 = vmatprep.subr.bf16.mxu0 %v8490_v34  ;;  %v9967_v22 = vld [vmem:[#allocation66_spill] sm:$0xff]  ;;  %v9968_v32 = vld [vmem:[#allocation104_spill] sm:$0xff] }
 0xff5   :  { %2364 = vadd.xlane.f32.xlu0 %v2362_v44  ;;  %v2363_v4 = vmul.f32 %v2359_v3, %v8671_v2  ;;  %v9969_v44 = vld [vmem:[#allocation67_spill] sm:$0xff]  ;;  %v9970_v3 = vld [vmem:[#allocation105_spill] sm:$0xff] }
 0xff6   :  { %6100 = vmatpush1.bf16.msra.mxu1 %v8322_v30  ;;  %6164 = vmatpush1.bf16.msra.mxu0 %v8493_v18 }
 0xff7   :  { %2366 = vadd.xlane.f32.xlu1 %v2363_v4  ;;  %6102 = vmatprep.subr.bf16.mxu1 %v8325_v31  ;;  %v9971_v4 = vld [vmem:[#allocation68_spill] sm:$0xff] }
 0xff8   :  { %6166 = vmatprep.subr.bf16.mxu0 %v8496_v21 }
 0xffa   :  { %6104 = vmatpush1.bf16.msra.mxu1 %v8328_v38  ;;  %6168 = vmatpush1.bf16.msra.mxu0 %v8499_v40 }
 0xffb   :  { %6106 = vmatprep.subr.bf16.mxu1 %v8331_v39  ;;  %6170 = vmatprep.subr.bf16.mxu0 %v8502_v41 }
 0xffe   :  { %6108 = vmatpush1.bf16.msra.mxu1 %v8334_v48  ;;  %6172 = vmatpush1.bf16.msra.mxu0 %v8505_v46 }
 0xfff   :  { %6110 = vmatprep.subr.bf16.mxu1 %v8337_v49  ;;  %6174 = vmatprep.subr.bf16.mxu0 %v8508_v47 }
0x1002   :  { %6112 = vmatpush1.bf16.msra.mxu1 %v8340_v56  ;;  %6176 = vmatpush1.bf16.msra.mxu0 %v8511_v63 }
0x1003   :  { %6114 = vmatprep.subr.bf16.mxu1 %v8343_v57  ;;  %6178 = vmatprep.subr.bf16.mxu0 %v8514_v20 }
0x1006   :  { %6116 = vmatpush1.bf16.msra.mxu1 %v8346_v62  ;;  %6180 = vmatpush1.bf16.msra.mxu0 %v8517_v35 }
0x1007   :  { %6118 = vmatprep.subr.bf16.mxu1 %v8350_v8  ;;  %6182 = vmatprep.subr.bf16.mxu0 %v8520_v53 }
0x100a   :  { %6120 = vmatpush1.bf16.msra.mxu1 %v8352_v13  ;;  %6184 = vmatpush1.bf16.msra.mxu0 %v9896_v7 }
0x100b   :  { %6122 = vmatprep.subr.bf16.mxu1 %v9897_v45  ;;  %6186 = vmatprep.subr.bf16.mxu0 %v9956_v42 }
0x100e   :  { %6124 = vmatpush1.bf16.msra.mxu1 %v9957_v27  ;;  %6188 = vmatpush1.bf16.msra.mxu0 %v9958_v55 }
0x100f   :  { %6126 = vmatprep.subr.bf16.mxu1 %v9959_v6  ;;  %6190 = vmatprep.subr.bf16.mxu0 %v9960_v10  ;;  %v9989_v10 = vld [vmem:[#allocation116_spill] sm:$0xff] }
0x1012   :  { %6128 = vmatpush1.bf16.msra.mxu1 %v9961_v51  ;;  %6192 = vmatpush1.bf16.msra.mxu0 %v9962_v33  ;;  %v9972_v51 = vld [vmem:[#allocation106_spill] sm:$0xff]  ;;  %v9973_v33 = vld [vmem:[#allocation69_spill] sm:$0xff] }
0x1013   :  { %6130 = vmatprep.subr.bf16.mxu1 %v9963_v14  ;;  %6194 = vmatprep.subr.bf16.mxu0 %v9964_v28  ;;  %v9974_v14 = vld [vmem:[#allocation107_spill] sm:$0xff]  ;;  %v9975_v28 = vld [vmem:[#allocation70_spill] sm:$0xff] }
0x1016   :  { %6132 = vmatpush1.bf16.msra.mxu1 %v9965_v25  ;;  %6196 = vmatpush1.bf16.msra.mxu0 %v9966_v12  ;;  %v9976_v25 = vld [vmem:[#allocation108_spill] sm:$0xff]  ;;  %v9977_v12 = vld [vmem:[#allocation71_spill] sm:$0xff] }
0x1017   :  { %6134 = vmatprep.subr.bf16.mxu1 %v9967_v22  ;;  %6198 = vmatprep.subr.bf16.mxu0 %v9968_v32  ;;  %v9978_v22 = vld [vmem:[#allocation109_spill] sm:$0xff]  ;;  %v9979_v32 = vld [vmem:[#allocation72_spill] sm:$0xff] }
0x101a   :  { %6136 = vmatpush1.bf16.msra.mxu1 %v9969_v44  ;;  %6200 = vmatpush1.bf16.msra.mxu0 %v9970_v3  ;;  %v9980_v44 = vld [vmem:[#allocation110_spill] sm:$0xff]  ;;  %v9981_v3 = vld [vmem:[#allocation73_spill] sm:$0xff] }
0x101b   :  { %6138 = vmatprep.subr.bf16.mxu1 %v9971_v4  ;;  %6202 = vmatprep.subr.bf16.mxu0 %v9972_v51  ;;  %v9982_v4 = vld [vmem:[#allocation111_spill] sm:$0xff]  ;;  %v9983_v51 = vld [vmem:[#allocation74_spill] sm:$0xff] }
0x101e   :  { %6140 = vmatpush1.bf16.msra.mxu1 %v9973_v33  ;;  %6204 = vmatpush1.bf16.msra.mxu0 %v9974_v14  ;;  %v9984_v33 = vld [vmem:[#allocation112_spill] sm:$0xff]  ;;  %v9985_v14 = vld [vmem:[#allocation75_spill] sm:$0xff] }
0x101f   :  { %6142 = vmatprep.subr.bf16.mxu1 %v9975_v28  ;;  %6206 = vmatprep.subr.bf16.mxu0 %v9976_v25  ;;  %v9986_v28 = vld [vmem:[#allocation113_spill] sm:$0xff]  ;;  %v9987_v25 = vld [vmem:[#allocation35_spill] sm:$0xff] }
0x1022   :  { %6144 = vmatpush1.bf16.msra.mxu1 %v9977_v12  ;;  %6208 = vmatpush1.bf16.msra.mxu0 %v9978_v22  ;;  %v9988_v12 = vld [vmem:[#allocation61_spill] sm:$0xff] }
0x1023   :  { %6146 = vmatprep.subr.bf16.mxu1 %v9979_v32  ;;  %6210 = vmatprep.subr.bf16.mxu0 %v9980_v44 }
0x1026   :  { %6148 = vmatpush1.bf16.msra.mxu1 %v9981_v3  ;;  %6212 = vmatpush1.bf16.msra.mxu0 %v9982_v4 }
0x1027   :  { %6150 = vmatprep.subr.bf16.mxu1 %v9983_v51  ;;  %6214 = vmatprep.subr.bf16.mxu0 %v9984_v33 }
0x102a   :  { %6152 = vmatpush1.bf16.msra.mxu1 %v9985_v14  ;;  %6216 = vmatpush1.bf16.msra.mxu0 %v9986_v28 }
0x102b   :  { %6218 = vmatprep.subr.bf16.mxu1 %v9987_v25  ;;  %6250 = vmatprep.subr.bf16.mxu0 %v9988_v12 }
0x1082   :  { %v2365_v22 = vpop.xlane.xlu0 %2364 }
0x1083   :  { %v2373_v44 = vrot.slane %v2365_v22, %v9989_v10 }
0x1084   :  { %v2367_v32 = vpop.xlane.xlu1 %2366 }
0x1085   :  { %v2377_v3 = vrot.slane %v2367_v32, %v9989_v10 }
0x1087   :  { %v2378_v4 = vsel %vm1933_vm5, %v2377_v3, %v2373_v44 }
0x1088   :  { %v2380_v51 = vsel %vm1936_vm6, %v2378_v4, -inf }
0x1089   :  { %2381 = vmax.xlane.f32.xlu1 %v2380_v51 }
0x1116   :  { %v2382_v33 = vpop.xlane.xlu1 %2381 }
0x1117   :  { %v2387_v14 = vrot.slane %v2382_v33, %v8611_v50  ;;  %v2391_v28 = vrot.slane %v2382_v33, %v8605_v16 }
0x1119   :  { %v2394_v6 = vsub.f32 %v2365_v22, %v2387_v14  ;;  %v2395_v25 = vsub.f32 %v2367_v32, %v2391_v28 }
0x111b   :  { %v2396_v55 = vmul.f32 1.442695, %v2394_v6  ;;  %v2398_v12 = vmul.f32 1.442695, %v2395_v25 }
0x111d   :  { %7340 = vpow2.f32 %v2396_v55 }
0x111e   :  { %7342 = vpow2.f32 %v2398_v12 }
0x1127   :  { %v7341_v27 = vpop.eup %7340 }
0x1128   :  { %2403 = vperm.xlu1 %7291, %v7341_v27   ;;  %v7343_v42 = vpop.eup %7342 }
0x112c   :  { %2406 = vperm.xlu1 %7291, %v7343_v42  }
0x11a7   :  { %v2404_v45 = vpop.permute.xlu1 %2403 }
0x11a8   :  { %v2411_v3 = vrot.slane %v2404_v45, %v9989_v10 }
0x11ab   :  { %v2407_v44 = vpop.permute.xlu1 %2406 }
0x11ac   :  { %v2415_v51 = vrot.slane %v2407_v44, %v9989_v10 }
0x11ae   :  { %v2416_v4 = vsel %vm1933_vm5, %v2415_v51, %v2411_v3 }
0x11af   :  { %v2418_v33 = vsel %vm1936_vm6, %v2416_v4, 0.0 }
0x11b0   :  { %2419 = vadd.xlane.f32.xlu0 %v2418_v33 }
0x123d   :  { %v2420_v14 = vpop.xlane.xlu0 %2419 }
0x123e   :  { %7344 = vrcp.f32 %v2420_v14 }
0x1248   :  { %v7345_v55 = vpop.eup %7344 }
0x1249   :  { %v2430_v6 = vrot.slane %v7345_v55, %v8605_v16  ;;  %v2426_v28 = vrot.slane %v7345_v55, %v8611_v50 }
0x124b   :  { %v2434_v25 = vmul.f32 %v7343_v42, %v2430_v6  ;;  %v2433_v12 = vmul.f32 %v7341_v27, %v2426_v28  ;;  %v9995_v28 = vld [vmem:[#allocation41_spill] sm:$0xff] }
0x124d   :  { %2442 = vperm.xlu0 %7290, %v2434_v25   ;;  %2437 = vperm.xlu1 %7291, %v2433_v12   ;;  %v9996_v25 = vld [vmem:[#allocation79_spill] sm:$0xff]  ;;  %v9997_v12 = vld [vmem:[#allocation42_spill] sm:$0xff] }
0x12cc   :  { %v2443_v22 = vpop.permute.xlu0 %2442  ;;  %v2438_v45 = vpop.permute.xlu1 %2437 }
0x12cd   :  { %v2446_v32 = vmul.f32 %v2443_v22, %v8671_v2  ;;  %v2445_v44 = vmul.f32 %v2438_v45, %v8661_v54  ;;  %v9998_v22 = vld [vmem:[#allocation80_spill] sm:$0xff]  ;;  %v9999_v45 = vld [vmem:[#allocation43_spill] sm:$0xff] }
0x12cf   :  { %v2453_v3 = vrot.slane %v2446_v32, 4  ;;  %v2447_v51 = vrot.slane %v2445_v44, 4 }
0x12d1   :  { %v2454_v4 = vadd.f32 %v2453_v3, %v2446_v32  ;;  %v2448_v33 = vadd.f32 %v2447_v51, %v2445_v44  ;;  %v10000_v32 = vld [vmem:[#allocation81_spill] sm:$0xff]  ;;  %v10001_v44 = vld [vmem:[#allocation44_spill] sm:$0xff]  ;;  %v10002_v3 = vld [vmem:[#allocation82_spill] sm:$0xff] }
0x12d2   :  { %v10003_v51 = vld [vmem:[#allocation45_spill] sm:$0xff] }
0x12d3   :  { %v2455_v14 = vrot.slane %v2454_v4, 2  ;;  %v2449_v10 = vrot.slane %v2448_v33, 2 }
0x12d5   :  { %v2456_v7 = vadd.f32 %v2455_v14, %v2454_v4  ;;  %v2450_v16 = vadd.f32 %v2449_v10, %v2448_v33  ;;  %v9994_v10 = vld [vmem:[#allocation78_spill] sm:$0xff]  ;;  %v10004_v4 = vld [vmem:[#allocation83_spill] sm:$0xff]  ;;  %v10006_v14 = vld [vmem:[#allocation84_spill] sm:$0xff] }
0x12d6   :  { %v10005_v33 = vld [vmem:[#allocation46_spill] sm:$0xff] }
0x12d7   :  { %v2457_v13 = vrot.slane %v2456_v7, 1  ;;  %v2451_v55 = vrot.slane %v2450_v16, 1 }
0x12d9   :  { %v2452_v42 = vadd.f32 %v2451_v55, %v2450_v16  ;;  %v2458_v27 = vadd.f32 %v2457_v13, %v2456_v7  ;;  %v9990_v13 = vld [vmem:[#allocation76_spill] sm:$0xff]  ;;  %v9991_v16 = vld [vmem:[#allocation39_spill] sm:$0xff]  ;;  %v9992_v7 = vld [vmem:[#allocation77_spill] sm:$0xff] }
0x12da   :  { %v10007_v55 = vld [vmem:[#allocation47_spill] sm:$0xff] }
0x12db   :  { %v2461_v6 = vsel %vm1933_vm5, %v2458_v27, %v2452_v42  ;;  %v10008_v42 = vld [vmem:[#allocation85_spill] sm:$0xff]  ;;  %v10009_v27 = vld [vmem:[#allocation48_spill] sm:$0xff] }
0x12dc   :  { %2669 = vmatprep.mubr.f32.mxu1 %v2461_v6  ;;  %2740 = vmatprep.mubr.f32.mxu0 %v2461_v6  ;;  %v10010_v6 = vld [vmem:[#allocation86_spill] sm:$0xff] }
0x12dd   :  { %2670 = vmatmul.mubr.f32.vlgmr.msra.gmra.mrb[14].mxu1 %v8784_v61  ;;  %2741 = vmatmul.mubr.f32.vlgmr.msra.gmra.mrb[18].mxu0 %v8784_v61  ;;  %v9993_v61 = vld [vmem:[#allocation40_spill] sm:$0xff] }
0x12de   :  { %6220 = vmatpush1.bf16.msra.mxu1 %v9926_v5  ;;  %6252 = vmatpush1.bf16.msra.mxu0 %v8429_v15 }
0x12df   :  { %6222 = vmatprep.subr.bf16.mxu1 %v9927_v11  ;;  %6254 = vmatprep.subr.bf16.mxu0 %v8431_v0 }
0x12e0   :  { %2970 = vmatprep.mubr.f32.mxu1 %v9856_v26  ;;  %3041 = vmatprep.mubr.f32.mxu0 %v9856_v26 }
0x12e2   :  { %6224 = vmatpush1.bf16.msra.mxu1 %v9928_v37  ;;  %6256 = vmatpush1.bf16.msra.mxu0 %v9990_v13 }
0x12e3   :  { %6226 = vmatprep.subr.bf16.mxu1 %v9991_v16  ;;  %6258 = vmatprep.subr.bf16.mxu0 %v9992_v7 }
0x12e6   :  { %6228 = vmatpush1.bf16.msra.mxu1 %v9993_v61  ;;  %6260 = vmatpush1.bf16.msra.mxu0 %v9994_v10 }
0x12e7   :  { %6230 = vmatprep.subr.bf16.mxu1 %v9995_v28  ;;  %6262 = vmatprep.subr.bf16.mxu0 %v9996_v25 }
0x12ea   :  { %6232 = vmatpush1.bf16.msra.mxu1 %v9997_v12  ;;  %6264 = vmatpush1.bf16.msra.mxu0 %v9998_v22 }
0x12eb   :  { %6234 = vmatprep.subr.bf16.mxu1 %v9999_v45  ;;  %6266 = vmatprep.subr.bf16.mxu0 %v10000_v32  ;;  %v10011_v32 = vld [vmem:[#allocation49_spill] sm:$0xff] }
0x12ee   :  { %6236 = vmatpush1.bf16.msra.mxu1 %v10001_v44  ;;  %6268 = vmatpush1.bf16.msra.mxu0 %v10002_v3  ;;  %v10012_v44 = vld [vmem:[#allocation87_spill] sm:$0xff]  ;;  %v10013_v3 = vld [vmem:[#allocation50_spill] sm:$0xff] }
0x12ef   :  { %6238 = vmatprep.subr.bf16.mxu1 %v10003_v51  ;;  %6270 = vmatprep.subr.bf16.mxu0 %v10004_v4  ;;  %v10014_v51 = vld [vmem:[#allocation88_spill] sm:$0xff]  ;;  %v10015_v4 = vld [vmem:[#allocation51_spill] sm:$0xff] }
0x12f2   :  { %6240 = vmatpush1.bf16.msra.mxu1 %v10005_v33  ;;  %6272 = vmatpush1.bf16.msra.mxu0 %v10006_v14  ;;  %v10016_v33 = vld [vmem:[#allocation89_spill] sm:$0xff] }
0x12f3   :  { %6242 = vmatprep.subr.bf16.mxu1 %v10007_v55  ;;  %6274 = vmatprep.subr.bf16.mxu0 %v10008_v42 }
0x12f6   :  { %6244 = vmatpush1.bf16.msra.mxu1 %v10009_v27  ;;  %6276 = vmatpush1.bf16.msra.mxu0 %v10010_v6 }
0x12f7   :  { %6246 = vmatprep.subr.bf16.mxu1 %v10011_v32  ;;  %6278 = vmatprep.subr.bf16.mxu0 %v10012_v44 }
0x12fa   :  { %6248 = vmatpush1.bf16.msra.mxu1 %v10013_v3  ;;  %6280 = vmatpush1.bf16.msra.mxu0 %v10014_v51 }
0x12fb   :  { %6282 = vmatprep.subr.bf16.mxu1 %v10015_v4  ;;  %6346 = vmatprep.subr.bf16.mxu0 %v10016_v33 }
0x13b0   :  { %v2671_v14 = vpop.f32.mrb[14].mxu1  ;;  %v2742_v55 = vpop.f32.mrb[18].mxu0 }
0x13b1   :  { %v2747_v42 = vadd.f32 %v2671_v14, %v8617_v1  ;;  %v2673_v45 = vpop.f32.mrb[15].mxu1  ;;  %v2744_v27 = vpop.f32.mrb[19].mxu0  ;;  %v2749_v33 = vadd.f32 %v2742_v55, %v8623_v60 }
0x13b2   :  { %v2748_v6 = vadd.f32 %v2673_v45, %v9955_v43  ;;  %v2750_v3 = vadd.f32 %v2744_v27, %v8625_v36 }
0x13b3   :  { %v2751_v22 = vsub.f32 0.0, %v2747_v42 }
0x13b4   :  { %v2756_v32 = vsub.f32 0.0, %v2748_v6  ;;  %v2762_v51 = vsub.f32 0.0, %v2750_v3 }
0x13b5   :  { %v2752_v12 = vmul.f32 1.442695, %v2751_v22 }
0x13b6   :  { %v2757_v44 = vmul.f32 1.442695, %v2756_v32  ;;  %v2763_v4 = vmul.f32 1.442695, %v2762_v51 }
0x13b7   :  { %7346 = vpow2.f32 %v2752_v12 }
0x13b8   :  { %7348 = vpow2.f32 %v2757_v44 }
0x13b9   :  { %7350 = vpow2.f32 %v2763_v4 }
0x13ba   :  { %7352 = vtanh.f32 %v2749_v33 }
0x13c1   :  { %v7347_v25 = vpop.eup %7346 }
0x13c2   :  { %v7349_v28 = vpop.eup %7348  ;;  %v2754_v10 = vadd.f32 1.0, %v7347_v25 }
0x13c3   :  { %v2759_v14 = vadd.f32 1.0, %v7349_v28  ;;  %v7351_v45 = vpop.eup %7350 }
0x13c4   :  { %7354 = vrcp.f32 %v2754_v10  ;;  %v7353_v42 = vpop.eup %7352  ;;  %v2765_v27 = vadd.f32 1.0, %v7351_v45 }
0x13c5   :  { %7356 = vrcp.f32 %v2759_v14 }
0x13c6   :  { %7358 = vrcp.f32 %v2765_v27  ;;  %v10021_v27 = vld [vmem:[#allocation60_spill] sm:$0xff] }
0x13ce   :  { %v7355_v22 = vpop.eup %7354 }
0x13cf   :  { %v7357_v32 = vpop.eup %7356  ;;  %v2768_v6 = vmul.f32 %v7355_v22, %v7353_v42  ;;  %v10017_v42 = vld [vmem:[#allocation58_spill] sm:$0xff]  ;;  %v10018_v22 = vld [vmem:[#allocation97_spill] sm:$0xff] }
0x13d0   :  { %v2767_v12 = vmul.f32 %v7357_v32, %v8781_v29  ;;  %v7359_v3 = vpop.eup %7358  ;;  %v10019_v32 = vld [vmem:[#allocation59_spill] sm:$0xff] }
0x13d2   :  { %v8916_v44 = vadd.f32 %v2768_v6, %v2767_v12  ;;  %v10020_v6 = vld [vmem:[#allocation98_spill] sm:$0xff]  ;;  %v10022_v12 = vld [vmem:[#allocation99_spill] sm:$0xff] }
0x13d4   :  { %7360 = vtanh.f32 %v8916_v44 }
0x13de   :  { %v7361_v25 = vpop.eup %7360 }
0x13df   :  { %v8919_v51 = vmul.f32 %v7361_v25, %v7359_v3  ;;  %v10023_v3 = vld [vmem:[#allocation62_spill] sm:$0xff]  ;;  %v10024_v25 = vld [vmem:[#allocation100_spill] sm:$0xff] }
0x13e1   :  { %2971 = vmatmul.mubr.f32.vlgmr.msra.gmra.mrb[16].mxu1 %v8919_v51  ;;  %3042 = vmatmul.mubr.f32.vlgmr.msra.gmra.mrb[20].mxu0 %v8919_v51  ;;  %v2779_v10 = vrot.slane %v8919_v51, %v8637_v9 }
0x13e2   :  { %6284 = vmatpush1.bf16.msra.mxu1 %v8308_v17  ;;  %6348 = vmatpush1.bf16.msra.mxu0 %v8479_v58 }
0x13e3   :  { %v2787_v29 = vrot.slane %v2779_v10, %v8637_v9  ;;  %v2780_v28 = vcombine.high %v2779_v10, %v2779_v10  ;;  %6286 = vmatprep.subr.bf16.mxu1 %v8311_v19  ;;  %6350 = vmatprep.subr.bf16.mxu0 %v8482_v59  ;;  %v10025_v10 = vld [vmem:[#allocation63_spill] sm:$0xff] }
0x13e5   :  { %v2798_v4 = vrot.slane %v2787_v29, %v8611_v50  ;;  %v2794_v33 = vrot.slane %v2780_v28, %v8637_v9  ;;  %v10026_v29 = vld [vmem:[#allocation101_spill] sm:$0xff]  ;;  %v10027_v28 = vld [vmem:[#allocation64_spill] sm:$0xff] }
0x13e6   :  { %6288 = vmatpush1.bf16.msra.mxu1 %v8315_v23  ;;  %6352 = vmatpush1.bf16.msra.mxu0 %v8486_v52 }
0x13e7   :  { %v2805_v55 = vmul.f32 %v2798_v4, %v8661_v54  ;;  %v2802_v14 = vrot.slane %v2794_v33, %v8611_v50  ;;  %6290 = vmatprep.subr.bf16.mxu1 %v8319_v24  ;;  %6354 = vmatprep.subr.bf16.mxu0 %v8490_v34  ;;  %v10028_v4 = vld [vmem:[#allocation102_spill] sm:$0xff]  ;;  %v10029_v33 = vld [vmem:[#allocation65_spill] sm:$0xff] }
0x13e9   :  { %2807 = vadd.xlane.f32.xlu1 %v2805_v55  ;;  %v2806_v45 = vmul.f32 %v2802_v14, %v8671_v2  ;;  %v10030_v55 = vld [vmem:[#allocation103_spill] sm:$0xff]  ;;  %v10031_v14 = vld [vmem:[#allocation66_spill] sm:$0xff] }
0x13ea   :  { %6292 = vmatpush1.bf16.msra.mxu1 %v8322_v30  ;;  %6356 = vmatpush1.bf16.msra.mxu0 %v8493_v18 }
0x13eb   :  { %2809 = vadd.xlane.f32.xlu0 %v2806_v45  ;;  %6294 = vmatprep.subr.bf16.mxu1 %v8325_v31  ;;  %v10032_v45 = vld [vmem:[#allocation104_spill] sm:$0xff] }
0x13ec   :  { %6358 = vmatprep.subr.bf16.mxu0 %v8496_v21 }
0x13ee   :  { %6296 = vmatpush1.bf16.msra.mxu1 %v8328_v38  ;;  %6360 = vmatpush1.bf16.msra.mxu0 %v8499_v40 }
0x13ef   :  { %6298 = vmatprep.subr.bf16.mxu1 %v8331_v39  ;;  %6362 = vmatprep.subr.bf16.mxu0 %v8502_v41 }
0x13f2   :  { %6300 = vmatpush1.bf16.msra.mxu1 %v8334_v48  ;;  %6364 = vmatpush1.bf16.msra.mxu0 %v8505_v46 }
0x13f3   :  { %6302 = vmatprep.subr.bf16.mxu1 %v8337_v49  ;;  %6366 = vmatprep.subr.bf16.mxu0 %v8508_v47 }
0x13f6   :  { %6304 = vmatpush1.bf16.msra.mxu1 %v8340_v56  ;;  %6368 = vmatpush1.bf16.msra.mxu0 %v8511_v63 }
0x13f7   :  { %6306 = vmatprep.subr.bf16.mxu1 %v8343_v57  ;;  %6370 = vmatprep.subr.bf16.mxu0 %v8514_v20 }
0x13fa   :  { %6308 = vmatpush1.bf16.msra.mxu1 %v8346_v62  ;;  %6372 = vmatpush1.bf16.msra.mxu0 %v8517_v35 }
0x13fb   :  { %6310 = vmatprep.subr.bf16.mxu1 %v8350_v8  ;;  %6374 = vmatprep.subr.bf16.mxu0 %v8520_v53 }
0x13fe   :  { %6312 = vmatpush1.bf16.msra.mxu1 %v10017_v42  ;;  %6376 = vmatpush1.bf16.msra.mxu0 %v10018_v22 }
0x13ff   :  { %6314 = vmatprep.subr.bf16.mxu1 %v10019_v32  ;;  %6378 = vmatprep.subr.bf16.mxu0 %v10020_v6  ;;  %v10054_v6 = vld [vmem:[#allocation114_spill] sm:$0xff] }
0x1402   :  { %6316 = vmatpush1.bf16.msra.mxu1 %v10021_v27  ;;  %6380 = vmatpush1.bf16.msra.mxu0 %v10022_v12  ;;  %v10033_v12 = vld [vmem:[#allocation67_spill] sm:$0xff]  ;;  %v10053_v27 = vld [vmem:[#allocation116_spill] sm:$0xff] }
0x1403   :  { %6318 = vmatprep.subr.bf16.mxu1 %v10023_v3  ;;  %6382 = vmatprep.subr.bf16.mxu0 %v10024_v25  ;;  %v10034_v3 = vld [vmem:[#allocation105_spill] sm:$0xff]  ;;  %v10035_v25 = vld [vmem:[#allocation68_spill] sm:$0xff] }
0x1406   :  { %6320 = vmatpush1.bf16.msra.mxu1 %v10025_v10  ;;  %6384 = vmatpush1.bf16.msra.mxu0 %v10026_v29  ;;  %v10036_v10 = vld [vmem:[#allocation106_spill] sm:$0xff]  ;;  %v10037_v29 = vld [vmem:[#allocation69_spill] sm:$0xff] }
0x1407   :  { %6322 = vmatprep.subr.bf16.mxu1 %v10027_v28  ;;  %6386 = vmatprep.subr.bf16.mxu0 %v10028_v4  ;;  %v10038_v28 = vld [vmem:[#allocation107_spill] sm:$0xff]  ;;  %v10039_v4 = vld [vmem:[#allocation70_spill] sm:$0xff] }
0x140a   :  { %6324 = vmatpush1.bf16.msra.mxu1 %v10029_v33  ;;  %6388 = vmatpush1.bf16.msra.mxu0 %v10030_v55  ;;  %v10040_v33 = vld [vmem:[#allocation108_spill] sm:$0xff]  ;;  %v10041_v55 = vld [vmem:[#allocation71_spill] sm:$0xff] }
0x140b   :  { %6326 = vmatprep.subr.bf16.mxu1 %v10031_v14  ;;  %6390 = vmatprep.subr.bf16.mxu0 %v10032_v45  ;;  %v10042_v14 = vld [vmem:[#allocation109_spill] sm:$0xff]  ;;  %v10043_v45 = vld [vmem:[#allocation72_spill] sm:$0xff] }
0x140e   :  { %6328 = vmatpush1.bf16.msra.mxu1 %v10033_v12  ;;  %6392 = vmatpush1.bf16.msra.mxu0 %v10034_v3  ;;  %v10044_v12 = vld [vmem:[#allocation110_spill] sm:$0xff]  ;;  %v10045_v3 = vld [vmem:[#allocation73_spill] sm:$0xff] }
0x140f   :  { %6330 = vmatprep.subr.bf16.mxu1 %v10035_v25  ;;  %6394 = vmatprep.subr.bf16.mxu0 %v10036_v10  ;;  %v10046_v25 = vld [vmem:[#allocation111_spill] sm:$0xff]  ;;  %v10047_v10 = vld [vmem:[#allocation74_spill] sm:$0xff] }
0x1412   :  { %6332 = vmatpush1.bf16.msra.mxu1 %v10037_v29  ;;  %6396 = vmatpush1.bf16.msra.mxu0 %v10038_v28  ;;  %v10048_v29 = vld [vmem:[#allocation112_spill] sm:$0xff]  ;;  %v10049_v28 = vld [vmem:[#allocation75_spill] sm:$0xff] }
0x1413   :  { %6334 = vmatprep.subr.bf16.mxu1 %v10039_v4  ;;  %6398 = vmatprep.subr.bf16.mxu0 %v10040_v33  ;;  %v10050_v4 = vld [vmem:[#allocation113_spill] sm:$0xff]  ;;  %v10051_v33 = vld [vmem:[#allocation35_spill] sm:$0xff] }
0x1416   :  { %6336 = vmatpush1.bf16.msra.mxu1 %v10041_v55  ;;  %6400 = vmatpush1.bf16.msra.mxu0 %v10042_v14  ;;  %v10052_v55 = vld [vmem:[#allocation61_spill] sm:$0xff] }
0x1417   :  { %6338 = vmatprep.subr.bf16.mxu1 %v10043_v45  ;;  %6402 = vmatprep.subr.bf16.mxu0 %v10044_v12 }
0x141a   :  { %6340 = vmatpush1.bf16.msra.mxu1 %v10045_v3  ;;  %6404 = vmatpush1.bf16.msra.mxu0 %v10046_v25 }
0x141b   :  { %6342 = vmatprep.subr.bf16.mxu1 %v10047_v10  ;;  %6406 = vmatprep.subr.bf16.mxu0 %v10048_v29 }
0x141e   :  { %6344 = vmatpush1.bf16.msra.mxu1 %v10049_v28  ;;  %6408 = vmatpush1.bf16.msra.mxu0 %v10050_v4 }
0x141f   :  { %6410 = vmatprep.subr.bf16.mxu1 %v10051_v33  ;;  %6442 = vmatprep.subr.bf16.mxu0 %v10052_v55 }
0x1476   :  { %v2808_v14 = vpop.xlane.xlu1 %2807 }
0x1477   :  { %v2816_v12 = vrot.slane %v2808_v14, %v10053_v27 }
0x1478   :  { %v2810_v45 = vpop.xlane.xlu0 %2809 }
0x1479   :  { %v2820_v3 = vrot.slane %v2810_v45, %v10053_v27 }
0x147b   :  { %v2821_v25 = vsel %vm1933_vm5, %v2820_v3, %v2816_v12 }
0x147c   :  { %v2823_v10 = vsel %vm1936_vm6, %v2821_v25, -inf }
0x147d   :  { %2824 = vmax.xlane.f32.xlu1 %v2823_v10 }
0x150a   :  { %v2825_v29 = vpop.xlane.xlu1 %2824 }
0x150b   :  { %v2830_v28 = vrot.slane %v2825_v29, %v8611_v50  ;;  %v2834_v4 = vrot.slane %v2825_v29, %v10054_v6 }
0x150d   :  { %v2837_v32 = vsub.f32 %v2808_v14, %v2830_v28  ;;  %v2838_v33 = vsub.f32 %v2810_v45, %v2834_v4 }
0x150f   :  { %v2839_v22 = vmul.f32 1.442695, %v2837_v32  ;;  %v2841_v55 = vmul.f32 1.442695, %v2838_v33 }
0x1511   :  { %7362 = vpow2.f32 %v2839_v22 }
0x1512   :  { %7364 = vpow2.f32 %v2841_v55 }
0x151b   :  { %v7363_v42 = vpop.eup %7362 }
0x151c   :  { %v7365_v53 = vpop.eup %7364  ;;  %2846 = vperm.xlu1 %7291, %v7363_v42  }
0x151d   :  { %2849 = vperm.xlu0 %7290, %v7365_v53  }
0x159b   :  { %v2847_v8 = vpop.permute.xlu1 %2846 }
0x159c   :  { %v2850_v12 = vpop.permute.xlu0 %2849  ;;  %v2854_v3 = vrot.slane %v2847_v8, %v10053_v27 }
0x159d   :  { %v2858_v25 = vrot.slane %v2850_v12, %v10053_v27 }
0x159f   :  { %v2859_v10 = vsel %vm1933_vm5, %v2858_v25, %v2854_v3 }
0x15a0   :  { %v2861_v29 = vsel %vm1936_vm6, %v2859_v10, 0.0 }
0x15a1   :  { %2862 = vadd.xlane.f32.xlu1 %v2861_v29 }
0x162e   :  { %v2863_v28 = vpop.xlane.xlu1 %2862 }
0x162f   :  { %7366 = vrcp.f32 %v2863_v28 }
0x1639   :  { %v7367_v32 = vpop.eup %7366 }
0x163a   :  { %v2869_v22 = vrot.slane %v7367_v32, %v8611_v50  ;;  %v2873_v33 = vrot.slane %v7367_v32, %v10054_v6 }
0x163c   :  { %v2876_v4 = vmul.f32 %v7363_v42, %v2869_v22  ;;  %v2877_v55 = vmul.f32 %v7365_v53, %v2873_v33  ;;  %v10059_v33 = vld [vmem:[#allocation80_spill] sm:$0xff] }
0x163e   :  { %2880 = vperm.xlu0 %7290, %v2876_v4  }
0x1642   :  { %2885 = vperm.xlu0 %7290, %v2877_v55   ;;  %v10060_v55 = vld [vmem:[#allocation43_spill] sm:$0xff] }
0x16bd   :  { %v2881_v14 = vpop.permute.xlu0 %2880 }
0x16be   :  { %v2888_v8 = vmul.f32 %v2881_v14, %v8661_v54  ;;  %v10061_v14 = vld [vmem:[#allocation81_spill] sm:$0xff] }
0x16c0   :  { %v2890_v45 = vrot.slane %v2888_v8, 4 }
0x16c1   :  { %v2886_v12 = vpop.permute.xlu0 %2885 }
0x16c2   :  { %v2891_v3 = vadd.f32 %v2890_v45, %v2888_v8  ;;  %v2889_v25 = vmul.f32 %v2886_v12, %v8671_v2  ;;  %v10062_v8 = vld [vmem:[#allocation44_spill] sm:$0xff]  ;;  %v10063_v45 = vld [vmem:[#allocation82_spill] sm:$0xff]  ;;  %v10064_v12 = vld [vmem:[#allocation45_spill] sm:$0xff] }
0x16c4   :  { %v2892_v10 = vrot.slane %v2891_v3, 2  ;;  %v2896_v29 = vrot.slane %v2889_v25, 4 }
0x16c6   :  { %v2893_v28 = vadd.f32 %v2892_v10, %v2891_v3  ;;  %v2897_v27 = vadd.f32 %v2896_v29, %v2889_v25  ;;  %v10065_v3 = vld [vmem:[#allocation83_spill] sm:$0xff]  ;;  %v10066_v25 = vld [vmem:[#allocation46_spill] sm:$0xff]  ;;  %v10067_v10 = vld [vmem:[#allocation84_spill] sm:$0xff] }
0x16c7   :  { %v10068_v29 = vld [vmem:[#allocation47_spill] sm:$0xff] }
0x16c8   :  { %v2898_v35 = vrot.slane %v2897_v27, 2  ;;  %v2894_v62 = vrot.slane %v2893_v28, 1 }
0x16ca   :  { %v2899_v42 = vadd.f32 %v2898_v35, %v2897_v27  ;;  %v2895_v32 = vadd.f32 %v2894_v62, %v2893_v28  ;;  %v10055_v62 = vld [vmem:[#allocation78_spill] sm:$0xff]  ;;  %v10056_v35 = vld [vmem:[#allocation41_spill] sm:$0xff] }
0x16cb   :  { %v10058_v27 = vld [vmem:[#allocation42_spill] sm:$0xff]  ;;  %v10069_v28 = vld [vmem:[#allocation85_spill] sm:$0xff] }
0x16cc   :  { %v2900_v22 = vrot.slane %v2899_v42, 1 }
0x16ce   :  { %v2901_v4 = vadd.f32 %v2900_v22, %v2899_v42  ;;  %v10070_v42 = vld [vmem:[#allocation48_spill] sm:$0xff]  ;;  %v10071_v22 = vld [vmem:[#allocation86_spill] sm:$0xff] }
0x16d0   :  { %v2904_v53 = vsel %vm1933_vm5, %v2901_v4, %v2895_v32  ;;  %v10072_v32 = vld [vmem:[#allocation49_spill] sm:$0xff]  ;;  %v10073_v4 = vld [vmem:[#allocation87_spill] sm:$0xff] }
0x16d1   :  { %3112 = vmatprep.mubr.f32.mxu1 %v2904_v53  ;;  %3183 = vmatprep.mubr.f32.mxu0 %v2904_v53  ;;  %v10074_v53 = vld [vmem:[#allocation50_spill] sm:$0xff] }
0x16d2   :  { %3113 = vmatmul.mubr.f32.vlgmr.msra.gmra.mrb[16].mxu1 %v8919_v51  ;;  %3184 = vmatmul.mubr.f32.vlgmr.msra.gmra.mrb[20].mxu0 %v8919_v51  ;;  %v10057_v51 = vld [vmem:[#allocation79_spill] sm:$0xff] }
0x16d3   :  { %6412 = vmatpush1.bf16.msra.mxu1 %v9926_v5  ;;  %6444 = vmatpush1.bf16.msra.mxu0 %v8429_v15 }
0x16d4   :  { %6414 = vmatprep.subr.bf16.mxu1 %v9927_v11  ;;  %6446 = vmatprep.subr.bf16.mxu0 %v8431_v0 }
0x16d5   :  { %3413 = vmatprep.mubr.f32.mxu1 %v9856_v26  ;;  %3484 = vmatprep.mubr.f32.mxu0 %v9856_v26 }
0x16d7   :  { %6416 = vmatpush1.bf16.msra.mxu1 %v9928_v37  ;;  %6448 = vmatpush1.bf16.msra.mxu0 %v9990_v13 }
0x16d8   :  { %6418 = vmatprep.subr.bf16.mxu1 %v9991_v16  ;;  %6450 = vmatprep.subr.bf16.mxu0 %v9992_v7 }
0x16db   :  { %6420 = vmatpush1.bf16.msra.mxu1 %v9993_v61  ;;  %6452 = vmatpush1.bf16.msra.mxu0 %v10055_v62 }
0x16dc   :  { %6422 = vmatprep.subr.bf16.mxu1 %v10056_v35  ;;  %6454 = vmatprep.subr.bf16.mxu0 %v10057_v51 }
0x16df   :  { %6424 = vmatpush1.bf16.msra.mxu1 %v10058_v27  ;;  %6456 = vmatpush1.bf16.msra.mxu0 %v10059_v33 }
0x16e0   :  { %6426 = vmatprep.subr.bf16.mxu1 %v10060_v55  ;;  %6458 = vmatprep.subr.bf16.mxu0 %v10061_v14 }
0x16e3   :  { %6428 = vmatpush1.bf16.msra.mxu1 %v10062_v8  ;;  %6460 = vmatpush1.bf16.msra.mxu0 %v10063_v45 }
0x16e4   :  { %6430 = vmatprep.subr.bf16.mxu1 %v10064_v12  ;;  %6462 = vmatprep.subr.bf16.mxu0 %v10065_v3  ;;  %v10075_v12 = vld [vmem:[#allocation88_spill] sm:$0xff]  ;;  %v10076_v3 = vld [vmem:[#allocation51_spill] sm:$0xff] }
0x16e7   :  { %6432 = vmatpush1.bf16.msra.mxu1 %v10066_v25  ;;  %6464 = vmatpush1.bf16.msra.mxu0 %v10067_v10  ;;  %v10077_v25 = vld [vmem:[#allocation89_spill] sm:$0xff] }
0x16e8   :  { %6434 = vmatprep.subr.bf16.mxu1 %v10068_v29  ;;  %6466 = vmatprep.subr.bf16.mxu0 %v10069_v28 }
0x16eb   :  { %6436 = vmatpush1.bf16.msra.mxu1 %v10070_v42  ;;  %6468 = vmatpush1.bf16.msra.mxu0 %v10071_v22 }
0x16ec   :  { %6438 = vmatprep.subr.bf16.mxu1 %v10072_v32  ;;  %6470 = vmatprep.subr.bf16.mxu0 %v10073_v4 }
0x16ef   :  { %6440 = vmatpush1.bf16.msra.mxu1 %v10074_v53  ;;  %6472 = vmatpush1.bf16.msra.mxu0 %v10075_v12 }
0x16f0   :  { %6474 = vmatprep.subr.bf16.mxu1 %v10076_v3  ;;  %6538 = vmatprep.subr.bf16.mxu0 %v10077_v25 }
0x17a5   :  { %v3114_v10 = vpop.f32.mrb[16].mxu1  ;;  %v3185_v29 = vpop.f32.mrb[20].mxu0 }
0x17a6   :  { %v3190_v28 = vadd.f32 %v3114_v10, %v8617_v1  ;;  %v3116_v45 = vpop.f32.mrb[17].mxu1  ;;  %v3187_v42 = vpop.f32.mrb[21].mxu0  ;;  %v3192_v25 = vadd.f32 %v3185_v29, %v8623_v60 }
0x17a7   :  { %v3191_v22 = vadd.f32 %v3116_v45, %v9955_v43  ;;  %v3193_v53 = vadd.f32 %v3187_v42, %v8625_v36 }
0x17a8   :  { %v3194_v8 = vsub.f32 0.0, %v3190_v28 }
0x17a9   :  { %v3199_v32 = vsub.f32 0.0, %v3191_v22  ;;  %v3205_v12 = vsub.f32 0.0, %v3193_v53 }
0x17aa   :  { %v3195_v14 = vmul.f32 1.442695, %v3194_v8 }
0x17ab   :  { %v3200_v4 = vmul.f32 1.442695, %v3199_v32  ;;  %v3206_v3 = vmul.f32 1.442695, %v3205_v12 }
0x17ac   :  { %7368 = vpow2.f32 %v3195_v14 }
0x17ad   :  { %7370 = vpow2.f32 %v3200_v4 }
0x17ae   :  { %7372 = vpow2.f32 %v3206_v3 }
0x17af   :  { %7374 = vtanh.f32 %v3192_v25 }
0x17b6   :  { %v7369_v55 = vpop.eup %7368 }
0x17b7   :  { %v7371_v33 = vpop.eup %7370  ;;  %v3197_v27 = vadd.f32 1.0, %v7369_v55 }
0x17b8   :  { %v3202_v10 = vadd.f32 1.0, %v7371_v33  ;;  %v7373_v45 = vpop.eup %7372 }
0x17b9   :  { %7376 = vrcp.f32 %v3197_v27  ;;  %v7375_v28 = vpop.eup %7374  ;;  %v3208_v42 = vadd.f32 1.0, %v7373_v45 }
0x17ba   :  { %7378 = vrcp.f32 %v3202_v10 }
0x17bb   :  { %7380 = vrcp.f32 %v3208_v42  ;;  %v10082_v42 = vld [vmem:[#allocation58_spill] sm:$0xff] }
0x17c3   :  { %v7377_v8 = vpop.eup %7376 }
0x17c4   :  { %v7379_v22 = vpop.eup %7378  ;;  %v3211_v32 = vmul.f32 %v7377_v8, %v7375_v28  ;;  %v10078_v28 = vld [vmem:[#allocation56_spill] sm:$0xff]  ;;  %v10079_v8 = vld [vmem:[#allocation95_spill] sm:$0xff] }
0x17c5   :  { %v3210_v14 = vmul.f32 %v7379_v22, %v8916_v44  ;;  %v7381_v12 = vpop.eup %7380  ;;  %v10080_v22 = vld [vmem:[#allocation57_spill] sm:$0xff] }
0x17c7   :  { %v9051_v4 = vadd.f32 %v3211_v32, %v3210_v14  ;;  %v10081_v32 = vld [vmem:[#allocation96_spill] sm:$0xff]  ;;  %v10083_v14 = vld [vmem:[#allocation97_spill] sm:$0xff] }
0x17c9   :  { %7382 = vtanh.f32 %v9051_v4 }
0x17d3   :  { %v7383_v55 = vpop.eup %7382 }
0x17d4   :  { %v9054_v3 = vmul.f32 %v7383_v55, %v7381_v12  ;;  %v10084_v12 = vld [vmem:[#allocation59_spill] sm:$0xff]  ;;  %v10085_v55 = vld [vmem:[#allocation98_spill] sm:$0xff] }
0x17d6   :  { %3414 = vmatmul.mubr.f32.vlgmr.msra.gmra.mrb[18].mxu1 %v9054_v3  ;;  %3485 = vmatmul.mubr.f32.vlgmr.msra.gmra.mrb[22].mxu0 %v9054_v3  ;;  %v3222_v27 = vrot.slane %v9054_v3, %v8637_v9 }
0x17d7   :  { %6476 = vmatpush1.bf16.msra.mxu1 %v8308_v17  ;;  %6540 = vmatpush1.bf16.msra.mxu0 %v8479_v58 }
0x17d8   :  { %v3230_v44 = vrot.slane %v3222_v27, %v8637_v9  ;;  %v3223_v33 = vcombine.high %v3222_v27, %v3222_v27  ;;  %6478 = vmatprep.subr.bf16.mxu1 %v8311_v19  ;;  %6542 = vmatprep.subr.bf16.mxu0 %v8482_v59  ;;  %v10086_v27 = vld [vmem:[#allocation60_spill] sm:$0xff] }
0x17da   :  { %v3241_v25 = vrot.slane %v3230_v44, %v8611_v50  ;;  %v3237_v29 = vrot.slane %v3223_v33, %v8637_v9  ;;  %v10087_v44 = vld [vmem:[#allocation99_spill] sm:$0xff]  ;;  %v10088_v33 = vld [vmem:[#allocation62_spill] sm:$0xff] }
0x17db   :  { %6480 = vmatpush1.bf16.msra.mxu1 %v8315_v23  ;;  %6544 = vmatpush1.bf16.msra.mxu0 %v8486_v52 }
0x17dc   :  { %v3248_v53 = vmul.f32 %v3241_v25, %v8661_v54  ;;  %v3245_v10 = vrot.slane %v3237_v29, %v8611_v50  ;;  %6482 = vmatprep.subr.bf16.mxu1 %v8319_v24  ;;  %6546 = vmatprep.subr.bf16.mxu0 %v8490_v34  ;;  %v10089_v25 = vld [vmem:[#allocation100_spill] sm:$0xff]  ;;  %v10090_v29 = vld [vmem:[#allocation63_spill] sm:$0xff] }
0x17de   :  { %3250 = vadd.xlane.f32.xlu0 %v3248_v53  ;;  %v3249_v45 = vmul.f32 %v3245_v10, %v8671_v2  ;;  %v10091_v53 = vld [vmem:[#allocation101_spill] sm:$0xff]  ;;  %v10092_v10 = vld [vmem:[#allocation64_spill] sm:$0xff] }
0x17df   :  { %6484 = vmatpush1.bf16.msra.mxu1 %v8322_v30  ;;  %6548 = vmatpush1.bf16.msra.mxu0 %v8493_v18 }
0x17e0   :  { %3252 = vadd.xlane.f32.xlu1 %v3249_v45  ;;  %6486 = vmatprep.subr.bf16.mxu1 %v8325_v31  ;;  %v10093_v45 = vld [vmem:[#allocation102_spill] sm:$0xff] }
0x17e1   :  { %6550 = vmatprep.subr.bf16.mxu0 %v8496_v21 }
0x17e3   :  { %6488 = vmatpush1.bf16.msra.mxu1 %v8328_v38  ;;  %6552 = vmatpush1.bf16.msra.mxu0 %v8499_v40 }
0x17e4   :  { %6490 = vmatprep.subr.bf16.mxu1 %v8331_v39  ;;  %6554 = vmatprep.subr.bf16.mxu0 %v8502_v41 }
0x17e7   :  { %6492 = vmatpush1.bf16.msra.mxu1 %v8334_v48  ;;  %6556 = vmatpush1.bf16.msra.mxu0 %v8505_v46 }
0x17e8   :  { %6494 = vmatprep.subr.bf16.mxu1 %v8337_v49  ;;  %6558 = vmatprep.subr.bf16.mxu0 %v8508_v47 }
0x17eb   :  { %6496 = vmatpush1.bf16.msra.mxu1 %v8340_v56  ;;  %6560 = vmatpush1.bf16.msra.mxu0 %v8511_v63 }
0x17ec   :  { %6498 = vmatprep.subr.bf16.mxu1 %v8343_v57  ;;  %6562 = vmatprep.subr.bf16.mxu0 %v8514_v20 }
0x17ef   :  { %6500 = vmatpush1.bf16.msra.mxu1 %v10078_v28  ;;  %6564 = vmatpush1.bf16.msra.mxu0 %v10079_v8 }
0x17f0   :  { %6502 = vmatprep.subr.bf16.mxu1 %v10080_v22  ;;  %6566 = vmatprep.subr.bf16.mxu0 %v10081_v32 }
0x17f3   :  { %6504 = vmatpush1.bf16.msra.mxu1 %v10082_v42  ;;  %6568 = vmatpush1.bf16.msra.mxu0 %v10083_v14  ;;  %v10094_v14 = vld [vmem:[#allocation65_spill] sm:$0xff]  ;;  %v10118_v42 = vld [vmem:[#allocation116_spill] sm:$0xff] }
0x17f4   :  { %6506 = vmatprep.subr.bf16.mxu1 %v10084_v12  ;;  %6570 = vmatprep.subr.bf16.mxu0 %v10085_v55  ;;  %v10095_v12 = vld [vmem:[#allocation103_spill] sm:$0xff]  ;;  %v10096_v55 = vld [vmem:[#allocation66_spill] sm:$0xff] }
0x17f7   :  { %6508 = vmatpush1.bf16.msra.mxu1 %v10086_v27  ;;  %6572 = vmatpush1.bf16.msra.mxu0 %v10087_v44  ;;  %v10097_v27 = vld [vmem:[#allocation104_spill] sm:$0xff]  ;;  %v10098_v44 = vld [vmem:[#allocation67_spill] sm:$0xff] }
0x17f8   :  { %6510 = vmatprep.subr.bf16.mxu1 %v10088_v33  ;;  %6574 = vmatprep.subr.bf16.mxu0 %v10089_v25  ;;  %v10099_v33 = vld [vmem:[#allocation105_spill] sm:$0xff]  ;;  %v10100_v25 = vld [vmem:[#allocation68_spill] sm:$0xff] }
0x17fb   :  { %6512 = vmatpush1.bf16.msra.mxu1 %v10090_v29  ;;  %6576 = vmatpush1.bf16.msra.mxu0 %v10091_v53  ;;  %v10101_v29 = vld [vmem:[#allocation106_spill] sm:$0xff]  ;;  %v10102_v53 = vld [vmem:[#allocation69_spill] sm:$0xff] }
0x17fc   :  { %6514 = vmatprep.subr.bf16.mxu1 %v10092_v10  ;;  %6578 = vmatprep.subr.bf16.mxu0 %v10093_v45  ;;  %v10103_v10 = vld [vmem:[#allocation107_spill] sm:$0xff]  ;;  %v10104_v45 = vld [vmem:[#allocation70_spill] sm:$0xff] }
0x17ff   :  { %6516 = vmatpush1.bf16.msra.mxu1 %v10094_v14  ;;  %6580 = vmatpush1.bf16.msra.mxu0 %v10095_v12  ;;  %v10105_v14 = vld [vmem:[#allocation108_spill] sm:$0xff]  ;;  %v10106_v12 = vld [vmem:[#allocation71_spill] sm:$0xff] }
0x1800   :  { %6518 = vmatprep.subr.bf16.mxu1 %v10096_v55  ;;  %6582 = vmatprep.subr.bf16.mxu0 %v10097_v27  ;;  %v10107_v55 = vld [vmem:[#allocation109_spill] sm:$0xff]  ;;  %v10108_v27 = vld [vmem:[#allocation72_spill] sm:$0xff] }
0x1803   :  { %6520 = vmatpush1.bf16.msra.mxu1 %v10098_v44  ;;  %6584 = vmatpush1.bf16.msra.mxu0 %v10099_v33  ;;  %v10109_v44 = vld [vmem:[#allocation110_spill] sm:$0xff]  ;;  %v10110_v33 = vld [vmem:[#allocation73_spill] sm:$0xff] }
0x1804   :  { %6522 = vmatprep.subr.bf16.mxu1 %v10100_v25  ;;  %6586 = vmatprep.subr.bf16.mxu0 %v10101_v29  ;;  %v10111_v25 = vld [vmem:[#allocation111_spill] sm:$0xff]  ;;  %v10112_v29 = vld [vmem:[#allocation74_spill] sm:$0xff] }
0x1807   :  { %6524 = vmatpush1.bf16.msra.mxu1 %v10102_v53  ;;  %6588 = vmatpush1.bf16.msra.mxu0 %v10103_v10  ;;  %v10113_v53 = vld [vmem:[#allocation112_spill] sm:$0xff]  ;;  %v10114_v10 = vld [vmem:[#allocation75_spill] sm:$0xff] }
0x1808   :  { %6526 = vmatprep.subr.bf16.mxu1 %v10104_v45  ;;  %6590 = vmatprep.subr.bf16.mxu0 %v10105_v14  ;;  %v10115_v45 = vld [vmem:[#allocation113_spill] sm:$0xff]  ;;  %v10116_v14 = vld [vmem:[#allocation35_spill] sm:$0xff] }
0x180b   :  { %6528 = vmatpush1.bf16.msra.mxu1 %v10106_v12  ;;  %6592 = vmatpush1.bf16.msra.mxu0 %v10107_v55  ;;  %v10117_v12 = vld [vmem:[#allocation61_spill] sm:$0xff] }
0x180c   :  { %6530 = vmatprep.subr.bf16.mxu1 %v10108_v27  ;;  %6594 = vmatprep.subr.bf16.mxu0 %v10109_v44 }
0x180f   :  { %6532 = vmatpush1.bf16.msra.mxu1 %v10110_v33  ;;  %6596 = vmatpush1.bf16.msra.mxu0 %v10111_v25 }
0x1810   :  { %6534 = vmatprep.subr.bf16.mxu1 %v10112_v29  ;;  %6598 = vmatprep.subr.bf16.mxu0 %v10113_v53 }
0x1813   :  { %6536 = vmatpush1.bf16.msra.mxu1 %v10114_v10  ;;  %6600 = vmatpush1.bf16.msra.mxu0 %v10115_v45 }
0x1814   :  { %6602 = vmatprep.subr.bf16.mxu1 %v10116_v14  ;;  %6634 = vmatprep.subr.bf16.mxu0 %v10117_v12 }
0x186b   :  { %v3251_v55 = vpop.xlane.xlu0 %3250 }
0x186c   :  { %v3259_v44 = vrot.slane %v3251_v55, %v10118_v42 }
0x186d   :  { %v3253_v27 = vpop.xlane.xlu1 %3252 }
0x186e   :  { %v3263_v33 = vrot.slane %v3253_v27, %v10118_v42 }
0x1870   :  { %v3264_v25 = vsel %vm1933_vm5, %v3263_v33, %v3259_v44 }
0x1871   :  { %v3266_v29 = vsel %vm1936_vm6, %v3264_v25, -inf }
0x1872   :  { %3267 = vmax.xlane.f32.xlu1 %v3266_v29 }
0x18ff   :  { %v3268_v53 = vpop.xlane.xlu1 %3267 }
0x1900   :  { %v3273_v10 = vrot.slane %v3268_v53, %v8611_v50  ;;  %v3277_v45 = vrot.slane %v3268_v53, %v10054_v6 }
0x1902   :  { %v3280_v32 = vsub.f32 %v3251_v55, %v3273_v10  ;;  %v3281_v14 = vsub.f32 %v3253_v27, %v3277_v45 }
0x1904   :  { %v3282_v22 = vmul.f32 1.442695, %v3280_v32  ;;  %v3284_v12 = vmul.f32 1.442695, %v3281_v14 }
0x1906   :  { %7384 = vpow2.f32 %v3282_v22 }
0x1907   :  { %7386 = vpow2.f32 %v3284_v12 }
0x1910   :  { %v7385_v8 = vpop.eup %7384 }
0x1911   :  { %v7387_v28 = vpop.eup %7386  ;;  %3289 = vperm.xlu1 %7291, %v7385_v8  }
0x1912   :  { %3292 = vperm.xlu0 %7290, %v7387_v28  }
0x1990   :  { %v3290_v20 = vpop.permute.xlu1 %3289 }
0x1991   :  { %v3293_v44 = vpop.permute.xlu0 %3292  ;;  %v3297_v33 = vrot.slane %v3290_v20, %v10118_v42 }
0x1992   :  { %v3301_v25 = vrot.slane %v3293_v44, %v10118_v42 }
0x1994   :  { %v3302_v29 = vsel %vm1933_vm5, %v3301_v25, %v3297_v33 }
0x1995   :  { %v3304_v53 = vsel %vm1936_vm6, %v3302_v29, 0.0 }
0x1996   :  { %3305 = vadd.xlane.f32.xlu1 %v3304_v53 }
0x1a23   :  { %v3306_v55 = vpop.xlane.xlu1 %3305 }
0x1a24   :  { %7388 = vrcp.f32 %v3306_v55 }
0x1a2e   :  { %v7389_v32 = vpop.eup %7388 }
0x1a2f   :  { %v3312_v22 = vrot.slane %v7389_v32, %v8611_v50  ;;  %v3316_v12 = vrot.slane %v7389_v32, %v10054_v6 }
0x1a31   :  { %v3319_v14 = vmul.f32 %v7385_v8, %v3312_v22  ;;  %v3320_v27 = vmul.f32 %v7387_v28, %v3316_v12  ;;  %v10123_v12 = vld [vmem:[#allocation44_spill] sm:$0xff] }
0x1a33   :  { %3323 = vperm.xlu0 %7290, %v3319_v14  }
0x1a37   :  { %3328 = vperm.xlu0 %7290, %v3320_v27   ;;  %v10124_v27 = vld [vmem:[#allocation82_spill] sm:$0xff] }
0x1ab2   :  { %v3324_v10 = vpop.permute.xlu0 %3323 }
0x1ab3   :  { %v3331_v20 = vmul.f32 %v3324_v10, %v8661_v54  ;;  %v10125_v10 = vld [vmem:[#allocation45_spill] sm:$0xff] }
0x1ab5   :  { %v3333_v45 = vrot.slane %v3331_v20, 4 }
0x1ab6   :  { %v3329_v44 = vpop.permute.xlu0 %3328 }
0x1ab7   :  { %v3334_v33 = vadd.f32 %v3333_v45, %v3331_v20  ;;  %v3332_v25 = vmul.f32 %v3329_v44, %v8671_v2  ;;  %v10126_v20 = vld [vmem:[#allocation83_spill] sm:$0xff]  ;;  %v10127_v45 = vld [vmem:[#allocation46_spill] sm:$0xff]  ;;  %v10128_v44 = vld [vmem:[#allocation84_spill] sm:$0xff] }
0x1ab9   :  { %v3335_v29 = vrot.slane %v3334_v33, 2  ;;  %v3339_v53 = vrot.slane %v3332_v25, 4 }
0x1abb   :  { %v3336_v55 = vadd.f32 %v3335_v29, %v3334_v33  ;;  %v3340_v42 = vadd.f32 %v3339_v53, %v3332_v25  ;;  %v10129_v33 = vld [vmem:[#allocation47_spill] sm:$0xff]  ;;  %v10130_v25 = vld [vmem:[#allocation85_spill] sm:$0xff]  ;;  %v10131_v29 = vld [vmem:[#allocation48_spill] sm:$0xff] }
0x1abc   :  { %v10132_v53 = vld [vmem:[#allocation86_spill] sm:$0xff] }
0x1abd   :  { %v3341_v57 = vrot.slane %v3340_v42, 2  ;;  %v3337_v63 = vrot.slane %v3336_v55, 1 }
0x1abf   :  { %v3342_v8 = vadd.f32 %v3341_v57, %v3340_v42  ;;  %v3338_v32 = vadd.f32 %v3337_v63, %v3336_v55  ;;  %v10119_v57 = vld [vmem:[#allocation42_spill] sm:$0xff]  ;;  %v10120_v63 = vld [vmem:[#allocation80_spill] sm:$0xff]  ;;  %v10122_v42 = vld [vmem:[#allocation81_spill] sm:$0xff] }
0x1ac0   :  { %v10133_v55 = vld [vmem:[#allocation49_spill] sm:$0xff] }
0x1ac1   :  { %v3343_v22 = vrot.slane %v3342_v8, 1 }
0x1ac3   :  { %v3344_v14 = vadd.f32 %v3343_v22, %v3342_v8  ;;  %v10134_v8 = vld [vmem:[#allocation87_spill] sm:$0xff]  ;;  %v10135_v22 = vld [vmem:[#allocation50_spill] sm:$0xff] }
0x1ac5   :  { %v3347_v28 = vsel %vm1933_vm5, %v3344_v14, %v3338_v32  ;;  %v10136_v32 = vld [vmem:[#allocation88_spill] sm:$0xff]  ;;  %v10137_v14 = vld [vmem:[#allocation51_spill] sm:$0xff] }
0x1ac6   :  { %3555 = vmatprep.mubr.f32.mxu1 %v3347_v28  ;;  %3626 = vmatprep.mubr.f32.mxu0 %v3347_v28  ;;  %v10138_v28 = vld [vmem:[#allocation89_spill] sm:$0xff] }
0x1ac7   :  { %3556 = vmatmul.mubr.f32.vlgmr.msra.gmra.mrb[18].mxu1 %v9054_v3  ;;  %3627 = vmatmul.mubr.f32.vlgmr.msra.gmra.mrb[22].mxu0 %v9054_v3  ;;  %v10121_v3 = vld [vmem:[#allocation43_spill] sm:$0xff] }
0x1ac8   :  { %6604 = vmatpush1.bf16.msra.mxu1 %v9926_v5  ;;  %6636 = vmatpush1.bf16.msra.mxu0 %v8429_v15 }
0x1ac9   :  { %6606 = vmatprep.subr.bf16.mxu1 %v9927_v11  ;;  %6638 = vmatprep.subr.bf16.mxu0 %v8431_v0 }
0x1aca   :  { %3856 = vmatprep.mubr.f32.mxu1 %v9856_v26  ;;  %3927 = vmatprep.mubr.f32.mxu0 %v9856_v26 }
0x1acc   :  { %6608 = vmatpush1.bf16.msra.mxu1 %v9928_v37  ;;  %6640 = vmatpush1.bf16.msra.mxu0 %v9990_v13 }
0x1acd   :  { %6610 = vmatprep.subr.bf16.mxu1 %v9991_v16  ;;  %6642 = vmatprep.subr.bf16.mxu0 %v9992_v7 }
0x1ad0   :  { %6612 = vmatpush1.bf16.msra.mxu1 %v9993_v61  ;;  %6644 = vmatpush1.bf16.msra.mxu0 %v10055_v62 }
0x1ad1   :  { %6614 = vmatprep.subr.bf16.mxu1 %v10056_v35  ;;  %6646 = vmatprep.subr.bf16.mxu0 %v10057_v51 }
0x1ad4   :  { %6616 = vmatpush1.bf16.msra.mxu1 %v10119_v57  ;;  %6648 = vmatpush1.bf16.msra.mxu0 %v10120_v63 }
0x1ad5   :  { %6618 = vmatprep.subr.bf16.mxu1 %v10121_v3  ;;  %6650 = vmatprep.subr.bf16.mxu0 %v10122_v42 }
0x1ad8   :  { %6620 = vmatpush1.bf16.msra.mxu1 %v10123_v12  ;;  %6652 = vmatpush1.bf16.msra.mxu0 %v10124_v27 }
0x1ad9   :  { %6622 = vmatprep.subr.bf16.mxu1 %v10125_v10  ;;  %6654 = vmatprep.subr.bf16.mxu0 %v10126_v20 }
0x1adc   :  { %6624 = vmatpush1.bf16.msra.mxu1 %v10127_v45  ;;  %6656 = vmatpush1.bf16.msra.mxu0 %v10128_v44 }
0x1add   :  { %6626 = vmatprep.subr.bf16.mxu1 %v10129_v33  ;;  %6658 = vmatprep.subr.bf16.mxu0 %v10130_v25 }
0x1ae0   :  { %6628 = vmatpush1.bf16.msra.mxu1 %v10131_v29  ;;  %6660 = vmatpush1.bf16.msra.mxu0 %v10132_v53 }
0x1ae1   :  { %6630 = vmatprep.subr.bf16.mxu1 %v10133_v55  ;;  %6662 = vmatprep.subr.bf16.mxu0 %v10134_v8 }
0x1ae4   :  { %6632 = vmatpush1.bf16.msra.mxu1 %v10135_v22  ;;  %6664 = vmatpush1.bf16.msra.mxu0 %v10136_v32 }
0x1ae5   :  { %6666 = vmatprep.subr.bf16.mxu1 %v10137_v14  ;;  %6730 = vmatprep.subr.bf16.mxu0 %v10138_v28 }
0x1b9a   :  { %v3557_v44 = vpop.f32.mrb[18].mxu1  ;;  %v3628_v33 = vpop.f32.mrb[22].mxu0 }
0x1b9b   :  { %v3633_v25 = vadd.f32 %v3557_v44, %v8617_v1  ;;  %v3559_v45 = vpop.f32.mrb[19].mxu1  ;;  %v3630_v29 = vpop.f32.mrb[23].mxu0  ;;  %v3635_v28 = vadd.f32 %v3628_v33, %v8623_v60 }
0x1b9c   :  { %v3634_v53 = vadd.f32 %v3559_v45, %v9955_v43  ;;  %v3636_v22 = vadd.f32 %v3630_v29, %v8625_v36 }
0x1b9d   :  { %v3637_v20 = vsub.f32 0.0, %v3633_v25 }
0x1b9e   :  { %v3642_v55 = vsub.f32 0.0, %v3634_v53  ;;  %v3648_v32 = vsub.f32 0.0, %v3636_v22 }
0x1b9f   :  { %v3638_v10 = vmul.f32 1.442695, %v3637_v20 }
0x1ba0   :  { %v3643_v8 = vmul.f32 1.442695, %v3642_v55  ;;  %v3649_v14 = vmul.f32 1.442695, %v3648_v32 }
0x1ba1   :  { %7390 = vpow2.f32 %v3638_v10 }
0x1ba2   :  { %7392 = vpow2.f32 %v3643_v8 }
0x1ba3   :  { %7394 = vpow2.f32 %v3649_v14 }
0x1ba4   :  { %7396 = vtanh.f32 %v3635_v28 }
0x1bab   :  { %v7391_v27 = vpop.eup %7390 }
0x1bac   :  { %v7393_v12 = vpop.eup %7392  ;;  %v3640_v42 = vadd.f32 1.0, %v7391_v27 }
0x1bad   :  { %v3645_v44 = vadd.f32 1.0, %v7393_v12  ;;  %v7395_v45 = vpop.eup %7394 }
0x1bae   :  { %7398 = vrcp.f32 %v3640_v42  ;;  %v7397_v25 = vpop.eup %7396  ;;  %v3651_v29 = vadd.f32 1.0, %v7395_v45 }
0x1baf   :  { %7400 = vrcp.f32 %v3645_v44 }
0x1bb0   :  { %7402 = vrcp.f32 %v3651_v29  ;;  %v10143_v29 = vld [vmem:[#allocation95_spill] sm:$0xff] }
0x1bb8   :  { %v7399_v20 = vpop.eup %7398 }
0x1bb9   :  { %v7401_v53 = vpop.eup %7400  ;;  %v3654_v55 = vmul.f32 %v7399_v20, %v7397_v25  ;;  %v10139_v25 = vld [vmem:[#allocation93_spill] sm:$0xff]  ;;  %v10140_v20 = vld [vmem:[#allocation55_spill] sm:$0xff] }
0x1bba   :  { %v3653_v10 = vmul.f32 %v7401_v53, %v9051_v4  ;;  %v7403_v33 = vpop.eup %7402  ;;  %v10141_v53 = vld [vmem:[#allocation94_spill] sm:$0xff] }
0x1bbc   :  { %v9186_v8 = vadd.f32 %v3654_v55, %v3653_v10  ;;  %v10142_v55 = vld [vmem:[#allocation56_spill] sm:$0xff]  ;;  %v10144_v10 = vld [vmem:[#allocation57_spill] sm:$0xff] }
0x1bbe   :  { %7404 = vtanh.f32 %v9186_v8 }
0x1bc8   :  { %v7405_v27 = vpop.eup %7404 }
0x1bc9   :  { %v9189_v22 = vmul.f32 %v7405_v27, %v7403_v33  ;;  %v10145_v33 = vld [vmem:[#allocation96_spill] sm:$0xff]  ;;  %v10146_v27 = vld [vmem:[#allocation58_spill] sm:$0xff] }
0x1bcb   :  { %3857 = vmatmul.mubr.f32.vlgmr.msra.gmra.mrb[20].mxu1 %v9189_v22  ;;  %3928 = vmatmul.mubr.f32.vlgmr.msra.gmra.mrb[24].mxu0 %v9189_v22  ;;  %v3665_v42 = vrot.slane %v9189_v22, %v8637_v9 }
0x1bcc   :  { %6668 = vmatpush1.bf16.msra.mxu1 %v8308_v17  ;;  %6732 = vmatpush1.bf16.msra.mxu0 %v8479_v58 }
0x1bcd   :  { %v3673_v4 = vrot.slane %v3665_v42, %v8637_v9  ;;  %v3666_v12 = vcombine.high %v3665_v42, %v3665_v42  ;;  %6670 = vmatprep.subr.bf16.mxu1 %v8311_v19  ;;  %6734 = vmatprep.subr.bf16.mxu0 %v8482_v59  ;;  %v10147_v42 = vld [vmem:[#allocation97_spill] sm:$0xff] }
0x1bcf   :  { %v3684_v32 = vrot.slane %v3673_v4, %v8611_v50  ;;  %v3680_v14 = vrot.slane %v3666_v12, %v8637_v9  ;;  %v10148_v4 = vld [vmem:[#allocation59_spill] sm:$0xff]  ;;  %v10149_v12 = vld [vmem:[#allocation98_spill] sm:$0xff] }
0x1bd0   :  { %6672 = vmatpush1.bf16.msra.mxu1 %v8315_v23  ;;  %6736 = vmatpush1.bf16.msra.mxu0 %v8486_v52 }
0x1bd1   :  { %v3691_v28 = vmul.f32 %v3684_v32, %v8661_v54  ;;  %v3688_v44 = vrot.slane %v3680_v14, %v8611_v50  ;;  %6674 = vmatprep.subr.bf16.mxu1 %v8319_v24  ;;  %6738 = vmatprep.subr.bf16.mxu0 %v8490_v34  ;;  %v10150_v32 = vld [vmem:[#allocation60_spill] sm:$0xff]  ;;  %v10151_v14 = vld [vmem:[#allocation99_spill] sm:$0xff] }
0x1bd3   :  { %3693 = vadd.xlane.f32.xlu0 %v3691_v28  ;;  %v3692_v45 = vmul.f32 %v3688_v44, %v8671_v2  ;;  %v10152_v28 = vld [vmem:[#allocation62_spill] sm:$0xff]  ;;  %v10153_v44 = vld [vmem:[#allocation100_spill] sm:$0xff] }
0x1bd4   :  { %6676 = vmatpush1.bf16.msra.mxu1 %v8322_v30  ;;  %6740 = vmatpush1.bf16.msra.mxu0 %v8493_v18 }
0x1bd5   :  { %3695 = vadd.xlane.f32.xlu1 %v3692_v45  ;;  %6678 = vmatprep.subr.bf16.mxu1 %v8325_v31  ;;  %v10154_v45 = vld [vmem:[#allocation63_spill] sm:$0xff] }
0x1bd6   :  { %6742 = vmatprep.subr.bf16.mxu0 %v8496_v21 }
0x1bd8   :  { %6680 = vmatpush1.bf16.msra.mxu1 %v8328_v38  ;;  %6744 = vmatpush1.bf16.msra.mxu0 %v8499_v40 }
0x1bd9   :  { %6682 = vmatprep.subr.bf16.mxu1 %v8331_v39  ;;  %6746 = vmatprep.subr.bf16.mxu0 %v8502_v41 }
0x1bdc   :  { %6684 = vmatpush1.bf16.msra.mxu1 %v8334_v48  ;;  %6748 = vmatpush1.bf16.msra.mxu0 %v8505_v46 }
0x1bdd   :  { %6686 = vmatprep.subr.bf16.mxu1 %v8337_v49  ;;  %6750 = vmatprep.subr.bf16.mxu0 %v8508_v47 }
0x1be0   :  { %6688 = vmatpush1.bf16.msra.mxu1 %v8340_v56  ;;  %6752 = vmatpush1.bf16.msra.mxu0 %v10139_v25 }
0x1be1   :  { %6690 = vmatprep.subr.bf16.mxu1 %v10140_v20  ;;  %6754 = vmatprep.subr.bf16.mxu0 %v10141_v53 }
0x1be4   :  { %6692 = vmatpush1.bf16.msra.mxu1 %v10142_v55  ;;  %6756 = vmatpush1.bf16.msra.mxu0 %v10143_v29  ;;  %v10182_v29 = vld [vmem:[#allocation116_spill] sm:$0xff] }
0x1be5   :  { %6694 = vmatprep.subr.bf16.mxu1 %v10144_v10  ;;  %6758 = vmatprep.subr.bf16.mxu0 %v10145_v33  ;;  %v10155_v10 = vld [vmem:[#allocation101_spill] sm:$0xff]  ;;  %v10156_v33 = vld [vmem:[#allocation64_spill] sm:$0xff] }
0x1be8   :  { %6696 = vmatpush1.bf16.msra.mxu1 %v10146_v27  ;;  %6760 = vmatpush1.bf16.msra.mxu0 %v10147_v42  ;;  %v10157_v27 = vld [vmem:[#allocation102_spill] sm:$0xff]  ;;  %v10158_v42 = vld [vmem:[#allocation65_spill] sm:$0xff] }
0x1be9   :  { %6698 = vmatprep.subr.bf16.mxu1 %v10148_v4  ;;  %6762 = vmatprep.subr.bf16.mxu0 %v10149_v12  ;;  %v10159_v4 = vld [vmem:[#allocation103_spill] sm:$0xff]  ;;  %v10160_v12 = vld [vmem:[#allocation66_spill] sm:$0xff] }
0x1bec   :  { %6700 = vmatpush1.bf16.msra.mxu1 %v10150_v32  ;;  %6764 = vmatpush1.bf16.msra.mxu0 %v10151_v14  ;;  %v10161_v32 = vld [vmem:[#allocation104_spill] sm:$0xff]  ;;  %v10162_v14 = vld [vmem:[#allocation67_spill] sm:$0xff] }
0x1bed   :  { %6702 = vmatprep.subr.bf16.mxu1 %v10152_v28  ;;  %6766 = vmatprep.subr.bf16.mxu0 %v10153_v44  ;;  %v10163_v28 = vld [vmem:[#allocation105_spill] sm:$0xff]  ;;  %v10164_v44 = vld [vmem:[#allocation68_spill] sm:$0xff] }
0x1bf0   :  { %6704 = vmatpush1.bf16.msra.mxu1 %v10154_v45  ;;  %6768 = vmatpush1.bf16.msra.mxu0 %v10155_v10  ;;  %v10165_v45 = vld [vmem:[#allocation106_spill] sm:$0xff]  ;;  %v10166_v10 = vld [vmem:[#allocation69_spill] sm:$0xff] }
0x1bf1   :  { %6706 = vmatprep.subr.bf16.mxu1 %v10156_v33  ;;  %6770 = vmatprep.subr.bf16.mxu0 %v10157_v27  ;;  %v10167_v33 = vld [vmem:[#allocation107_spill] sm:$0xff]  ;;  %v10168_v27 = vld [vmem:[#allocation70_spill] sm:$0xff] }
0x1bf4   :  { %6708 = vmatpush1.bf16.msra.mxu1 %v10158_v42  ;;  %6772 = vmatpush1.bf16.msra.mxu0 %v10159_v4  ;;  %v10169_v42 = vld [vmem:[#allocation108_spill] sm:$0xff]  ;;  %v10170_v4 = vld [vmem:[#allocation71_spill] sm:$0xff] }
0x1bf5   :  { %6710 = vmatprep.subr.bf16.mxu1 %v10160_v12  ;;  %6774 = vmatprep.subr.bf16.mxu0 %v10161_v32  ;;  %v10171_v12 = vld [vmem:[#allocation109_spill] sm:$0xff]  ;;  %v10172_v32 = vld [vmem:[#allocation72_spill] sm:$0xff] }
0x1bf8   :  { %6712 = vmatpush1.bf16.msra.mxu1 %v10162_v14  ;;  %6776 = vmatpush1.bf16.msra.mxu0 %v10163_v28  ;;  %v10173_v14 = vld [vmem:[#allocation110_spill] sm:$0xff]  ;;  %v10174_v28 = vld [vmem:[#allocation73_spill] sm:$0xff] }
0x1bf9   :  { %6714 = vmatprep.subr.bf16.mxu1 %v10164_v44  ;;  %6778 = vmatprep.subr.bf16.mxu0 %v10165_v45  ;;  %v10175_v44 = vld [vmem:[#allocation111_spill] sm:$0xff]  ;;  %v10176_v45 = vld [vmem:[#allocation74_spill] sm:$0xff] }
0x1bfc   :  { %6716 = vmatpush1.bf16.msra.mxu1 %v10166_v10  ;;  %6780 = vmatpush1.bf16.msra.mxu0 %v10167_v33  ;;  %v10177_v10 = vld [vmem:[#allocation112_spill] sm:$0xff]  ;;  %v10178_v33 = vld [vmem:[#allocation75_spill] sm:$0xff] }
0x1bfd   :  { %6718 = vmatprep.subr.bf16.mxu1 %v10168_v27  ;;  %6782 = vmatprep.subr.bf16.mxu0 %v10169_v42  ;;  %v10179_v27 = vld [vmem:[#allocation113_spill] sm:$0xff]  ;;  %v10180_v42 = vld [vmem:[#allocation35_spill] sm:$0xff] }
0x1c00   :  { %6720 = vmatpush1.bf16.msra.mxu1 %v10170_v4  ;;  %6784 = vmatpush1.bf16.msra.mxu0 %v10171_v12  ;;  %v10181_v4 = vld [vmem:[#allocation61_spill] sm:$0xff] }
0x1c01   :  { %6722 = vmatprep.subr.bf16.mxu1 %v10172_v32  ;;  %6786 = vmatprep.subr.bf16.mxu0 %v10173_v14 }
0x1c04   :  { %6724 = vmatpush1.bf16.msra.mxu1 %v10174_v28  ;;  %6788 = vmatpush1.bf16.msra.mxu0 %v10175_v44 }
0x1c05   :  { %6726 = vmatprep.subr.bf16.mxu1 %v10176_v45  ;;  %6790 = vmatprep.subr.bf16.mxu0 %v10177_v10 }
0x1c08   :  { %6728 = vmatpush1.bf16.msra.mxu1 %v10178_v33  ;;  %6792 = vmatpush1.bf16.msra.mxu0 %v10179_v27 }
0x1c09   :  { %6794 = vmatprep.subr.bf16.mxu1 %v10180_v42  ;;  %6826 = vmatprep.subr.bf16.mxu0 %v10181_v4 }
0x1c60   :  { %v3694_v12 = vpop.xlane.xlu0 %3693 }
0x1c61   :  { %v3702_v14 = vrot.slane %v3694_v12, %v10182_v29 }
0x1c62   :  { %v3696_v32 = vpop.xlane.xlu1 %3695 }
0x1c63   :  { %v3706_v28 = vrot.slane %v3696_v32, %v10182_v29 }
0x1c65   :  { %v3707_v44 = vsel %vm1933_vm5, %v3706_v28, %v3702_v14 }
0x1c66   :  { %v3709_v45 = vsel %vm1936_vm6, %v3707_v44, -inf }
0x1c67   :  { %3710 = vmax.xlane.f32.xlu1 %v3709_v45 }
0x1cf4   :  { %v3711_v10 = vpop.xlane.xlu1 %3710 }
0x1cf5   :  { %v3716_v33 = vrot.slane %v3711_v10, %v8611_v50  ;;  %v3720_v27 = vrot.slane %v3711_v10, %v10054_v6 }
0x1cf7   :  { %v3723_v55 = vsub.f32 %v3694_v12, %v3716_v33  ;;  %v3724_v42 = vsub.f32 %v3696_v32, %v3720_v27 }
0x1cf9   :  { %v3725_v53 = vmul.f32 1.442695, %v3723_v55  ;;  %v3727_v4 = vmul.f32 1.442695, %v3724_v42 }
0x1cfb   :  { %7406 = vpow2.f32 %v3725_v53 }
0x1cfc   :  { %7408 = vpow2.f32 %v3727_v4 }
0x1d05   :  { %v7407_v20 = vpop.eup %7406 }
0x1d06   :  { %v7409_v25 = vpop.eup %7408  ;;  %3732 = vperm.xlu1 %7291, %v7407_v20  }
0x1d07   :  { %3735 = vperm.xlu0 %7290, %v7409_v25  }
0x1d85   :  { %v3733_v56 = vpop.permute.xlu1 %3732 }
0x1d86   :  { %v3736_v14 = vpop.permute.xlu0 %3735  ;;  %v3740_v28 = vrot.slane %v3733_v56, %v10182_v29 }
0x1d87   :  { %v3744_v44 = vrot.slane %v3736_v14, %v10182_v29 }
0x1d89   :  { %v3745_v45 = vsel %vm1933_vm5, %v3744_v44, %v3740_v28 }
0x1d8a   :  { %v3747_v10 = vsel %vm1936_vm6, %v3745_v45, 0.0 }
0x1d8b   :  { %3748 = vadd.xlane.f32.xlu1 %v3747_v10 }
0x1e18   :  { %v3749_v33 = vpop.xlane.xlu1 %3748 }
0x1e19   :  { %7410 = vrcp.f32 %v3749_v33 }
0x1e23   :  { %v7411_v55 = vpop.eup %7410 }
0x1e24   :  { %v3755_v53 = vrot.slane %v7411_v55, %v8611_v50  ;;  %v3759_v42 = vrot.slane %v7411_v55, %v10054_v6 }
0x1e26   :  { %v3762_v27 = vmul.f32 %v7407_v20, %v3755_v53  ;;  %v3763_v4 = vmul.f32 %v7409_v25, %v3759_v42  ;;  %v10187_v42 = vld [vmem:[#allocation83_spill] sm:$0xff] }
0x1e28   :  { %3766 = vperm.xlu0 %7290, %v3762_v27  }
0x1e2c   :  { %3771 = vperm.xlu0 %7290, %v3763_v4   ;;  %v10188_v4 = vld [vmem:[#allocation46_spill] sm:$0xff] }
0x1ea7   :  { %v3767_v12 = vpop.permute.xlu0 %3766 }
0x1ea8   :  { %v3774_v56 = vmul.f32 %v3767_v12, %v8661_v54  ;;  %v10189_v12 = vld [vmem:[#allocation84_spill] sm:$0xff] }
0x1eaa   :  { %v3776_v32 = vrot.slane %v3774_v56, 4 }
0x1eab   :  { %v3772_v14 = vpop.permute.xlu0 %3771 }
0x1eac   :  { %v3777_v28 = vadd.f32 %v3776_v32, %v3774_v56  ;;  %v3775_v44 = vmul.f32 %v3772_v14, %v8671_v2  ;;  %v10190_v56 = vld [vmem:[#allocation47_spill] sm:$0xff]  ;;  %v10191_v32 = vld [vmem:[#allocation85_spill] sm:$0xff]  ;;  %v10192_v14 = vld [vmem:[#allocation48_spill] sm:$0xff] }
0x1eae   :  { %v3778_v45 = vrot.slane %v3777_v28, 2  ;;  %v3782_v10 = vrot.slane %v3775_v44, 4 }
0x1eb0   :  { %v3779_v33 = vadd.f32 %v3778_v45, %v3777_v28  ;;  %v3783_v29 = vadd.f32 %v3782_v10, %v3775_v44  ;;  %v10193_v28 = vld [vmem:[#allocation86_spill] sm:$0xff]  ;;  %v10194_v44 = vld [vmem:[#allocation49_spill] sm:$0xff]  ;;  %v10195_v45 = vld [vmem:[#allocation87_spill] sm:$0xff] }
0x1eb1   :  { %v10196_v10 = vld [vmem:[#allocation50_spill] sm:$0xff] }
0x1eb2   :  { %v3784_v47 = vrot.slane %v3783_v29, 2  ;;  %v3780_v49 = vrot.slane %v3779_v33, 1 }
0x1eb4   :  { %v3785_v20 = vadd.f32 %v3784_v47, %v3783_v29  ;;  %v3781_v55 = vadd.f32 %v3780_v49, %v3779_v33  ;;  %v10183_v49 = vld [vmem:[#allocation81_spill] sm:$0xff]  ;;  %v10184_v47 = vld [vmem:[#allocation44_spill] sm:$0xff] }
0x1eb5   :  { %v10186_v29 = vld [vmem:[#allocation45_spill] sm:$0xff]  ;;  %v10197_v33 = vld [vmem:[#allocation88_spill] sm:$0xff] }
0x1eb6   :  { %v3786_v53 = vrot.slane %v3785_v20, 1 }
0x1eb8   :  { %v3787_v27 = vadd.f32 %v3786_v53, %v3785_v20  ;;  %v10198_v20 = vld [vmem:[#allocation51_spill] sm:$0xff]  ;;  %v10199_v53 = vld [vmem:[#allocation89_spill] sm:$0xff] }
0x1eba   :  { %v3790_v25 = vsel %vm1933_vm5, %v3787_v27, %v3781_v55 }
0x1ebb   :  { %3998 = vmatprep.mubr.f32.mxu1 %v3790_v25  ;;  %4069 = vmatprep.mubr.f32.mxu0 %v3790_v25 }
0x1ebc   :  { %3999 = vmatmul.mubr.f32.vlgmr.msra.gmra.mrb[20].mxu1 %v9189_v22  ;;  %4070 = vmatmul.mubr.f32.vlgmr.msra.gmra.mrb[24].mxu0 %v9189_v22  ;;  %v10185_v22 = vld [vmem:[#allocation82_spill] sm:$0xff] }
0x1ebd   :  { %6796 = vmatpush1.bf16.msra.mxu1 %v9926_v5  ;;  %6828 = vmatpush1.bf16.msra.mxu0 %v8429_v15 }
0x1ebe   :  { %6798 = vmatprep.subr.bf16.mxu1 %v9927_v11  ;;  %6830 = vmatprep.subr.bf16.mxu0 %v8431_v0 }
0x1ebf   :  { %4299 = vmatprep.mubr.f32.mxu1 %v9856_v26  ;;  %4370 = vmatprep.mubr.f32.mxu0 %v9856_v26 }
0x1ec1   :  { %6800 = vmatpush1.bf16.msra.mxu1 %v9928_v37  ;;  %6832 = vmatpush1.bf16.msra.mxu0 %v9990_v13 }
0x1ec2   :  { %6802 = vmatprep.subr.bf16.mxu1 %v9991_v16  ;;  %6834 = vmatprep.subr.bf16.mxu0 %v9992_v7 }
0x1ec5   :  { %6804 = vmatpush1.bf16.msra.mxu1 %v9993_v61  ;;  %6836 = vmatpush1.bf16.msra.mxu0 %v10055_v62 }
0x1ec6   :  { %6806 = vmatprep.subr.bf16.mxu1 %v10056_v35  ;;  %6838 = vmatprep.subr.bf16.mxu0 %v10057_v51 }
0x1ec9   :  { %6808 = vmatpush1.bf16.msra.mxu1 %v10119_v57  ;;  %6840 = vmatpush1.bf16.msra.mxu0 %v10120_v63 }
0x1eca   :  { %6810 = vmatprep.subr.bf16.mxu1 %v10121_v3  ;;  %6842 = vmatprep.subr.bf16.mxu0 %v10183_v49 }
0x1ecd   :  { %6812 = vmatpush1.bf16.msra.mxu1 %v10184_v47  ;;  %6844 = vmatpush1.bf16.msra.mxu0 %v10185_v22 }
0x1ece   :  { %6814 = vmatprep.subr.bf16.mxu1 %v10186_v29  ;;  %6846 = vmatprep.subr.bf16.mxu0 %v10187_v42 }
0x1ed1   :  { %6816 = vmatpush1.bf16.msra.mxu1 %v10188_v4  ;;  %6848 = vmatpush1.bf16.msra.mxu0 %v10189_v12 }
0x1ed2   :  { %6818 = vmatprep.subr.bf16.mxu1 %v10190_v56  ;;  %6850 = vmatprep.subr.bf16.mxu0 %v10191_v32 }
0x1ed5   :  { %6820 = vmatpush1.bf16.msra.mxu1 %v10192_v14  ;;  %6852 = vmatpush1.bf16.msra.mxu0 %v10193_v28 }
0x1ed6   :  { %6822 = vmatprep.subr.bf16.mxu1 %v10194_v44  ;;  %6854 = vmatprep.subr.bf16.mxu0 %v10195_v45 }
0x1ed9   :  { %6824 = vmatpush1.bf16.msra.mxu1 %v10196_v10  ;;  %6856 = vmatpush1.bf16.msra.mxu0 %v10197_v33 }
0x1eda   :  { %6858 = vmatprep.subr.bf16.mxu1 %v10198_v20  ;;  %6922 = vmatprep.subr.bf16.mxu0 %v10199_v53 }
0x1f8f   :  { %v4000_v55 = vpop.f32.mrb[20].mxu1  ;;  %v4071_v27 = vpop.f32.mrb[24].mxu0 }
0x1f90   :  { %v4076_v25 = vadd.f32 %v4000_v55, %v8617_v1  ;;  %v4002_v32 = vpop.f32.mrb[21].mxu1  ;;  %v4073_v14 = vpop.f32.mrb[25].mxu0  ;;  %v4078_v53 = vadd.f32 %v4071_v27, %v8623_v60 }
0x1f91   :  { %v4077_v28 = vadd.f32 %v4002_v32, %v9955_v43  ;;  %v4079_v10 = vadd.f32 %v4073_v14, %v8625_v36 }
0x1f92   :  { %v4080_v56 = vsub.f32 0.0, %v4076_v25 }
0x1f93   :  { %v4085_v44 = vsub.f32 0.0, %v4077_v28  ;;  %v4091_v33 = vsub.f32 0.0, %v4079_v10 }
0x1f94   :  { %v4081_v12 = vmul.f32 1.442695, %v4080_v56 }
0x1f95   :  { %v4086_v45 = vmul.f32 1.442695, %v4085_v44  ;;  %v4092_v20 = vmul.f32 1.442695, %v4091_v33 }
0x1f96   :  { %7412 = vpow2.f32 %v4081_v12 }
0x1f97   :  { %7414 = vpow2.f32 %v4086_v45 }
0x1f98   :  { %7416 = vpow2.f32 %v4092_v20 }
0x1f99   :  { %7418 = vtanh.f32 %v4078_v53 }
0x1fa0   :  { %v7413_v4 = vpop.eup %7412 }
0x1fa1   :  { %v7415_v42 = vpop.eup %7414  ;;  %v4083_v29 = vadd.f32 1.0, %v7413_v4 }
0x1fa2   :  { %v4088_v55 = vadd.f32 1.0, %v7415_v42  ;;  %v7417_v32 = vpop.eup %7416 }
0x1fa3   :  { %7420 = vrcp.f32 %v4083_v29  ;;  %v7419_v28 = vpop.eup %7418  ;;  %v4094_v14 = vadd.f32 1.0, %v7417_v32 }
0x1fa4   :  { %7422 = vrcp.f32 %v4088_v55 }
0x1fa5   :  { %7424 = vrcp.f32 %v4094_v14  ;;  %v10204_v14 = vld [vmem:[#allocation55_spill] sm:$0xff] }
0x1fad   :  { %v7421_v56 = vpop.eup %7420 }
0x1fae   :  { %v7423_v44 = vpop.eup %7422  ;;  %v4097_v25 = vmul.f32 %v7421_v56, %v7419_v28  ;;  %v10200_v28 = vld [vmem:[#allocation53_spill] sm:$0xff]  ;;  %v10201_v56 = vld [vmem:[#allocation92_spill] sm:$0xff] }
0x1faf   :  { %v4096_v12 = vmul.f32 %v7423_v44, %v9186_v8  ;;  %v7425_v10 = vpop.eup %7424  ;;  %v10202_v44 = vld [vmem:[#allocation54_spill] sm:$0xff] }
0x1fb1   :  { %v9321_v45 = vadd.f32 %v4097_v25, %v4096_v12  ;;  %v10203_v25 = vld [vmem:[#allocation93_spill] sm:$0xff]  ;;  %v10205_v12 = vld [vmem:[#allocation94_spill] sm:$0xff] }
0x1fb3   :  { %7426 = vtanh.f32 %v9321_v45 }
0x1fbd   :  { %v7427_v4 = vpop.eup %7426 }
0x1fbe   :  { %v9324_v33 = vmul.f32 %v7427_v4, %v7425_v10  ;;  %v10206_v10 = vld [vmem:[#allocation56_spill] sm:$0xff]  ;;  %v10207_v4 = vld [vmem:[#allocation95_spill] sm:$0xff] }
0x1fc0   :  { %4300 = vmatmul.mubr.f32.vlgmr.msra.gmra.mrb[22].mxu1 %v9324_v33  ;;  %4371 = vmatmul.mubr.f32.vlgmr.msra.gmra.mrb[26].mxu0 %v9324_v33  ;;  %v4108_v29 = vrot.slane %v9324_v33, %v8637_v9 }
0x1fc1   :  { %6860 = vmatpush1.bf16.msra.mxu1 %v8308_v17  ;;  %6924 = vmatpush1.bf16.msra.mxu0 %v8479_v58 }
0x1fc2   :  { %v4116_v8 = vrot.slane %v4108_v29, %v8637_v9  ;;  %v4109_v42 = vcombine.high %v4108_v29, %v4108_v29  ;;  %6862 = vmatprep.subr.bf16.mxu1 %v8311_v19  ;;  %6926 = vmatprep.subr.bf16.mxu0 %v8482_v59  ;;  %v10208_v29 = vld [vmem:[#allocation57_spill] sm:$0xff] }
0x1fc4   :  { %v4127_v20 = vrot.slane %v4116_v8, %v8611_v50  ;;  %v4123_v53 = vrot.slane %v4109_v42, %v8637_v9  ;;  %v10209_v8 = vld [vmem:[#allocation96_spill] sm:$0xff]  ;;  %v10210_v42 = vld [vmem:[#allocation58_spill] sm:$0xff] }
0x1fc5   :  { %6864 = vmatpush1.bf16.msra.mxu1 %v8315_v23  ;;  %6928 = vmatpush1.bf16.msra.mxu0 %v8486_v52 }
0x1fc6   :  { %v4134_v27 = vmul.f32 %v4127_v20, %v8661_v54  ;;  %v4131_v55 = vrot.slane %v4123_v53, %v8611_v50  ;;  %6866 = vmatprep.subr.bf16.mxu1 %v8319_v24  ;;  %6930 = vmatprep.subr.bf16.mxu0 %v8490_v34  ;;  %v10211_v20 = vld [vmem:[#allocation97_spill] sm:$0xff]  ;;  %v10212_v53 = vld [vmem:[#allocation59_spill] sm:$0xff] }
0x1fc8   :  { %4136 = vadd.xlane.f32.xlu0 %v4134_v27  ;;  %v4135_v32 = vmul.f32 %v4131_v55, %v8671_v2  ;;  %v10213_v27 = vld [vmem:[#allocation98_spill] sm:$0xff]  ;;  %v10214_v55 = vld [vmem:[#allocation60_spill] sm:$0xff] }
0x1fc9   :  { %6868 = vmatpush1.bf16.msra.mxu1 %v8322_v30  ;;  %6932 = vmatpush1.bf16.msra.mxu0 %v8493_v18 }
0x1fca   :  { %4138 = vadd.xlane.f32.xlu1 %v4135_v32  ;;  %6870 = vmatprep.subr.bf16.mxu1 %v8325_v31  ;;  %v10215_v32 = vld [vmem:[#allocation99_spill] sm:$0xff] }
0x1fcb   :  { %6934 = vmatprep.subr.bf16.mxu0 %v8496_v21 }
0x1fcd   :  { %6872 = vmatpush1.bf16.msra.mxu1 %v8328_v38  ;;  %6936 = vmatpush1.bf16.msra.mxu0 %v8499_v40 }
0x1fce   :  { %6874 = vmatprep.subr.bf16.mxu1 %v8331_v39  ;;  %6938 = vmatprep.subr.bf16.mxu0 %v8502_v41 }
0x1fd1   :  { %6876 = vmatpush1.bf16.msra.mxu1 %v8334_v48  ;;  %6940 = vmatpush1.bf16.msra.mxu0 %v8505_v46 }
0x1fd2   :  { %6878 = vmatprep.subr.bf16.mxu1 %v10200_v28  ;;  %6942 = vmatprep.subr.bf16.mxu0 %v10201_v56 }
0x1fd5   :  { %6880 = vmatpush1.bf16.msra.mxu1 %v10202_v44  ;;  %6944 = vmatpush1.bf16.msra.mxu0 %v10203_v25 }
0x1fd6   :  { %6882 = vmatprep.subr.bf16.mxu1 %v10204_v14  ;;  %6946 = vmatprep.subr.bf16.mxu0 %v10205_v12  ;;  %v10216_v12 = vld [vmem:[#allocation62_spill] sm:$0xff]  ;;  %v10246_v14 = vld [vmem:[#allocation116_spill] sm:$0xff] }
0x1fd9   :  { %6884 = vmatpush1.bf16.msra.mxu1 %v10206_v10  ;;  %6948 = vmatpush1.bf16.msra.mxu0 %v10207_v4  ;;  %v10217_v10 = vld [vmem:[#allocation100_spill] sm:$0xff]  ;;  %v10218_v4 = vld [vmem:[#allocation63_spill] sm:$0xff] }
0x1fda   :  { %6886 = vmatprep.subr.bf16.mxu1 %v10208_v29  ;;  %6950 = vmatprep.subr.bf16.mxu0 %v10209_v8  ;;  %v10219_v29 = vld [vmem:[#allocation101_spill] sm:$0xff]  ;;  %v10220_v8 = vld [vmem:[#allocation64_spill] sm:$0xff] }
0x1fdd   :  { %6888 = vmatpush1.bf16.msra.mxu1 %v10210_v42  ;;  %6952 = vmatpush1.bf16.msra.mxu0 %v10211_v20  ;;  %v10221_v42 = vld [vmem:[#allocation102_spill] sm:$0xff]  ;;  %v10222_v20 = vld [vmem:[#allocation65_spill] sm:$0xff] }
0x1fde   :  { %6890 = vmatprep.subr.bf16.mxu1 %v10212_v53  ;;  %6954 = vmatprep.subr.bf16.mxu0 %v10213_v27  ;;  %v10223_v53 = vld [vmem:[#allocation103_spill] sm:$0xff]  ;;  %v10224_v27 = vld [vmem:[#allocation66_spill] sm:$0xff] }
0x1fe1   :  { %6892 = vmatpush1.bf16.msra.mxu1 %v10214_v55  ;;  %6956 = vmatpush1.bf16.msra.mxu0 %v10215_v32  ;;  %v10225_v55 = vld [vmem:[#allocation104_spill] sm:$0xff]  ;;  %v10226_v32 = vld [vmem:[#allocation67_spill] sm:$0xff] }
0x1fe2   :  { %6894 = vmatprep.subr.bf16.mxu1 %v10216_v12  ;;  %6958 = vmatprep.subr.bf16.mxu0 %v10217_v10  ;;  %v10227_v12 = vld [vmem:[#allocation105_spill] sm:$0xff]  ;;  %v10228_v10 = vld [vmem:[#allocation68_spill] sm:$0xff] }
0x1fe5   :  { %6896 = vmatpush1.bf16.msra.mxu1 %v10218_v4  ;;  %6960 = vmatpush1.bf16.msra.mxu0 %v10219_v29  ;;  %v10229_v4 = vld [vmem:[#allocation106_spill] sm:$0xff]  ;;  %v10230_v29 = vld [vmem:[#allocation69_spill] sm:$0xff] }
0x1fe6   :  { %6898 = vmatprep.subr.bf16.mxu1 %v10220_v8  ;;  %6962 = vmatprep.subr.bf16.mxu0 %v10221_v42  ;;  %v10231_v8 = vld [vmem:[#allocation107_spill] sm:$0xff]  ;;  %v10232_v42 = vld [vmem:[#allocation70_spill] sm:$0xff] }
0x1fe9   :  { %6900 = vmatpush1.bf16.msra.mxu1 %v10222_v20  ;;  %6964 = vmatpush1.bf16.msra.mxu0 %v10223_v53  ;;  %v10233_v20 = vld [vmem:[#allocation108_spill] sm:$0xff]  ;;  %v10234_v53 = vld [vmem:[#allocation71_spill] sm:$0xff] }
0x1fea   :  { %6902 = vmatprep.subr.bf16.mxu1 %v10224_v27  ;;  %6966 = vmatprep.subr.bf16.mxu0 %v10225_v55  ;;  %v10235_v27 = vld [vmem:[#allocation109_spill] sm:$0xff]  ;;  %v10236_v55 = vld [vmem:[#allocation72_spill] sm:$0xff] }
0x1fed   :  { %6904 = vmatpush1.bf16.msra.mxu1 %v10226_v32  ;;  %6968 = vmatpush1.bf16.msra.mxu0 %v10227_v12  ;;  %v10237_v32 = vld [vmem:[#allocation110_spill] sm:$0xff]  ;;  %v10238_v12 = vld [vmem:[#allocation73_spill] sm:$0xff] }
0x1fee   :  { %6906 = vmatprep.subr.bf16.mxu1 %v10228_v10  ;;  %6970 = vmatprep.subr.bf16.mxu0 %v10229_v4  ;;  %v10239_v10 = vld [vmem:[#allocation111_spill] sm:$0xff]  ;;  %v10240_v4 = vld [vmem:[#allocation74_spill] sm:$0xff] }
0x1ff1   :  { %6908 = vmatpush1.bf16.msra.mxu1 %v10230_v29  ;;  %6972 = vmatpush1.bf16.msra.mxu0 %v10231_v8  ;;  %v10241_v29 = vld [vmem:[#allocation112_spill] sm:$0xff]  ;;  %v10242_v8 = vld [vmem:[#allocation75_spill] sm:$0xff] }
0x1ff2   :  { %6910 = vmatprep.subr.bf16.mxu1 %v10232_v42  ;;  %6974 = vmatprep.subr.bf16.mxu0 %v10233_v20  ;;  %v10243_v42 = vld [vmem:[#allocation113_spill] sm:$0xff]  ;;  %v10244_v20 = vld [vmem:[#allocation35_spill] sm:$0xff] }
0x1ff5   :  { %6912 = vmatpush1.bf16.msra.mxu1 %v10234_v53  ;;  %6976 = vmatpush1.bf16.msra.mxu0 %v10235_v27  ;;  %v10245_v53 = vld [vmem:[#allocation61_spill] sm:$0xff] }
0x1ff6   :  { %6914 = vmatprep.subr.bf16.mxu1 %v10236_v55  ;;  %6978 = vmatprep.subr.bf16.mxu0 %v10237_v32 }
0x1ff9   :  { %6916 = vmatpush1.bf16.msra.mxu1 %v10238_v12  ;;  %6980 = vmatpush1.bf16.msra.mxu0 %v10239_v10 }
0x1ffa   :  { %6918 = vmatprep.subr.bf16.mxu1 %v10240_v4  ;;  %6982 = vmatprep.subr.bf16.mxu0 %v10241_v29 }
0x1ffd   :  { %6920 = vmatpush1.bf16.msra.mxu1 %v10242_v8  ;;  %6984 = vmatpush1.bf16.msra.mxu0 %v10243_v42 }
0x1ffe   :  { %6986 = vmatprep.subr.bf16.mxu1 %v10244_v20  ;;  %7018 = vmatprep.subr.bf16.mxu0 %v10245_v53 }
0x2055   :  { %v4137_v27 = vpop.xlane.xlu0 %4136 }
0x2056   :  { %v4145_v32 = vrot.slane %v4137_v27, %v10246_v14 }
0x2057   :  { %v4139_v55 = vpop.xlane.xlu1 %4138 }
0x2058   :  { %v4149_v12 = vrot.slane %v4139_v55, %v10246_v14 }
0x205a   :  { %v4150_v10 = vsel %vm1933_vm5, %v4149_v12, %v4145_v32 }
0x205b   :  { %v4152_v4 = vsel %vm1936_vm6, %v4150_v10, -inf }
0x205c   :  { %4153 = vmax.xlane.f32.xlu1 %v4152_v4 }
0x20e9   :  { %v4154_v29 = vpop.xlane.xlu1 %4153 }
0x20ea   :  { %v4159_v8 = vrot.slane %v4154_v29, %v8611_v50  ;;  %v4163_v42 = vrot.slane %v4154_v29, %v10054_v6 }
0x20ec   :  { %v4166_v25 = vsub.f32 %v4137_v27, %v4159_v8  ;;  %v4167_v20 = vsub.f32 %v4139_v55, %v4163_v42 }
0x20ee   :  { %v4168_v44 = vmul.f32 1.442695, %v4166_v25  ;;  %v4170_v53 = vmul.f32 1.442695, %v4167_v20 }
0x20f0   :  { %7428 = vpow2.f32 %v4168_v44 }
0x20f1   :  { %7430 = vpow2.f32 %v4170_v53 }
0x20fa   :  { %v7429_v56 = vpop.eup %7428 }
0x20fb   :  { %v7431_v28 = vpop.eup %7430  ;;  %4175 = vperm.xlu1 %7291, %v7429_v56  }
0x20fc   :  { %4178 = vperm.xlu0 %7290, %v7431_v28  }
0x217a   :  { %v4176_v46 = vpop.permute.xlu1 %4175 }
0x217b   :  { %v4179_v12 = vpop.permute.xlu0 %4178  ;;  %v4183_v10 = vrot.slane %v4176_v46, %v10246_v14 }
0x217c   :  { %v4187_v4 = vrot.slane %v4179_v12, %v10246_v14 }
0x217e   :  { %v4188_v32 = vsel %vm1933_vm5, %v4187_v4, %v4183_v10 }
0x217f   :  { %v4190_v29 = vsel %vm1936_vm6, %v4188_v32, 0.0 }
0x2180   :  { %4191 = vadd.xlane.f32.xlu1 %v4190_v29 }
0x220d   :  { %v4192_v8 = vpop.xlane.xlu1 %4191 }
0x220e   :  { %7432 = vrcp.f32 %v4192_v8 }
0x2218   :  { %v7433_v25 = vpop.eup %7432 }
0x2219   :  { %v4198_v44 = vrot.slane %v7433_v25, %v8611_v50  ;;  %v4202_v27 = vrot.slane %v7433_v25, %v10054_v6 }
0x221b   :  { %v4205_v42 = vmul.f32 %v7429_v56, %v4198_v44  ;;  %v4206_v55 = vmul.f32 %v7431_v28, %v4202_v27 }
0x221d   :  { %4209 = vperm.xlu0 %7290, %v4205_v42  }
0x2221   :  { %4214 = vperm.xlu0 %7290, %v4206_v55  }
0x229c   :  { %v4210_v20 = vpop.permute.xlu0 %4209 }
0x229d   :  { %v4217_v46 = vmul.f32 %v4210_v20, %v8661_v54 }
0x229f   :  { %v4219_v53 = vrot.slane %v4217_v46, 4 }
0x22a0   :  { %v4215_v12 = vpop.permute.xlu0 %4214 }
0x22a1   :  { %v4220_v10 = vadd.f32 %v4219_v53, %v4217_v46  ;;  %v4218_v4 = vmul.f32 %v4215_v12, %v8671_v2 }
0x22a3   :  { %v4221_v32 = vrot.slane %v4220_v10, 2  ;;  %v4225_v29 = vrot.slane %v4218_v4, 4 }
0x22a5   :  { %v4222_v8 = vadd.f32 %v4221_v32, %v4220_v10  ;;  %v4226_v14 = vadd.f32 %v4225_v29, %v4218_v4 }
0x22a7   :  { %v4227_v48 = vrot.slane %v4226_v14, 2  ;;  %v4223_v41 = vrot.slane %v4222_v8, 1 }
0x22a9   :  { %v4228_v56 = vadd.f32 %v4227_v48, %v4226_v14  ;;  %v4224_v25 = vadd.f32 %v4223_v41, %v4222_v8  ;;  %v10248_v48 = vld [vmem:[#allocation83_spill] sm:$0xff]  ;;  %v10250_v41 = vld [vmem:[#allocation84_spill] sm:$0xff] }
0x22ab   :  { %v4229_v44 = vrot.slane %v4228_v56, 1 }
0x22ad   :  { %v4230_v42 = vadd.f32 %v4229_v44, %v4228_v56 }
0x22af   :  { %v4233_v28 = vsel %vm1933_vm5, %v4230_v42, %v4224_v25 }
0x22b0   :  { %4441 = vmatprep.mubr.f32.mxu1 %v4233_v28  ;;  %4512 = vmatprep.mubr.f32.mxu0 %v4233_v28 }
0x22b1   :  { %4442 = vmatmul.mubr.f32.vlgmr.msra.gmra.mrb[22].mxu1 %v9324_v33  ;;  %4513 = vmatmul.mubr.f32.vlgmr.msra.gmra.mrb[26].mxu0 %v9324_v33 }
0x22b2   :  { %6988 = vmatpush1.bf16.msra.mxu1 %v9926_v5  ;;  %7020 = vmatpush1.bf16.msra.mxu0 %v8429_v15  ;;  %v10249_v15 = vld [vmem:[#allocation46_spill] sm:$0xff]  ;;  %v10251_v5 = vld [vmem:[#allocation47_spill] sm:$0xff] }
0x22b3   :  { %6990 = vmatprep.subr.bf16.mxu1 %v9927_v11  ;;  %7022 = vmatprep.subr.bf16.mxu0 %v8431_v0  ;;  %v10247_v0 = vld [vmem:[#allocation45_spill] sm:$0xff] }
0x22b4   :  { %4742 = vmatprep.mubr.f32.mxu1 %v9856_v26  ;;  %4813 = vmatprep.mubr.f32.mxu0 %v9856_v26  ;;  %v10252_v11 = vld [vmem:[#allocation85_spill] sm:$0xff] }
0x22b6   :  { %6992 = vmatpush1.bf16.msra.mxu1 %v9928_v37  ;;  %7024 = vmatpush1.bf16.msra.mxu0 %v9990_v13  ;;  %v10253_v37 = vld [vmem:[#allocation48_spill] sm:$0xff]  ;;  %v10254_v13 = vld [vmem:[#allocation86_spill] sm:$0xff] }
0x22b7   :  { %6994 = vmatprep.subr.bf16.mxu1 %v9991_v16  ;;  %7026 = vmatprep.subr.bf16.mxu0 %v9992_v7  ;;  %v10255_v16 = vld [vmem:[#allocation49_spill] sm:$0xff]  ;;  %v10256_v7 = vld [vmem:[#allocation87_spill] sm:$0xff] }
0x22ba   :  { %6996 = vmatpush1.bf16.msra.mxu1 %v9993_v61  ;;  %7028 = vmatpush1.bf16.msra.mxu0 %v10055_v62  ;;  %v10257_v61 = vld [vmem:[#allocation50_spill] sm:$0xff]  ;;  %v10258_v62 = vld [vmem:[#allocation88_spill] sm:$0xff] }
0x22bb   :  { %6998 = vmatprep.subr.bf16.mxu1 %v10056_v35  ;;  %7030 = vmatprep.subr.bf16.mxu0 %v10057_v51  ;;  %v10259_v35 = vld [vmem:[#allocation51_spill] sm:$0xff]  ;;  %v10260_v51 = vld [vmem:[#allocation89_spill] sm:$0xff] }
0x22be   :  { %7000 = vmatpush1.bf16.msra.mxu1 %v10119_v57  ;;  %7032 = vmatpush1.bf16.msra.mxu0 %v10120_v63 }
0x22bf   :  { %7002 = vmatprep.subr.bf16.mxu1 %v10121_v3  ;;  %7034 = vmatprep.subr.bf16.mxu0 %v10183_v49 }
0x22c2   :  { %7004 = vmatpush1.bf16.msra.mxu1 %v10184_v47  ;;  %7036 = vmatpush1.bf16.msra.mxu0 %v10185_v22 }
0x22c3   :  { %7006 = vmatprep.subr.bf16.mxu1 %v10247_v0  ;;  %7038 = vmatprep.subr.bf16.mxu0 %v10248_v48 }
0x22c6   :  { %7008 = vmatpush1.bf16.msra.mxu1 %v10249_v15  ;;  %7040 = vmatpush1.bf16.msra.mxu0 %v10250_v41 }
0x22c7   :  { %7010 = vmatprep.subr.bf16.mxu1 %v10251_v5  ;;  %7042 = vmatprep.subr.bf16.mxu0 %v10252_v11 }
0x22ca   :  { %7012 = vmatpush1.bf16.msra.mxu1 %v10253_v37  ;;  %7044 = vmatpush1.bf16.msra.mxu0 %v10254_v13 }
0x22cb   :  { %7014 = vmatprep.subr.bf16.mxu1 %v10255_v16  ;;  %7046 = vmatprep.subr.bf16.mxu0 %v10256_v7 }
0x22ce   :  { %7016 = vmatpush1.bf16.msra.mxu1 %v10257_v61  ;;  %7048 = vmatpush1.bf16.msra.mxu0 %v10258_v62  ;;  %v10274_v61 = vld [vmem:[#allocation58_spill] sm:$0xff]  ;;  %v10275_v62 = vld [vmem:[#allocation97_spill] sm:$0xff] }
0x22cf   :  { %7050 = vmatprep.subr.bf16.mxu1 %v10259_v35  ;;  %7114 = vmatprep.subr.bf16.mxu0 %v10260_v51  ;;  %v10276_v35 = vld [vmem:[#allocation59_spill] sm:$0xff]  ;;  %v10277_v51 = vld [vmem:[#allocation98_spill] sm:$0xff] }
0x2384   :  { %v4443_v57 = vpop.f32.mrb[22].mxu1  ;;  %v4514_v63 = vpop.f32.mrb[26].mxu0 }
0x2385   :  { %v4519_v3 = vadd.f32 %v4443_v57, %v8617_v1  ;;  %v4445_v49 = vpop.f32.mrb[23].mxu1  ;;  %v4516_v47 = vpop.f32.mrb[27].mxu0  ;;  %v4521_v12 = vadd.f32 %v4514_v63, %v8623_v60  ;;  %v10278_v57 = vld [vmem:[#allocation60_spill] sm:$0xff]  ;;  %v10279_v63 = vld [vmem:[#allocation99_spill] sm:$0xff] }
0x2386   :  { %v4520_v22 = vadd.f32 %v4445_v49, %v9955_v43  ;;  %v4522_v20 = vadd.f32 %v4516_v47, %v8625_v36  ;;  %v10281_v49 = vld [vmem:[#allocation100_spill] sm:$0xff]  ;;  %v10282_v47 = vld [vmem:[#allocation63_spill] sm:$0xff] }
0x2387   :  { %v4523_v33 = vsub.f32 0.0, %v4519_v3  ;;  %v10280_v3 = vld [vmem:[#allocation62_spill] sm:$0xff] }
0x2388   :  { %v4528_v14 = vsub.f32 0.0, %v4520_v22  ;;  %v4534_v46 = vsub.f32 0.0, %v4522_v20  ;;  %v10283_v22 = vld [vmem:[#allocation101_spill] sm:$0xff]  ;;  %v10288_v20 = vld [vmem:[#allocation66_spill] sm:$0xff] }
0x2389   :  { %v4524_v27 = vmul.f32 1.442695, %v4523_v33  ;;  %v10284_v33 = vld [vmem:[#allocation64_spill] sm:$0xff] }
0x238a   :  { %v4529_v55 = vmul.f32 1.442695, %v4528_v14  ;;  %v4535_v53 = vmul.f32 1.442695, %v4534_v46  ;;  %v10285_v14 = vld [vmem:[#allocation102_spill] sm:$0xff]  ;;  %v10289_v46 = vld [vmem:[#allocation104_spill] sm:$0xff] }
0x238b   :  { %7434 = vpow2.f32 %v4524_v27  ;;  %v10286_v27 = vld [vmem:[#allocation65_spill] sm:$0xff] }
0x238c   :  { %7436 = vpow2.f32 %v4529_v55  ;;  %v10287_v55 = vld [vmem:[#allocation103_spill] sm:$0xff] }
0x238d   :  { %7438 = vpow2.f32 %v4535_v53  ;;  %v10290_v53 = vld [vmem:[#allocation67_spill] sm:$0xff] }
0x238e   :  { %7440 = vtanh.f32 %v4521_v12  ;;  %v10291_v12 = vld [vmem:[#allocation105_spill] sm:$0xff] }
0x2395   :  { %v7435_v10 = vpop.eup %7434 }
0x2396   :  { %v7437_v4 = vpop.eup %7436  ;;  %v4526_v32 = vadd.f32 1.0, %v7435_v10  ;;  %v10292_v10 = vld [vmem:[#allocation68_spill] sm:$0xff] }
0x2397   :  { %v4531_v29 = vadd.f32 1.0, %v7437_v4  ;;  %v7439_v8 = vpop.eup %7438  ;;  %v10293_v4 = vld [vmem:[#allocation106_spill] sm:$0xff] }
0x2398   :  { %7442 = vrcp.f32 %v4526_v32  ;;  %v7441_v56 = vpop.eup %7440  ;;  %v4537_v28 = vadd.f32 1.0, %v7439_v8  ;;  %v10294_v32 = vld [vmem:[#allocation69_spill] sm:$0xff]  ;;  %v10296_v8 = vld [vmem:[#allocation70_spill] sm:$0xff] }
0x2399   :  { %7444 = vrcp.f32 %v4531_v29  ;;  %v10295_v29 = vld [vmem:[#allocation107_spill] sm:$0xff] }
0x239a   :  { %7446 = vrcp.f32 %v4537_v28  ;;  %v10301_v28 = vld [vmem:[#allocation110_spill] sm:$0xff] }
0x23a2   :  { %v7443_v44 = vpop.eup %7442 }
0x23a3   :  { %v7445_v25 = vpop.eup %7444  ;;  %v4540_v42 = vmul.f32 %v7443_v44, %v7441_v56  ;;  %v10297_v56 = vld [vmem:[#allocation108_spill] sm:$0xff]  ;;  %v10298_v44 = vld [vmem:[#allocation71_spill] sm:$0xff] }
0x23a4   :  { %v4539_v0 = vmul.f32 %v7445_v25, %v9321_v45  ;;  %v7447_v15 = vpop.eup %7446  ;;  %v10299_v25 = vld [vmem:[#allocation109_spill] sm:$0xff] }
0x23a6   :  { %v9456_v48 = vadd.f32 %v4540_v42, %v4539_v0  ;;  %v10300_v42 = vld [vmem:[#allocation72_spill] sm:$0xff]  ;;  %v10302_v0 = vld [vmem:[#allocation73_spill] sm:$0xff] }
0x23a8   :  { %7448 = vtanh.f32 %v9456_v48 }
0x23b2   :  { %v7449_v41 = vpop.eup %7448 }
0x23b3   :  { %v9459_v5 = vmul.f32 %v7449_v41, %v7447_v15  ;;  %v10303_v15 = vld [vmem:[#allocation111_spill] sm:$0xff]  ;;  %v10304_v41 = vld [vmem:[#allocation74_spill] sm:$0xff] }
0x23b5   :  { %4743 = vmatmul.mubr.f32.vlgmr.msra.gmra.mrb[24].mxu1 %v9459_v5  ;;  %4814 = vmatmul.mubr.f32.vlgmr.msra.gmra.mrb[28].mxu0 %v9459_v5  ;;  %v4551_v11 = vrot.slane %v9459_v5, %v8637_v9 }
0x23b6   :  { %7052 = vmatpush1.bf16.msra.mxu1 %v8308_v17  ;;  %7116 = vmatpush1.bf16.msra.mxu0 %v8479_v58  ;;  %v10263_v58 = vld [vmem:[#allocation91_spill] sm:$0xff] }
0x23b7   :  { %v4559_v45 = vrot.slane %v4551_v11, %v8637_v9  ;;  %v4552_v37 = vcombine.high %v4551_v11, %v4551_v11  ;;  %7054 = vmatprep.subr.bf16.mxu1 %v8311_v19  ;;  %7118 = vmatprep.subr.bf16.mxu0 %v8482_v59  ;;  %v10266_v59 = vld [vmem:[#allocation54_spill] sm:$0xff]  ;;  %v10305_v11 = vld [vmem:[#allocation112_spill] sm:$0xff] }
0x23b9   :  { %v4570_v13 = vrot.slane %v4559_v45, %v8611_v50  ;;  %v4566_v16 = vrot.slane %v4552_v37, %v8637_v9  ;;  %v10306_v45 = vld [vmem:[#allocation75_spill] sm:$0xff]  ;;  %v10307_v37 = vld [vmem:[#allocation113_spill] sm:$0xff] }
0x23ba   :  { %7056 = vmatpush1.bf16.msra.mxu1 %v8315_v23  ;;  %7120 = vmatpush1.bf16.msra.mxu0 %v8486_v52  ;;  %v10261_v23 = vld [vmem:[#allocation90_spill] sm:$0xff]  ;;  %v10270_v52 = vld [vmem:[#allocation56_spill] sm:$0xff] }
0x23bb   :  { %v4577_v7 = vmul.f32 %v4570_v13, %v8661_v54  ;;  %v4574_v17 = vrot.slane %v4566_v16, %v8611_v50  ;;  %7058 = vmatprep.subr.bf16.mxu1 %v8319_v24  ;;  %7122 = vmatprep.subr.bf16.mxu0 %v8490_v34  ;;  %v10262_v24 = vld [vmem:[#allocation52_spill] sm:$0xff]  ;;  %v10272_v34 = vld [vmem:[#allocation57_spill] sm:$0xff] }
0x23bd   :  { %4579 = vadd.xlane.f32.xlu0 %v4577_v7  ;;  %v4578_v19 = vmul.f32 %v4574_v17, %v8671_v2  ;;  %v10308_v7 = vld [vmem:[#allocation116_spill] sm:$0xff] }
0x23be   :  { %7060 = vmatpush1.bf16.msra.mxu1 %v8322_v30  ;;  %7124 = vmatpush1.bf16.msra.mxu0 %v8493_v18  ;;  %v10264_v30 = vld [vmem:[#allocation53_spill] sm:$0xff]  ;;  %v10265_v18 = vld [vmem:[#allocation92_spill] sm:$0xff] }
0x23bf   :  { %4581 = vadd.xlane.f32.xlu1 %v4578_v19  ;;  %7062 = vmatprep.subr.bf16.mxu1 %v8325_v31  ;;  %v10267_v31 = vld [vmem:[#allocation93_spill] sm:$0xff] }
0x23c0   :  { %7126 = vmatprep.subr.bf16.mxu0 %v8496_v21  ;;  %v10268_v21 = vld [vmem:[#allocation55_spill] sm:$0xff] }
0x23c2   :  { %7064 = vmatpush1.bf16.msra.mxu1 %v8328_v38  ;;  %7128 = vmatpush1.bf16.msra.mxu0 %v8499_v40  ;;  %v10269_v38 = vld [vmem:[#allocation94_spill] sm:$0xff]  ;;  %v10273_v40 = vld [vmem:[#allocation96_spill] sm:$0xff] }
0x23c3   :  { %7066 = vmatprep.subr.bf16.mxu1 %v8331_v39  ;;  %7130 = vmatprep.subr.bf16.mxu0 %v10261_v23  ;;  %v10271_v39 = vld [vmem:[#allocation95_spill] sm:$0xff] }
0x23c6   :  { %7068 = vmatpush1.bf16.msra.mxu1 %v10262_v24  ;;  %7132 = vmatpush1.bf16.msra.mxu0 %v10263_v58 }
0x23c7   :  { %7070 = vmatprep.subr.bf16.mxu1 %v10264_v30  ;;  %7134 = vmatprep.subr.bf16.mxu0 %v10265_v18 }
0x23ca   :  { %7072 = vmatpush1.bf16.msra.mxu1 %v10266_v59  ;;  %7136 = vmatpush1.bf16.msra.mxu0 %v10267_v31 }
0x23cb   :  { %7074 = vmatprep.subr.bf16.mxu1 %v10268_v21  ;;  %7138 = vmatprep.subr.bf16.mxu0 %v10269_v38 }
0x23ce   :  { %7076 = vmatpush1.bf16.msra.mxu1 %v10270_v52  ;;  %7140 = vmatpush1.bf16.msra.mxu0 %v10271_v39 }
0x23cf   :  { %7078 = vmatprep.subr.bf16.mxu1 %v10272_v34  ;;  %7142 = vmatprep.subr.bf16.mxu0 %v10273_v40 }
0x23d2   :  { %7080 = vmatpush1.bf16.msra.mxu1 %v10274_v61  ;;  %7144 = vmatpush1.bf16.msra.mxu0 %v10275_v62 }
0x23d3   :  { %7082 = vmatprep.subr.bf16.mxu1 %v10276_v35  ;;  %7146 = vmatprep.subr.bf16.mxu0 %v10277_v51 }
0x23d6   :  { %7084 = vmatpush1.bf16.msra.mxu1 %v10278_v57  ;;  %7148 = vmatpush1.bf16.msra.mxu0 %v10279_v63 }
0x23d7   :  { %7086 = vmatprep.subr.bf16.mxu1 %v10280_v3  ;;  %7150 = vmatprep.subr.bf16.mxu0 %v10281_v49 }
0x23da   :  { %7088 = vmatpush1.bf16.msra.mxu1 %v10282_v47  ;;  %7152 = vmatpush1.bf16.msra.mxu0 %v10283_v22 }
0x23db   :  { %7090 = vmatprep.subr.bf16.mxu1 %v10284_v33  ;;  %7154 = vmatprep.subr.bf16.mxu0 %v10285_v14 }
0x23de   :  { %7092 = vmatpush1.bf16.msra.mxu1 %v10286_v27  ;;  %7156 = vmatpush1.bf16.msra.mxu0 %v10287_v55 }
0x23df   :  { %7094 = vmatprep.subr.bf16.mxu1 %v10288_v20  ;;  %7158 = vmatprep.subr.bf16.mxu0 %v10289_v46 }
0x23e2   :  { %7096 = vmatpush1.bf16.msra.mxu1 %v10290_v53  ;;  %7160 = vmatpush1.bf16.msra.mxu0 %v10291_v12 }
0x23e3   :  { %7098 = vmatprep.subr.bf16.mxu1 %v10292_v10  ;;  %7162 = vmatprep.subr.bf16.mxu0 %v10293_v4 }
0x23e6   :  { %7100 = vmatpush1.bf16.msra.mxu1 %v10294_v32  ;;  %7164 = vmatpush1.bf16.msra.mxu0 %v10295_v29 }
0x23e7   :  { %7102 = vmatprep.subr.bf16.mxu1 %v10296_v8  ;;  %7166 = vmatprep.subr.bf16.mxu0 %v10297_v56 }
0x23ea   :  { %7104 = vmatpush1.bf16.msra.mxu1 %v10298_v44  ;;  %7168 = vmatpush1.bf16.msra.mxu0 %v10299_v25 }
0x23eb   :  { %7106 = vmatprep.subr.bf16.mxu1 %v10300_v42  ;;  %7170 = vmatprep.subr.bf16.mxu0 %v10301_v28 }
0x23ee   :  { %7108 = vmatpush1.bf16.msra.mxu1 %v10302_v0  ;;  %7172 = vmatpush1.bf16.msra.mxu0 %v10303_v15 }
0x23ef   :  { %7110 = vmatprep.subr.bf16.mxu1 %v10304_v41  ;;  %7174 = vmatprep.subr.bf16.mxu0 %v10305_v11 }
0x23f2   :  { %7112 = vmatpush1.bf16.msra.mxu1 %v10306_v45  ;;  %7176 = vmatpush1.bf16.msra.mxu0 %v10307_v37 }
0x244a   :  { %v4580_v13 = vpop.xlane.xlu0 %4579 }
0x244b   :  { %v4588_v17 = vrot.slane %v4580_v13, %v10308_v7 }
0x244c   :  { %v4582_v16 = vpop.xlane.xlu1 %4581 }
0x244d   :  { %v4592_v19 = vrot.slane %v4582_v16, %v10308_v7 }
0x244f   :  { %v4593_v23 = vsel %vm1933_vm5, %v4592_v19, %v4588_v17 }
0x2450   :  { %v4595_v24 = vsel %vm1936_vm6, %v4593_v23, -inf }
0x2451   :  { %4596 = vmax.xlane.f32.xlu1 %v4595_v24 }
0x24de   :  { %v4597_v58 = vpop.xlane.xlu1 %4596 }
0x24df   :  { %v4602_v30 = vrot.slane %v4597_v58, %v8611_v50  ;;  %v4606_v18 = vrot.slane %v4597_v58, %v10054_v6 }
0x24e1   :  { %v4609_v59 = vsub.f32 %v4580_v13, %v4602_v30  ;;  %v4610_v31 = vsub.f32 %v4582_v16, %v4606_v18 }
0x24e3   :  { %v4611_v21 = vmul.f32 1.442695, %v4609_v59  ;;  %v4613_v38 = vmul.f32 1.442695, %v4610_v31 }
0x24e5   :  { %7450 = vpow2.f32 %v4611_v21 }
0x24e6   :  { %7452 = vpow2.f32 %v4613_v38 }
0x24ef   :  { %v7451_v52 = vpop.eup %7450 }
0x24f0   :  { %v7453_v39 = vpop.eup %7452  ;;  %4618 = vperm.xlu1 %7291, %v7451_v52  }
0x24f1   :  { %4621 = vperm.xlu0 %7290, %v7453_v39  }
0x256f   :  { %v4619_v34 = vpop.permute.xlu1 %4618 }
0x2570   :  { %v4622_v40 = vpop.permute.xlu0 %4621  ;;  %v4626_v61 = vrot.slane %v4619_v34, %v10308_v7 }
0x2571   :  { %v4630_v62 = vrot.slane %v4622_v40, %v10308_v7 }
0x2573   :  { %v4631_v35 = vsel %vm1933_vm5, %v4630_v62, %v4626_v61 }
0x2574   :  { %v4633_v51 = vsel %vm1936_vm6, %v4631_v35, 0.0 }
0x2575   :  { %4634 = vadd.xlane.f32.xlu1 %v4633_v51 }
0x2602   :  { %v4635_v57 = vpop.xlane.xlu1 %4634 }
0x2603   :  { %7454 = vrcp.f32 %v4635_v57 }
0x260d   :  { %v7455_v63 = vpop.eup %7454 }
0x260e   :  { %v4641_v3 = vrot.slane %v7455_v63, %v8611_v50  ;;  %v4645_v47 = vrot.slane %v7455_v63, %v10054_v6 }
0x2610   :  { %v4648_v49 = vmul.f32 %v7451_v52, %v4641_v3  ;;  %v4649_v22 = vmul.f32 %v7453_v39, %v4645_v47 }
0x2612   :  { %4652 = vperm.xlu0 %7290, %v4648_v49  }
0x2616   :  { %4657 = vperm.xlu0 %7290, %v4649_v22  }
0x2691   :  { %v4653_v33 = vpop.permute.xlu0 %4652 }
0x2692   :  { %v4660_v14 = vmul.f32 %v4653_v33, %v8661_v54 }
0x2694   :  { %v4662_v27 = vrot.slane %v4660_v14, 4 }
0x2695   :  { %v4658_v55 = vpop.permute.xlu0 %4657 }
0x2696   :  { %v4663_v20 = vadd.f32 %v4662_v27, %v4660_v14  ;;  %v4661_v46 = vmul.f32 %v4658_v55, %v8671_v2 }
0x2698   :  { %v4664_v53 = vrot.slane %v4663_v20, 2  ;;  %v4668_v12 = vrot.slane %v4661_v46, 4 }
0x269a   :  { %v4665_v10 = vadd.f32 %v4664_v53, %v4663_v20  ;;  %v4669_v4 = vadd.f32 %v4668_v12, %v4661_v46 }
0x269c   :  { %v4670_v32 = vrot.slane %v4669_v4, 2  ;;  %v4666_v29 = vrot.slane %v4665_v10, 1 }
0x269e   :  { %v4671_v8 = vadd.f32 %v4670_v32, %v4669_v4  ;;  %v4667_v44 = vadd.f32 %v4666_v29, %v4665_v10 }
0x26a0   :  { %v4672_v56 = vrot.slane %v4671_v8, 1 }
0x26a2   :  { %v4673_v25 = vadd.f32 %v4672_v56, %v4671_v8 }
0x26a4   :  { %v4676_v42 = vsel %vm1933_vm5, %v4673_v25, %v4667_v44 }
0x26a5   :  { %4884 = vmatprep.mubr.f32.mxu1 %v4676_v42  ;;  %4955 = vmatprep.mubr.f32.mxu0 %v4676_v42  ;;  %v5137_v42 = vld [vmem:[#allocation22 + $0x80] sm:$0xff] }
0x26a6   :  { %4885 = vmatmul.mubr.f32.vlgmr.msra.gmra.mrb[24].mxu1 %v9459_v5  ;;  %4956 = vmatmul.mubr.f32.vlgmr.msra.gmra.mrb[28].mxu0 %v9459_v5 }
0x26a7   :  { %5594 = vmatprep.mubr.msk.f32.mxu0 %vm7845_vm0, %v9856_v26 }
0x2779   :  { %v4886_v28 = vpop.f32.mrb[24].mxu1  ;;  %v4957_v0 = vpop.f32.mrb[28].mxu0 }
0x277a   :  { %v4962_v15 = vadd.f32 %v4886_v28, %v8617_v1  ;;  %v4888_v41 = vpop.f32.mrb[25].mxu1  ;;  %v4959_v11 = vpop.f32.mrb[29].mxu0  ;;  %v4964_v26 = vadd.f32 %v4957_v0, %v8623_v60  ;;  %v5138_v28 = vld [vmem:[#allocation22 + $0x88] sm:$0xff]  ;;  %v5121_v0 = vld [vmem:[#allocation22] sm:$0xff] }
0x277b   :  { %v4963_v45 = vadd.f32 %v4888_v41, %v9955_v43  ;;  %v4965_v19 = vadd.f32 %v4959_v11, %v8625_v36  ;;  %v5122_v41 = vld [vmem:[#allocation22 + $0x8] sm:$0xff]  ;;  %v5139_v11 = vld [vmem:[#allocation22 + $0x90] sm:$0xff] }
0x277c   :  { %v4966_v37 = vsub.f32 0.0, %v4962_v15  ;;  %v7177_v15 = vpack.c.bf16 %v5138_v28, %v5137_v42  ;;  %v5234_v42 = vld [vmem:[#allocation23 + $0x20] sm:$0xff]  ;;  %v5235_v28 = vld [vmem:[#allocation23 + $0x28] sm:$0xff] }
0x277d   :  { %v4971_v13 = vsub.f32 0.0, %v4963_v45  ;;  %v4977_v5 = vsub.f32 0.0, %v4965_v19  ;;  %v5140_v45 = vld [vmem:[#allocation22 + $0x98] sm:$0xff]  ;;  %v5141_v19 = vld [vmem:[#allocation22 + $0xa0] sm:$0xff] }
0x277e   :  { %v4967_v16 = vmul.f32 1.442695, %v4966_v37  ;;  %v7179_v37 = vpack.c.bf16 %v5122_v41, %v5121_v0  ;;  %7178 = vmatprep.subr.bf16.mxu1 %v7177_v15  ;;  %v7216_v0 = vpack.c.bf16 %v5235_v28, %v5234_v42  ;;  %v5236_v15 = vld [vmem:[#allocation23 + $0x30] sm:$0xff]  ;;  %v5237_v41 = vld [vmem:[#allocation23 + $0x38] sm:$0xff] }
0x277f   :  { %v4972_v17 = vmul.f32 1.442695, %v4971_v13  ;;  %v4978_v23 = vmul.f32 1.442695, %v4977_v5  ;;  %v7181_v13 = vpack.c.bf16 %v5140_v45, %v5139_v11  ;;  %v5142_v5 = vld [vmem:[#allocation22 + $0xa8] sm:$0xff]  ;;  %v7219_v11 = vpack.c.bf16 %v5237_v41, %v5236_v15  ;;  %v5238_v45 = vld [vmem:[#allocation23 + $0x40] sm:$0xff] }
0x2780   :  { %7456 = vpow2.f32 %v4967_v16  ;;  %v5123_v16 = vld [vmem:[#allocation22 + $0x10] sm:$0xff]  ;;  %7180 = vmatpush3.bf16.msra.mxu1 %v7179_v37  ;;  %v5239_v37 = vld [vmem:[#allocation23 + $0x48] sm:$0xff] }
0x2781   :  { %7458 = vpow2.f32 %v4972_v17  ;;  %v5124_v17 = vld [vmem:[#allocation22 + $0x18] sm:$0xff]  ;;  %7182 = vmatprep.subr.bf16.mxu1 %v7181_v13  ;;  %v7222_v13 = vpack.c.bf16 %v5239_v37, %v5238_v45 }
0x2782   :  { %7460 = vpow2.f32 %v4978_v23  ;;  %v7185_v23 = vpack.c.bf16 %v5142_v5, %v5141_v19  ;;  %v5242_v5 = vld [vmem:[#allocation23 + $0x60] sm:$0xff] }
0x2783   :  { %7462 = vtanh.f32 %v4964_v26  ;;  %v5125_v26 = vld [vmem:[#allocation22 + $0x20] sm:$0xff] }
0x278a   :  { %v7457_v24 = vpop.eup %7456 }
0x278b   :  { %v7459_v58 = vpop.eup %7458  ;;  %v4969_v30 = vadd.f32 1.0, %v7457_v24  ;;  %v5126_v24 = vld [vmem:[#allocation22 + $0x28] sm:$0xff] }
0x278c   :  { %v4974_v1 = vadd.f32 1.0, %v7459_v58  ;;  %v7461_v43 = vpop.eup %7460  ;;  %v7187_v58 = vpack.c.bf16 %v5126_v24, %v5125_v26 }
0x278d   :  { %7464 = vrcp.f32 %v4969_v30  ;;  %v7463_v18 = vpop.eup %7462  ;;  %v4980_v36 = vadd.f32 1.0, %v7461_v43 }
0x278e   :  { %7466 = vrcp.f32 %v4974_v1 }
0x278f   :  { %7468 = vrcp.f32 %v4980_v36 }
0x2797   :  { %v7465_v59 = vpop.eup %7464 }
0x2798   :  { %v7467_v31 = vpop.eup %7466  ;;  %v4983_v21 = vmul.f32 %v7465_v59, %v7463_v18  ;;  %v5143_v18 = vld [vmem:[#allocation22 + $0xb0] sm:$0xff]  ;;  %v5144_v59 = vld [vmem:[#allocation22 + $0xb8] sm:$0xff] }
0x2799   :  { %v4982_v38 = vmul.f32 %v7467_v31, %v9456_v48  ;;  %v7469_v60 = vpop.eup %7468  ;;  %v7189_v36 = vpack.c.bf16 %v5144_v59, %v5143_v18 }
0x279b   :  { %v4984_v52 = vadd.f32 %v4983_v21, %v4982_v38  ;;  %v5127_v38 = vld [vmem:[#allocation22 + $0x30] sm:$0xff] }
0x279d   :  { %7470 = vtanh.f32 %v4984_v52  ;;  %v5128_v52 = vld [vmem:[#allocation22 + $0x38] sm:$0xff] }
0x27a7   :  { %v7471_v39 = vpop.eup %7470 }
0x27a8   :  { %v9557_v34 = vmul.f32 %v7471_v39, %v7469_v60  ;;  %v7191_v60 = vpack.c.bf16 %v5128_v52, %v5127_v38  ;;  %v5145_v39 = vld [vmem:[#allocation22 + $0xc0] sm:$0xff] }
0x27aa   :  { %v4994_v40 = vrot.slane %v9557_v34, %v8637_v9 }
0x27ac   :  { %v5002_v61 = vrot.slane %v4994_v40, %v8637_v9  ;;  %v4995_v62 = vcombine.high %v4994_v40, %v4994_v40  ;;  %v5146_v40 = vld [vmem:[#allocation22 + $0xc8] sm:$0xff] }
0x27ae   :  { %v5013_v35 = vrot.slane %v5002_v61, %v8611_v50  ;;  %v5009_v51 = vrot.slane %v4995_v62, %v8637_v9  ;;  %v7193_v62 = vpack.c.bf16 %v5146_v40, %v5145_v39 }
0x27b0   :  { %v5020_v57 = vmul.f32 %v5013_v35, %v8661_v54  ;;  %v5017_v48 = vrot.slane %v5009_v51, %v8611_v50  ;;  %v5129_v35 = vld [vmem:[#allocation22 + $0x40] sm:$0xff]  ;;  %v5130_v51 = vld [vmem:[#allocation22 + $0x48] sm:$0xff] }
0x27b2   :  { %5022 = vadd.xlane.f32.xlu0 %v5020_v57  ;;  %v5021_v63 = vmul.f32 %v5017_v48, %v8671_v2  ;;  %v7195_v57 = vpack.c.bf16 %v5130_v51, %v5129_v35  ;;  %v5148_v48 = vld [vmem:[#allocation22 + $0xd8] sm:$0xff]  ;;  %v5370_v51 = vld [vmem:[%s9619_s18] ss:$0 sm:$0xff] }
0x27b4   :  { %5024 = vadd.xlane.f32.xlu1 %v5021_v63  ;;  %v5131_v63 = vld [vmem:[#allocation22 + $0x50] sm:$0xff] }
0x283f   :  { %v5023_v3 = vpop.xlane.xlu0 %5022 }
0x2840   :  { %v5031_v47 = vrot.slane %v5023_v3, %v10308_v7 }
0x2841   :  { %v5025_v49 = vpop.xlane.xlu1 %5024 }
0x2842   :  { %v5035_v22 = vrot.slane %v5025_v49, %v10308_v7 }
0x2844   :  { %v5036_v33 = vsel %vm1933_vm5, %v5035_v22, %v5031_v47  ;;  %v5149_v47 = vld [vmem:[#allocation22 + $0xe0] sm:$0xff]  ;;  %v5150_v22 = vld [vmem:[#allocation22 + $0xe8] sm:$0xff] }
0x2845   :  { %v5038_v14 = vsel %vm1936_vm6, %v5036_v33, -inf  ;;  %v7201_v33 = vpack.c.bf16 %v5150_v22, %v5149_v47 }
0x2846   :  { %5039 = vmax.xlane.f32.xlu1 %v5038_v14  ;;  %v5133_v14 = vld [vmem:[#allocation22 + $0x60] sm:$0xff] }
0x28d3   :  { %v5040_v9 = vpop.xlane.xlu1 %5039 }
0x28d4   :  { %v5045_v27 = vrot.slane %v5040_v9, %v8611_v50  ;;  %v5049_v55 = vrot.slane %v5040_v9, %v10054_v6  ;;  %v5134_v9 = vld [vmem:[#allocation22 + $0x68] sm:$0xff] }
0x28d6   :  { %v5052_v20 = vsub.f32 %v5023_v3, %v5045_v27  ;;  %v5053_v46 = vsub.f32 %v5025_v49, %v5049_v55  ;;  %v5132_v3 = vld [vmem:[#allocation22 + $0x58] sm:$0xff]  ;;  %v7203_v27 = vpack.c.bf16 %v5134_v9, %v5133_v14  ;;  %v5151_v55 = vld [vmem:[#allocation22 + $0xf0] sm:$0xff] }
0x28d7   :  { %v7199_v49 = vpack.c.bf16 %v5132_v3, %v5131_v63 }
0x28d8   :  { %v5054_v53 = vmul.f32 1.442695, %v5052_v20  ;;  %v5056_v12 = vmul.f32 1.442695, %v5053_v46  ;;  %v5152_v20 = vld [vmem:[#allocation22 + $0xf8] sm:$0xff] }
0x28d9   :  { %v7205_v46 = vpack.c.bf16 %v5152_v20, %v5151_v55 }
0x28da   :  { %7472 = vpow2.f32 %v5054_v53  ;;  %v5135_v53 = vld [vmem:[#allocation22 + $0x70] sm:$0xff] }
0x28db   :  { %7474 = vpow2.f32 %v5056_v12  ;;  %v5136_v12 = vld [vmem:[#allocation22 + $0x78] sm:$0xff] }
0x28e4   :  { %v7473_v10 = vpop.eup %7472 }
0x28e5   :  { %v7475_v4 = vpop.eup %7474  ;;  %5061 = vperm.xlu1 %7291, %v7473_v10  }
0x28e6   :  { %5064 = vperm.xlu0 %7290, %v7475_v4  }
0x2964   :  { %v5062_v32 = vpop.permute.xlu1 %5061 }
0x2965   :  { %v5065_v29 = vpop.permute.xlu0 %5064  ;;  %v5069_v8 = vrot.slane %v5062_v32, %v10308_v7  ;;  %v5231_v32 = vld [vmem:[#allocation23 + $0x8] sm:$0xff] }
0x2966   :  { %v5073_v56 = vrot.slane %v5065_v29, %v10308_v7  ;;  %v7183_v7 = vpack.c.bf16 %v5124_v17, %v5123_v16  ;;  %v5232_v29 = vld [vmem:[#allocation23 + $0x10] sm:$0xff]  ;;  %v5241_v17 = vld [vmem:[#allocation23 + $0x58] sm:$0xff] }
0x2967   :  { %v5240_v16 = vld [vmem:[#allocation23 + $0x50] sm:$0xff] }
0x2968   :  { %v5074_v44 = vsel %vm1933_vm5, %v5073_v56, %v5069_v8  ;;  %7184 = vmatpush3.bf16.msra.mxu1 %v7183_v7  ;;  %v7849_v8 = vmov 0.0|0.0   ;;  %v7225_v19 = vpack.c.bf16 %v5241_v17, %v5240_v16  ;;  %v5243_v7 = vld [vmem:[#allocation23 + $0x68] sm:$0xff] }
0x2969   :  { %v5076_v25 = vsel %vm1936_vm6, %v5074_v44, 0.0  ;;  %7186 = vmatprep.subr.bf16.mxu1 %v7185_v23  ;;  %7209 = vmatprep.subr.bf16.mxu0 %v7849_v8  ;;  %v5233_v44 = vld [vmem:[#allocation23 + $0x18] sm:$0xff]  ;;  %v7228_v23 = vpack.c.bf16 %v5243_v7, %v5242_v5 }
0x296a   :  { %5077 = vadd.xlane.f32.xlu1 %v5076_v25  ;;  %v7213_v25 = vpack.c.bf16 %v5233_v44, %v5232_v29 }
0x296c   :  { %7188 = vmatpush3.bf16.msra.mxu1 %v7187_v58 }
0x296d   :  { %7190 = vmatprep.subr.bf16.mxu1 %v7189_v36 }
0x2970   :  { %7192 = vmatpush3.bf16.msra.mxu1 %v7191_v60 }
0x2971   :  { %7194 = vmatprep.subr.bf16.mxu1 %v7193_v62  ;;  %v5245_v62 = vld [vmem:[#allocation23 + $0x78] sm:$0xff] }
0x2974   :  { %7196 = vmatpush3.bf16.msra.mxu1 %v7195_v57 }
0x29f7   :  { %v5078_v30 = vpop.xlane.xlu1 %5077 }
0x29f8   :  { %7476 = vrcp.f32 %v5078_v30 }
0x2a02   :  { %v7477_v1 = vpop.eup %7476 }
0x2a03   :  { %v5084_v43 = vrot.slane %v7477_v1, %v8611_v50  ;;  %v5088_v21 = vrot.slane %v7477_v1, %v10054_v6  ;;  %v5147_v50 = vld [vmem:[#allocation22 + $0xd0] sm:$0xff] }
0x2a04   :  { %v7197_v6 = vpack.c.bf16 %v5148_v48, %v5147_v50 }
0x2a05   :  { %v5091_v31 = vmul.f32 %v7473_v10, %v5084_v43  ;;  %v5092_v61 = vmul.f32 %v7475_v4, %v5088_v21  ;;  %v7207_v10 = vpack.c.bf16 %v5136_v12, %v5135_v53  ;;  %v5230_v4 = vld [vmem:[#allocation23] sm:$0xff] }
0x2a06   :  { %7198 = vmatprep.subr.bf16.mxu1 %v7197_v6  ;;  %v7210_v56 = vpack.c.bf16 %v5231_v32, %v5230_v4  ;;  %v5371_v6 = vld [vmem:[%s10309_s0] ss:$0 sm:$0xff] }
0x2a07   :  { %5095 = vperm.xlu0 %7290, %v5091_v31   ;;  %7200 = vmatpush3.bf16.msra.mxu1 %v7199_v49 }
0x2a08   :  { %7202 = vmatprep.subr.bf16.mxu1 %v7201_v33  ;;  %7211 = vmatpush3.bf16.msra.mxu0 %v7210_v56 }
0x2a09   :  { %7212 = vmatprep.subr.bf16.mxu0 %v7849_v8 }
0x2a0b   :  { %5100 = vperm.xlu0 %7290, %v5092_v61   ;;  %7204 = vmatpush3.bf16.msra.mxu1 %v7203_v27 }
0x2a0c   :  { %7206 = vmatprep.subr.bf16.mxu1 %v7205_v46  ;;  %7214 = vmatpush3.bf16.msra.mxu0 %v7213_v25 }
0x2a0d   :  { %7215 = vmatprep.subr.bf16.mxu0 %v7849_v8 }
0x2a0f   :  { %7208 = vmatpush3.bf16.msra.mxu1 %v7207_v10 }
0x2a10   :  { %7217 = vmatpush3.bf16.msra.mxu0 %v7216_v0 }
0x2a11   :  { %7218 = vmatprep.subr.bf16.mxu0 %v7849_v8 }
0x2a14   :  { %7220 = vmatpush3.bf16.msra.mxu0 %v7219_v11 }
0x2a15   :  { %7221 = vmatprep.subr.bf16.mxu0 %v7849_v8 }
0x2a18   :  { %7223 = vmatpush3.bf16.msra.mxu0 %v7222_v13 }
0x2a19   :  { %7224 = vmatprep.subr.bf16.mxu0 %v7849_v8 }
0x2a1c   :  { %7226 = vmatpush3.bf16.msra.mxu0 %v7225_v19 }
0x2a1d   :  { %7227 = vmatprep.subr.bf16.mxu0 %v7849_v8 }
0x2a20   :  { %7229 = vmatpush3.bf16.msra.mxu0 %v7228_v23 }
0x2a21   :  { %7230 = vmatprep.subr.bf16.mxu0 %v7849_v8 }
0x2a86   :  { %v5096_v26 = vpop.permute.xlu0 %5095 }
0x2a87   :  { %v5103_v24 = vmul.f32 %v5096_v26, %v8661_v54  ;;  %v5244_v54 = vld [vmem:[#allocation23 + $0x70] sm:$0xff] }
0x2a88   :  { %v7231_v35 = vpack.c.bf16 %v5245_v62, %v5244_v54 }
0x2a89   :  { %v5105_v58 = vrot.slane %v5103_v24, 4 }
0x2a8a   :  { %v5101_v30 = vpop.permute.xlu0 %5100  ;;  %7232 = vmatpush3.bf16.msra.mxu0 %v7231_v35 }
0x2a8b   :  { %v5106_v1 = vadd.f32 %v5105_v58, %v5103_v24  ;;  %v5104_v43 = vmul.f32 %v5101_v30, %v8671_v2 }
0x2a8d   :  { %v5107_v18 = vrot.slane %v5106_v1, 2  ;;  %v5111_v59 = vrot.slane %v5104_v43, 4 }
0x2a8f   :  { %v5108_v31 = vadd.f32 %v5107_v18, %v5106_v1  ;;  %v5112_v21 = vadd.f32 %v5111_v59, %v5104_v43 }
0x2a91   :  { %v5113_v36 = vrot.slane %v5112_v21, 2  ;;  %v5109_v38 = vrot.slane %v5108_v31, 1 }
0x2a93   :  { %v5114_v52 = vadd.f32 %v5113_v36, %v5112_v21  ;;  %v5110_v39 = vadd.f32 %v5109_v38, %v5108_v31 }
0x2a95   :  { %v5115_v60 = vrot.slane %v5114_v52, 1 }
0x2a97   :  { %v5116_v40 = vadd.f32 %v5115_v60, %v5114_v52 }
0x2a99   :  { %v5119_v61 = vsel %vm1933_vm5, %v5116_v40, %v5110_v39 }
0x2a9a   :  { %5224 = vmatprep.mubr.f32.mxu1 %v5119_v61 }
0x2a9b   :  { %5225 = vmatmul.mubr.f32.vlgmr.msra.gmra.mrb[26].mxu1 %v9557_v34 }
0x2b6e   :  { %v5450_v2 = vpop.f32.mrb[26].mxu1 }
0x2b6f   :  { %v5451_v57 = vpop.f32.mrb[27].mxu1 }
0x2b70   :  { %v5452_v50 = vadd.f32 %v5451_v57, %v5450_v2 }
0x2b72   :  { %v5227_v48 = vadd.f32 %v5452_v50, %v5370_v51 }
0x2b74   :  { %5595 = vmatmul.mubr.f32.vlgmr.msra.gmra.mrb[30].mxu0 %v5227_v48 }
0x2c47   :  { %v5319_v34 = vpop.f32.mrb[30].mxu0 }
0x2c48   :  { %v5320_v63 = vadd.f32 %v5371_v6, %v5319_v34  ;;  %v5596_v3 = vpop.f32.mrb[31].mxu0 }
0x2c4a   :  { %5323 = vst [vmem:[#allocation25] sm:$0x3] %v5320_v63 }
0x2c4b   :  { %7797 = shalt.err (!%p7794_p4)
}
0x2c4c   :  { %s10310_s30 = sld [smem:[#allocation124_spill]] }
0x2c52   :  { %s7798_s17 = scalar_lea.hbm %s10310_s30, 32 }
0x2c53   :  { %p7799_p5 = scmp.ne.s32.totalorder %s10310_s30, %s7798_s17  ;;  %p7802_p6 = scmp.lt.u32.totalorder %s7798_s17, %s10310_s30 }
0x2c55   :  { %p7804_p7 = pnand %p7802_p6, %p7799_p5 }
0x2c57   :  { %7807 = shalt.err (!%p7804_p7)
}
0x2c58   :  { %5333 = dma.vmem_to_hbm [thread:$0]  %s5331_s15, 32, %s10310_s30, [#allocation4]  }
0x2c59   :  { %7824 = dma.done.wait [#allocation4], 32  }
0x2c5a   :  { %7825 = vsyncadd [#allocation4], 4294967264 }
0x2c5b   :  { %5337 = vsyncpa [#allocation3], 1 }
0x2c5c   :  { %5338 = vsyncpa [#allocation6], 1 }
0x2c5d   :  { %5339 = vsyncpa [#allocation9], 1 }
0x2c5e   :  { %5340 = vsyncpa [#allocation12], 1 }
0x2c5f   :  { %5341 = vsyncpa [#allocation15], 1 }
0x2c60   :  { %5342 = vsyncpa [#allocation18], 1 }
0x2c61   :  { %5343 = vsyncpa [#allocation21], 1 }
0x2c62   :  { %5344 = vsyncpa [#allocation24], 1 }
0x2c63   :  { %5345 = vsyncpa [#allocation4], 1 }

</bundles_post_ra>
